<compile_context>
chip_gen: v6e
topology: v6e:2x2x1
jax: 0.10.0
libtpu: 0.0.40
codegen_flags: <defaults>
</compile_context>

<pallas_src>
import functools

import jax
import jax.numpy as jnp
from jax.experimental import pallas as pl
from jax.experimental.pallas import tpu as pltpu


GP = 128              # gate pitch: each gate gets its own 128-lane block
NGATE = 4             # column blocks: r | z | n_input | n_hidden
WCOLS = NGATE * GP    # packed weight lane width (512)

_VMEM = pl.BlockSpec(memory_space=pltpu.MemorySpace.VMEM)


# --------------------------------------------------------------------------- kernel
def _gru_update(g, h):
    """PyTorch GRU cell update from fused pre-activations.

    g: (B, 4*GP) f32, all biases already folded in.  Column blocks (each 128
    lanes, gate values in the low `hid` lanes, zeros elsewhere):
      [r_i+r_h | z_i+z_h | n_i | n_h]
    h: (B, GP) f32 zero-padded hidden state.  Padded lanes stay exactly zero.
    """
    r = jax.nn.sigmoid(g[:, 0 * GP:1 * GP])
    z = jax.nn.sigmoid(g[:, 1 * GP:2 * GP])
    n = jnp.tanh(g[:, 2 * GP:3 * GP] + r * g[:, 3 * GP:4 * GP])
    return (1.0 - z) * n + z * h


def _seq2seq_kernel(x_ref, w_ref, b_ref, out_ref, *, seq_len, batch, num_layers,
                    offs, bias_rows, apply_bridge):
    T, B, L = seq_len, batch, num_layers
    f32 = jnp.float32

    def wdot(lhs, row_off, rows, cols=WCOLS):
        # bf16 operands -> single-pass MXU, f32 accumulation.
        return jnp.dot(lhs.astype(jnp.bfloat16),
                       w_ref[row_off:row_off + rows, 0:cols],
                       preferred_element_type=f32)

    def bias_bcast(row):
        # Hoisted (B, WCOLS) bias broadcast, reused across the unrolled loop.
        return jnp.broadcast_to(b_ref[row:row + 1, :], (B, WCOLS))

    # ---- encoder ------------------------------------------------------------
    # Layer-0 input projection for ALL T steps in one off-chain matmul
    # (its combined bias folded in once).
    e0 = bias_rows["enc"][0]
    gi0 = wdot(x_ref[...], offs["enc_wi0"], GP) + b_ref[e0:e0 + 1, :]
    enc_b = [bias_bcast(bias_rows["enc"][l]) for l in range(1, L)]

    enc_h = [jnp.zeros((B, GP), f32) for _ in range(L)]
    for t in range(T):
        g = gi0[t * B:(t + 1) * B, :] + wdot(enc_h[0], offs["enc_whh0"], GP)
        enc_h[0] = _gru_update(g, enc_h[0])
        for l in range(1, L):
            u = jnp.concatenate([enc_h[l - 1], enc_h[l]], axis=1)
            g = wdot(u, offs["enc_fused"][l - 1], 2 * GP) + enc_b[l - 1]
            enc_h[l] = _gru_update(g, enc_h[l])
    # encoder_outputs are never consumed downstream; not materialized.

    # ---- hidden bridge (rnn_lr); reference applies it only when H != O ------
    if apply_bridge:
        u = jnp.concatenate(enc_h, axis=1) if L > 1 else enc_h[0]
        br = bias_rows["bridge"]
        flat = wdot(u, offs["bridge"], L * GP, cols=L * GP) \
            + b_ref[br:br + 1, 0:L * GP]
        dec_h = [flat[:, l * GP:(l + 1) * GP] for l in range(L)]
    else:
        dec_h = list(enc_h)

    # ---- decoder (input is identically zero -> no input matmul anywhere) ----
    dec_b = [bias_bcast(bias_rows["dec"][l]) for l in range(L)]
    outs = []
    for t in range(T):
        g = wdot(dec_h[0], offs["dec_whh0"], GP) + dec_b[0]
        dec_h[0] = _gru_update(g, dec_h[0])
        for l in range(1, L):
            u = jnp.concatenate([dec_h[l - 1], dec_h[l]], axis=1)
            g = wdot(u, offs["dec_fused"][l - 1], 2 * GP) + dec_b[l]
            dec_h[l] = _gru_update(g, dec_h[l])
        outs.append(dec_h[L - 1])

    # Single dense lane-wide store (T*B, 128); wrapper slices back to (T,B,O).
    out_ref[...] = jnp.concatenate(outs, axis=0) if T > 1 else outs[0]


# --------------------------------------------------------------------------- params
def init_gru_params(key, input_size, hidden_size, num_layers):
    """PyTorch-layout GRU stack: w_ih (3H,in), w_hh (3H,H), b_* (3H,)."""
    layers = []
    scale = 1.0 / float(hidden_size) ** 0.5
    for l in range(num_layers):
        in_sz = input_size if l == 0 else hidden_size
        key, k1, k2, k3, k4 = jax.random.split(key, 5)
        layers.append(dict(
            w_ih=jax.random.normal(k1, (3 * hidden_size, in_sz), jnp.float32) * scale,
            w_hh=jax.random.normal(k2, (3 * hidden_size, hidden_size), jnp.float32) * scale,
            b_ih=jax.random.uniform(k3, (3 * hidden_size,), jnp.float32, -scale, scale),
            b_hh=jax.random.uniform(k4, (3 * hidden_size,), jnp.float32, -scale, scale),
        ))
    return layers, key


def init_seq2seq_params(key, input_dim, hidden_dim, output_dim, num_layers, seq_len):
    enc, key = init_gru_params(key, input_dim, hidden_dim, num_layers)
    dec, key = init_gru_params(key, hidden_dim, output_dim, num_layers)
    key, kw, kb = jax.random.split(key, 3)
    lr_scale = 1.0 / float(hidden_dim * num_layers) ** 0.5
    return dict(
        input_dim=input_dim, hidden_dim=hidden_dim, output_dim=output_dim,
        num_layers=num_layers, seq_len=seq_len, encoder=enc, decoder=dec,
        rnn_lr_w=jax.random.normal(
            kw, (output_dim * num_layers, hidden_dim * num_layers),
            jnp.float32) * lr_scale,
        rnn_lr_b=jax.random.uniform(
            kb, (output_dim * num_layers,), jnp.float32, -lr_scale, lr_scale),
    )


# --------------------------------------------------------------------------- packing
def _pack_in_w(w_ih_t, hid, rows_pad):
    """Input-half weight block: gates (r,z,n_i) -> column blocks (0,1,2)."""
    iw = w_ih_t.shape[0]
    assert iw <= rows_pad and hid <= GP
    blk = jnp.zeros((rows_pad, WCOLS), jnp.float32)
    for g, dst in ((0, 0), (1, 1), (2, 2)):
        blk = blk.at[:iw, dst * GP:dst * GP + hid].set(w_ih_t[:, g * hid:(g + 1) * hid])
    return blk


def _pack_hid_w(w_hh_t, hid, rows_pad):
    """Hidden-half weight block: gates (r,z,n_h) -> column blocks (0,1,3)."""
    assert hid <= rows_pad and hid <= GP
    blk = jnp.zeros((rows_pad, WCOLS), jnp.float32)
    for g, dst in ((0, 0), (1, 1), (2, 3)):
        blk = blk.at[:hid, dst * GP:dst * GP + hid].set(w_hh_t[:, g * hid:(g + 1) * hid])
    return blk


def _pack_bias(b_ih, b_hh, hid):
    """Combined bias row: [b_ir+b_hr | b_iz+b_hz | b_in | b_hn] at gate pitch."""
    row = jnp.zeros((WCOLS,), jnp.float32)
    row = row.at[0 * GP:0 * GP + hid].set(b_ih[0 * hid:1 * hid] + b_hh[0 * hid:1 * hid])
    row = row.at[1 * GP:1 * GP + hid].set(b_ih[1 * hid:2 * hid] + b_hh[1 * hid:2 * hid])
    row = row.at[2 * GP:2 * GP + hid].set(b_ih[2 * hid:3 * hid])
    row = row.at[3 * GP:3 * GP + hid].set(b_hh[2 * hid:3 * hid])
    return row


def pack_seq2seq_params(params):
    """Pack everything into ONE bf16 weight slab + one small f32 bias slab."""
    L, H, O, I = (params["num_layers"], params["hidden_dim"],
                  params["output_dim"], params["input_dim"])
    assert I <= GP and H <= GP and O <= GP, "dims above 128 lanes not supported"
    apply_bridge = (H != O)
    if apply_bridge:
        assert L * GP <= WCOLS, "bridge packing assumes num_layers <= 4"

    enc, dec = params["encoder"], params["decoder"]
    blocks, row = [], [0]
    offs = {"enc_fused": [], "dec_fused": []}

    def add(blk):
        off = row[0]
        blocks.append(blk)
        row[0] += blk.shape[0]
        return off

    # encoder layer 0: separate input-projection block (used pre-loop) + hidden block
    offs["enc_wi0"] = add(_pack_in_w(enc[0]["w_ih"].T, H, GP))
    offs["enc_whh0"] = add(_pack_hid_w(enc[0]["w_hh"].T, H, GP))
    # encoder layers >= 1: fused [input-half ; hidden-half] (2*GP rows)
    for l in range(1, L):
        off = add(_pack_in_w(enc[l]["w_ih"].T, H, GP))
        add(_pack_hid_w(enc[l]["w_hh"].T, H, GP))
        offs["enc_fused"].append(off)
    # rnn_lr bridge: rows at layer pitch GP, cols at layer pitch GP
    if apply_bridge:
        wt = params["rnn_lr_w"].T                      # (L*H, L*O)
        bw = jnp.zeros((L * GP, WCOLS), jnp.float32)
        for li in range(L):
            for lo in range(L):
                bw = bw.at[li * GP:li * GP + H, lo * GP:lo * GP + O].set(
                    wt[li * H:(li + 1) * H, lo * O:(lo + 1) * O])
        offs["bridge"] = add(bw)
    # decoder layer 0: hidden block only (decoder input is identically zero)
    offs["dec_whh0"] = add(_pack_hid_w(dec[0]["w_hh"].T, O, GP))
    for l in range(1, L):
        off = add(_pack_in_w(dec[l]["w_ih"].T, O, GP))
        add(_pack_hid_w(dec[l]["w_hh"].T, O, GP))
        offs["dec_fused"].append(off)

    w_packed = jnp.concatenate(blocks, axis=0).astype(jnp.bfloat16)

    # biases: one f32 row per cell (+ bridge), padded to 8 rows
    bias_rows = {"enc": [], "dec": []}
    rows = []
    for l in range(L):
        bias_rows["enc"].append(len(rows))
        rows.append(_pack_bias(enc[l]["b_ih"], enc[l]["b_hh"], H))
    if apply_bridge:
        bias_rows["bridge"] = len(rows)
        br = jnp.zeros((WCOLS,), jnp.float32)
        for lo in range(L):
            br = br.at[lo * GP:lo * GP + O].set(
                params["rnn_lr_b"][lo * O:(lo + 1) * O])
        rows.append(br)
    for l in range(L):
        bias_rows["dec"].append(len(rows))
        rows.append(_pack_bias(dec[l]["b_ih"], dec[l]["b_hh"], O))
    rows += [jnp.zeros((WCOLS,), jnp.float32)] * ((-len(rows)) % 8)
    b_packed = jnp.stack(rows, axis=0)

    meta = dict(offs=offs, bias_rows=bias_rows, apply_bridge=apply_bridge,
                num_layers=L, hidden_dim=H, output_dim=O, input_dim=I)
    return w_packed, b_packed, meta


# --------------------------------------------------------------------------- forward
def seq2seq_forward(w_packed, b_packed, meta, encoder_inputs):
    """Mirrors Seq2seq.forward (GRU/GRU) with ONE fused pallas_call.

    encoder_inputs: (T, B, input_dim) f32 -> (T, B, output_dim) f32.
    """
    T, B, I = encoder_inputs.shape
    L, O = meta["num_layers"], meta["output_dim"]

    # Layout plumbing only: flatten time into rows, zero-pad lanes to GP.
    x = encoder_inputs.reshape(T * B, I)
    if I < GP:
        x = jnp.pad(x, ((0, 0), (0, GP - I)))

    kernel = functools.partial(
        _seq2seq_kernel, seq_len=T, batch=B, num_layers=L,
        offs=meta["offs"], bias_rows=meta["bias_rows"],
        apply_bridge=meta["apply_bridge"])

    out = pl.pallas_call(
        kernel,
        out_shape=jax.ShapeDtypeStruct((T * B, GP), jnp.float32),
        in_specs=[_VMEM, _VMEM, _VMEM],
        out_specs=_VMEM,
    )(x, w_packed, b_packed)

    return out[:, :O].reshape(T, B, O)


# --------------------------------------------------------------------------- main
if __name__ == "__main__":
    # Shapes consistent with the module: seq_len=3, input_dim=8, hidden_dim=16,
    # output_dim=12, num_layers=2.  batch=8 fills the sublanes (free speedup).
    INPUT_DIM, HIDDEN_DIM, OUTPUT_DIM, NUM_LAYERS, SEQ_LEN, BATCH = 8, 16, 12, 2, 3, 8

    key = jax.random.PRNGKey(0)
    key, k_in = jax.random.split(key)
    params = init_seq2seq_params(key, INPUT_DIM, HIDDEN_DIM, OUTPUT_DIM,
                                 NUM_LAYERS, SEQ_LEN)
    w_packed, b_packed, meta = pack_seq2seq_params(params)

    encoder_inputs = jax.random.normal(
        k_in, (SEQ_LEN, BATCH, INPUT_DIM), jnp.float32)

    fwd = jax.jit(functools.partial(seq2seq_forward, w_packed, b_packed, meta))
    out = jax.block_until_ready(fwd(encoder_inputs))
    assert out.shape == (SEQ_LEN, BATCH, OUTPUT_DIM), out.shape
    assert out.dtype == jnp.float32
    print("KERNEL_OK")
</pallas_src>

<mosaic_0001>
module attributes {stable_mosaic.version = 11 : i64} {
  func.func @_seq2seq_kernel(%arg0: memref<24x128xf32, #tpu.memory_space<vmem>>, %arg1: memref<1152x512xbf16, #tpu.memory_space<vmem>>, %arg2: memref<8x512xf32, #tpu.memory_space<vmem>>, %arg3: memref<24x128xf32, #tpu.memory_space<vmem>>) attributes {dimension_semantics = [], scalar_prefetch = 0 : i64, scratch_operands = 0 : i64, tpu.core_type = #tpu.core_type<tc>} {
    %c0 = arith.constant 0 : index
    %c0_0 = arith.constant 0 : index
    %0 = vector.load %arg0[%c0, %c0_0] : memref<24x128xf32, #tpu.memory_space<vmem>>, vector<24x128xf32>
    %1 = arith.truncf %0 : vector<24x128xf32> to vector<24x128xbf16>
    %c0_1 = arith.constant 0 : index
    %c0_2 = arith.constant 0 : index
    %2 = vector.load %arg1[%c0_1, %c0_2] : memref<1152x512xbf16, #tpu.memory_space<vmem>>, vector<128x512xbf16>
    %cst = arith.constant dense<0.000000e+00> : vector<24x512xf32>
    %3 = tpu.matmul %1, %2, %cst {dimension_numbers = #tpu.dot_dimension_numbers<[1], [0], [0], [1], [0, 0, 1, 1], [], []>} : vector<24x128xbf16>, vector<128x512xbf16>, vector<24x512xf32> -> vector<24x512xf32>
    %c0_3 = arith.constant 0 : index
    %c0_4 = arith.constant 0 : index
    %4 = vector.load %arg2[%c0_3, %c0_4] : memref<8x512xf32, #tpu.memory_space<vmem>>, vector<1x512xf32>
    %5 = vector.broadcast %4 : vector<1x512xf32> to vector<24x512xf32>
    %6 = arith.addf %3, %5 : vector<24x512xf32>
    %c1 = arith.constant 1 : index
    %c0_5 = arith.constant 0 : index
    %7 = vector.load %arg2[%c1, %c0_5] : memref<8x512xf32, #tpu.memory_space<vmem>>, vector<1x512xf32>
    %8 = vector.shape_cast %7 : vector<1x512xf32> to vector<1x512xf32>
    %9 = vector.broadcast %8 : vector<1x512xf32> to vector<8x512xf32>
    %cst_6 = arith.constant 0.000000e+00 : f32
    %10 = vector.broadcast %cst_6 : f32 to vector<8x128xf32>
    %cst_7 = arith.constant 0.000000e+00 : f32
    %11 = vector.broadcast %cst_7 : f32 to vector<8x128xf32>
    %12 = vector.extract_strided_slice %6 {offsets = [0, 0], sizes = [8, 512], strides = [1, 1]} : vector<24x512xf32> to vector<8x512xf32>
    %13 = arith.truncf %10 : vector<8x128xf32> to vector<8x128xbf16>
    %c128 = arith.constant 128 : index
    %c0_8 = arith.constant 0 : index
    %14 = vector.load %arg1[%c128, %c0_8] : memref<1152x512xbf16, #tpu.memory_space<vmem>>, vector<128x512xbf16>
    %cst_9 = arith.constant dense<0.000000e+00> : vector<8x512xf32>
    %15 = tpu.matmul %13, %14, %cst_9 {dimension_numbers = #tpu.dot_dimension_numbers<[1], [0], [0], [1], [0, 0, 1, 1], [], []>} : vector<8x128xbf16>, vector<128x512xbf16>, vector<8x512xf32> -> vector<8x512xf32>
    %16 = arith.addf %12, %15 : vector<8x512xf32>
    %17 = vector.extract_strided_slice %16 {offsets = [0, 0], sizes = [8, 128], strides = [1, 1]} : vector<8x512xf32> to vector<8x128xf32>
    %18 = arith.negf %17 : vector<8x128xf32>
    %19 = math.exp %18 : vector<8x128xf32>
    %cst_10 = arith.constant 1.000000e+00 : f32
    %20 = vector.broadcast %cst_10 : f32 to vector<8x128xf32>
    %21 = arith.addf %20, %19 : vector<8x128xf32>
    %22 = arith.divf %20, %21 : vector<8x128xf32>
    %23 = vector.extract_strided_slice %16 {offsets = [0, 128], sizes = [8, 128], strides = [1, 1]} : vector<8x512xf32> to vector<8x128xf32>
    %24 = arith.negf %23 : vector<8x128xf32>
    %25 = math.exp %24 : vector<8x128xf32>
    %cst_11 = arith.constant 1.000000e+00 : f32
    %26 = vector.broadcast %cst_11 : f32 to vector<8x128xf32>
    %27 = arith.addf %26, %25 : vector<8x128xf32>
    %28 = arith.divf %26, %27 : vector<8x128xf32>
    %29 = vector.extract_strided_slice %16 {offsets = [0, 256], sizes = [8, 128], strides = [1, 1]} : vector<8x512xf32> to vector<8x128xf32>
    %30 = vector.extract_strided_slice %16 {offsets = [0, 384], sizes = [8, 128], strides = [1, 1]} : vector<8x512xf32> to vector<8x128xf32>
    %31 = arith.mulf %22, %30 : vector<8x128xf32>
    %32 = arith.addf %29, %31 : vector<8x128xf32>
    %33 = math.tanh %32 : vector<8x128xf32>
    %cst_12 = arith.constant 1.000000e+00 : f32
    %34 = vector.broadcast %cst_12 : f32 to vector<8x128xf32>
    %35 = arith.subf %34, %28 : vector<8x128xf32>
    %36 = arith.mulf %35, %33 : vector<8x128xf32>
    %37 = arith.mulf %28, %10 : vector<8x128xf32>
    %38 = arith.addf %36, %37 : vector<8x128xf32>
    %39 = tpu.concatenate %38, %11 in 1 : vector<8x128xf32>, vector<8x128xf32> -> vector<8x256xf32>
    %40 = arith.truncf %39 : vector<8x256xf32> to vector<8x256xbf16>
    %c256 = arith.constant 256 : index
    %c0_13 = arith.constant 0 : index
    %41 = vector.load %arg1[%c256, %c0_13] : memref<1152x512xbf16, #tpu.memory_space<vmem>>, vector<256x512xbf16>
    %cst_14 = arith.constant dense<0.000000e+00> : vector<8x512xf32>
    %42 = tpu.matmul %40, %41, %cst_14 {dimension_numbers = #tpu.dot_dimension_numbers<[1], [0], [0], [1], [0, 0, 1, 1], [], []>} : vector<8x256xbf16>, vector<256x512xbf16>, vector<8x512xf32> -> vector<8x512xf32>
    %43 = arith.addf %42, %9 : vector<8x512xf32>
    %44 = vector.extract_strided_slice %43 {offsets = [0, 0], sizes = [8, 128], strides = [1, 1]} : vector<8x512xf32> to vector<8x128xf32>
    %45 = arith.negf %44 : vector<8x128xf32>
    %46 = math.exp %45 : vector<8x128xf32>
    %cst_15 = arith.constant 1.000000e+00 : f32
    %47 = vector.broadcast %cst_15 : f32 to vector<8x128xf32>
    %48 = arith.addf %47, %46 : vector<8x128xf32>
    %49 = arith.divf %47, %48 : vector<8x128xf32>
    %50 = vector.extract_strided_slice %43 {offsets = [0, 128], sizes = [8, 128], strides = [1, 1]} : vector<8x512xf32> to vector<8x128xf32>
    %51 = arith.negf %50 : vector<8x128xf32>
    %52 = math.exp %51 : vector<8x128xf32>
    %cst_16 = arith.constant 1.000000e+00 : f32
    %53 = vector.broadcast %cst_16 : f32 to vector<8x128xf32>
    %54 = arith.addf %53, %52 : vector<8x128xf32>
    %55 = arith.divf %53, %54 : vector<8x128xf32>
    %56 = vector.extract_strided_slice %43 {offsets = [0, 256], sizes = [8, 128], strides = [1, 1]} : vector<8x512xf32> to vector<8x128xf32>
    %57 = vector.extract_strided_slice %43 {offsets = [0, 384], sizes = [8, 128], strides = [1, 1]} : vector<8x512xf32> to vector<8x128xf32>
    %58 = arith.mulf %49, %57 : vector<8x128xf32>
    %59 = arith.addf %56, %58 : vector<8x128xf32>
    %60 = math.tanh %59 : vector<8x128xf32>
    %cst_17 = arith.constant 1.000000e+00 : f32
    %61 = vector.broadcast %cst_17 : f32 to vector<8x128xf32>
    %62 = arith.subf %61, %55 : vector<8x128xf32>
    %63 = arith.mulf %62, %60 : vector<8x128xf32>
    %64 = arith.mulf %55, %11 : vector<8x128xf32>
    %65 = arith.addf %63, %64 : vector<8x128xf32>
    %66 = vector.extract_strided_slice %6 {offsets = [8, 0], sizes = [8, 512], strides = [1, 1]} : vector<24x512xf32> to vector<8x512xf32>
    %67 = arith.truncf %38 : vector<8x128xf32> to vector<8x128xbf16>
    %c128_18 = arith.constant 128 : index
    %c0_19 = arith.constant 0 : index
    %68 = vector.load %arg1[%c128_18, %c0_19] : memref<1152x512xbf16, #tpu.memory_space<vmem>>, vector<128x512xbf16>
    %cst_20 = arith.constant dense<0.000000e+00> : vector<8x512xf32>
    %69 = tpu.matmul %67, %68, %cst_20 {dimension_numbers = #tpu.dot_dimension_numbers<[1], [0], [0], [1], [0, 0, 1, 1], [], []>} : vector<8x128xbf16>, vector<128x512xbf16>, vector<8x512xf32> -> vector<8x512xf32>
    %70 = arith.addf %66, %69 : vector<8x512xf32>
    %71 = vector.extract_strided_slice %70 {offsets = [0, 0], sizes = [8, 128], strides = [1, 1]} : vector<8x512xf32> to vector<8x128xf32>
    %72 = arith.negf %71 : vector<8x128xf32>
    %73 = math.exp %72 : vector<8x128xf32>
    %cst_21 = arith.constant 1.000000e+00 : f32
    %74 = vector.broadcast %cst_21 : f32 to vector<8x128xf32>
    %75 = arith.addf %74, %73 : vector<8x128xf32>
    %76 = arith.divf %74, %75 : vector<8x128xf32>
    %77 = vector.extract_strided_slice %70 {offsets = [0, 128], sizes = [8, 128], strides = [1, 1]} : vector<8x512xf32> to vector<8x128xf32>
    %78 = arith.negf %77 : vector<8x128xf32>
    %79 = math.exp %78 : vector<8x128xf32>
    %cst_22 = arith.constant 1.000000e+00 : f32
    %80 = vector.broadcast %cst_22 : f32 to vector<8x128xf32>
    %81 = arith.addf %80, %79 : vector<8x128xf32>
    %82 = arith.divf %80, %81 : vector<8x128xf32>
    %83 = vector.extract_strided_slice %70 {offsets = [0, 256], sizes = [8, 128], strides = [1, 1]} : vector<8x512xf32> to vector<8x128xf32>
    %84 = vector.extract_strided_slice %70 {offsets = [0, 384], sizes = [8, 128], strides = [1, 1]} : vector<8x512xf32> to vector<8x128xf32>
    %85 = arith.mulf %76, %84 : vector<8x128xf32>
    %86 = arith.addf %83, %85 : vector<8x128xf32>
    %87 = math.tanh %86 : vector<8x128xf32>
    %cst_23 = arith.constant 1.000000e+00 : f32
    %88 = vector.broadcast %cst_23 : f32 to vector<8x128xf32>
    %89 = arith.subf %88, %82 : vector<8x128xf32>
    %90 = arith.mulf %89, %87 : vector<8x128xf32>
    %91 = arith.mulf %82, %38 : vector<8x128xf32>
    %92 = arith.addf %90, %91 : vector<8x128xf32>
    %93 = tpu.concatenate %92, %65 in 1 : vector<8x128xf32>, vector<8x128xf32> -> vector<8x256xf32>
    %94 = arith.truncf %93 : vector<8x256xf32> to vector<8x256xbf16>
    %c256_24 = arith.constant 256 : index
    %c0_25 = arith.constant 0 : index
    %95 = vector.load %arg1[%c256_24, %c0_25] : memref<1152x512xbf16, #tpu.memory_space<vmem>>, vector<256x512xbf16>
    %cst_26 = arith.constant dense<0.000000e+00> : vector<8x512xf32>
    %96 = tpu.matmul %94, %95, %cst_26 {dimension_numbers = #tpu.dot_dimension_numbers<[1], [0], [0], [1], [0, 0, 1, 1], [], []>} : vector<8x256xbf16>, vector<256x512xbf16>, vector<8x512xf32> -> vector<8x512xf32>
    %97 = arith.addf %96, %9 : vector<8x512xf32>
    %98 = vector.extract_strided_slice %97 {offsets = [0, 0], sizes = [8, 128], strides = [1, 1]} : vector<8x512xf32> to vector<8x128xf32>
    %99 = arith.negf %98 : vector<8x128xf32>
    %100 = math.exp %99 : vector<8x128xf32>
    %cst_27 = arith.constant 1.000000e+00 : f32
    %101 = vector.broadcast %cst_27 : f32 to vector<8x128xf32>
    %102 = arith.addf %101, %100 : vector<8x128xf32>
    %103 = arith.divf %101, %102 : vector<8x128xf32>
    %104 = vector.extract_strided_slice %97 {offsets = [0, 128], sizes = [8, 128], strides = [1, 1]} : vector<8x512xf32> to vector<8x128xf32>
    %105 = arith.negf %104 : vector<8x128xf32>
    %106 = math.exp %105 : vector<8x128xf32>
    %cst_28 = arith.constant 1.000000e+00 : f32
    %107 = vector.broadcast %cst_28 : f32 to vector<8x128xf32>
    %108 = arith.addf %107, %106 : vector<8x128xf32>
    %109 = arith.divf %107, %108 : vector<8x128xf32>
    %110 = vector.extract_strided_slice %97 {offsets = [0, 256], sizes = [8, 128], strides = [1, 1]} : vector<8x512xf32> to vector<8x128xf32>
    %111 = vector.extract_strided_slice %97 {offsets = [0, 384], sizes = [8, 128], strides = [1, 1]} : vector<8x512xf32> to vector<8x128xf32>
    %112 = arith.mulf %103, %111 : vector<8x128xf32>
    %113 = arith.addf %110, %112 : vector<8x128xf32>
    %114 = math.tanh %113 : vector<8x128xf32>
    %cst_29 = arith.constant 1.000000e+00 : f32
    %115 = vector.broadcast %cst_29 : f32 to vector<8x128xf32>
    %116 = arith.subf %115, %109 : vector<8x128xf32>
    %117 = arith.mulf %116, %114 : vector<8x128xf32>
    %118 = arith.mulf %109, %65 : vector<8x128xf32>
    %119 = arith.addf %117, %118 : vector<8x128xf32>
    %120 = vector.extract_strided_slice %6 {offsets = [16, 0], sizes = [8, 512], strides = [1, 1]} : vector<24x512xf32> to vector<8x512xf32>
    %121 = arith.truncf %92 : vector<8x128xf32> to vector<8x128xbf16>
    %c128_30 = arith.constant 128 : index
    %c0_31 = arith.constant 0 : index
    %122 = vector.load %arg1[%c128_30, %c0_31] : memref<1152x512xbf16, #tpu.memory_space<vmem>>, vector<128x512xbf16>
    %cst_32 = arith.constant dense<0.000000e+00> : vector<8x512xf32>
    %123 = tpu.matmul %121, %122, %cst_32 {dimension_numbers = #tpu.dot_dimension_numbers<[1], [0], [0], [1], [0, 0, 1, 1], [], []>} : vector<8x128xbf16>, vector<128x512xbf16>, vector<8x512xf32> -> vector<8x512xf32>
    %124 = arith.addf %120, %123 : vector<8x512xf32>
    %125 = vector.extract_strided_slice %124 {offsets = [0, 0], sizes = [8, 128], strides = [1, 1]} : vector<8x512xf32> to vector<8x128xf32>
    %126 = arith.negf %125 : vector<8x128xf32>
    %127 = math.exp %126 : vector<8x128xf32>
    %cst_33 = arith.constant 1.000000e+00 : f32
    %128 = vector.broadcast %cst_33 : f32 to vector<8x128xf32>
    %129 = arith.addf %128, %127 : vector<8x128xf32>
    %130 = arith.divf %128, %129 : vector<8x128xf32>
    %131 = vector.extract_strided_slice %124 {offsets = [0, 128], sizes = [8, 128], strides = [1, 1]} : vector<8x512xf32> to vector<8x128xf32>
    %132 = arith.negf %131 : vector<8x128xf32>
    %133 = math.exp %132 : vector<8x128xf32>
    %cst_34 = arith.constant 1.000000e+00 : f32
    %134 = vector.broadcast %cst_34 : f32 to vector<8x128xf32>
    %135 = arith.addf %134, %133 : vector<8x128xf32>
    %136 = arith.divf %134, %135 : vector<8x128xf32>
    %137 = vector.extract_strided_slice %124 {offsets = [0, 256], sizes = [8, 128], strides = [1, 1]} : vector<8x512xf32> to vector<8x128xf32>
    %138 = vector.extract_strided_slice %124 {offsets = [0, 384], sizes = [8, 128], strides = [1, 1]} : vector<8x512xf32> to vector<8x128xf32>
    %139 = arith.mulf %130, %138 : vector<8x128xf32>
    %140 = arith.addf %137, %139 : vector<8x128xf32>
    %141 = math.tanh %140 : vector<8x128xf32>
    %cst_35 = arith.constant 1.000000e+00 : f32
    %142 = vector.broadcast %cst_35 : f32 to vector<8x128xf32>
    %143 = arith.subf %142, %136 : vector<8x128xf32>
    %144 = arith.mulf %143, %141 : vector<8x128xf32>
    %145 = arith.mulf %136, %92 : vector<8x128xf32>
    %146 = arith.addf %144, %145 : vector<8x128xf32>
    %147 = tpu.concatenate %146, %119 in 1 : vector<8x128xf32>, vector<8x128xf32> -> vector<8x256xf32>
    %148 = arith.truncf %147 : vector<8x256xf32> to vector<8x256xbf16>
    %c256_36 = arith.constant 256 : index
    %c0_37 = arith.constant 0 : index
    %149 = vector.load %arg1[%c256_36, %c0_37] : memref<1152x512xbf16, #tpu.memory_space<vmem>>, vector<256x512xbf16>
    %cst_38 = arith.constant dense<0.000000e+00> : vector<8x512xf32>
    %150 = tpu.matmul %148, %149, %cst_38 {dimension_numbers = #tpu.dot_dimension_numbers<[1], [0], [0], [1], [0, 0, 1, 1], [], []>} : vector<8x256xbf16>, vector<256x512xbf16>, vector<8x512xf32> -> vector<8x512xf32>
    %151 = arith.addf %150, %9 : vector<8x512xf32>
    %152 = vector.extract_strided_slice %151 {offsets = [0, 0], sizes = [8, 128], strides = [1, 1]} : vector<8x512xf32> to vector<8x128xf32>
    %153 = arith.negf %152 : vector<8x128xf32>
    %154 = math.exp %153 : vector<8x128xf32>
    %cst_39 = arith.constant 1.000000e+00 : f32
    %155 = vector.broadcast %cst_39 : f32 to vector<8x128xf32>
    %156 = arith.addf %155, %154 : vector<8x128xf32>
    %157 = arith.divf %155, %156 : vector<8x128xf32>
    %158 = vector.extract_strided_slice %151 {offsets = [0, 128], sizes = [8, 128], strides = [1, 1]} : vector<8x512xf32> to vector<8x128xf32>
    %159 = arith.negf %158 : vector<8x128xf32>
    %160 = math.exp %159 : vector<8x128xf32>
    %cst_40 = arith.constant 1.000000e+00 : f32
    %161 = vector.broadcast %cst_40 : f32 to vector<8x128xf32>
    %162 = arith.addf %161, %160 : vector<8x128xf32>
    %163 = arith.divf %161, %162 : vector<8x128xf32>
    %164 = vector.extract_strided_slice %151 {offsets = [0, 256], sizes = [8, 128], strides = [1, 1]} : vector<8x512xf32> to vector<8x128xf32>
    %165 = vector.extract_strided_slice %151 {offsets = [0, 384], sizes = [8, 128], strides = [1, 1]} : vector<8x512xf32> to vector<8x128xf32>
    %166 = arith.mulf %157, %165 : vector<8x128xf32>
    %167 = arith.addf %164, %166 : vector<8x128xf32>
    %168 = math.tanh %167 : vector<8x128xf32>
    %cst_41 = arith.constant 1.000000e+00 : f32
    %169 = vector.broadcast %cst_41 : f32 to vector<8x128xf32>
    %170 = arith.subf %169, %163 : vector<8x128xf32>
    %171 = arith.mulf %170, %168 : vector<8x128xf32>
    %172 = arith.mulf %163, %119 : vector<8x128xf32>
    %173 = arith.addf %171, %172 : vector<8x128xf32>
    %174 = tpu.concatenate %146, %173 in 1 : vector<8x128xf32>, vector<8x128xf32> -> vector<8x256xf32>
    %175 = arith.truncf %174 : vector<8x256xf32> to vector<8x256xbf16>
    %c512 = arith.constant 512 : index
    %c0_42 = arith.constant 0 : index
    %176 = vector.load %arg1[%c512, %c0_42] : memref<1152x512xbf16, #tpu.memory_space<vmem>>, vector<256x256xbf16>
    %cst_43 = arith.constant dense<0.000000e+00> : vector<8x256xf32>
    %177 = tpu.matmul %175, %176, %cst_43 {dimension_numbers = #tpu.dot_dimension_numbers<[1], [0], [0], [1], [0, 0, 1, 1], [], []>} : vector<8x256xbf16>, vector<256x256xbf16>, vector<8x256xf32> -> vector<8x256xf32>
    %c2 = arith.constant 2 : index
    %c0_44 = arith.constant 0 : index
    %178 = vector.load %arg2[%c2, %c0_44] : memref<8x512xf32, #tpu.memory_space<vmem>>, vector<1x256xf32>
    %179 = vector.broadcast %178 : vector<1x256xf32> to vector<8x256xf32>
    %180 = arith.addf %177, %179 : vector<8x256xf32>
    %181 = vector.extract_strided_slice %180 {offsets = [0, 0], sizes = [8, 128], strides = [1, 1]} : vector<8x256xf32> to vector<8x128xf32>
    %182 = vector.extract_strided_slice %180 {offsets = [0, 128], sizes = [8, 128], strides = [1, 1]} : vector<8x256xf32> to vector<8x128xf32>
    %c3 = arith.constant 3 : index
    %c0_45 = arith.constant 0 : index
    %183 = vector.load %arg2[%c3, %c0_45] : memref<8x512xf32, #tpu.memory_space<vmem>>, vector<1x512xf32>
    %184 = vector.shape_cast %183 : vector<1x512xf32> to vector<1x512xf32>
    %185 = vector.broadcast %184 : vector<1x512xf32> to vector<8x512xf32>
    %c4 = arith.constant 4 : index
    %c0_46 = arith.constant 0 : index
    %186 = vector.load %arg2[%c4, %c0_46] : memref<8x512xf32, #tpu.memory_space<vmem>>, vector<1x512xf32>
    %187 = vector.shape_cast %186 : vector<1x512xf32> to vector<1x512xf32>
    %188 = vector.broadcast %187 : vector<1x512xf32> to vector<8x512xf32>
    %189 = arith.truncf %181 : vector<8x128xf32> to vector<8x128xbf16>
    %c768 = arith.constant 768 : index
    %c0_47 = arith.constant 0 : index
    %190 = vector.load %arg1[%c768, %c0_47] : memref<1152x512xbf16, #tpu.memory_space<vmem>>, vector<128x512xbf16>
    %cst_48 = arith.constant dense<0.000000e+00> : vector<8x512xf32>
    %191 = tpu.matmul %189, %190, %cst_48 {dimension_numbers = #tpu.dot_dimension_numbers<[1], [0], [0], [1], [0, 0, 1, 1], [], []>} : vector<8x128xbf16>, vector<128x512xbf16>, vector<8x512xf32> -> vector<8x512xf32>
    %192 = arith.addf %191, %185 : vector<8x512xf32>
    %193 = vector.extract_strided_slice %192 {offsets = [0, 0], sizes = [8, 128], strides = [1, 1]} : vector<8x512xf32> to vector<8x128xf32>
    %194 = arith.negf %193 : vector<8x128xf32>
    %195 = math.exp %194 : vector<8x128xf32>
    %cst_49 = arith.constant 1.000000e+00 : f32
    %196 = vector.broadcast %cst_49 : f32 to vector<8x128xf32>
    %197 = arith.addf %196, %195 : vector<8x128xf32>
    %198 = arith.divf %196, %197 : vector<8x128xf32>
    %199 = vector.extract_strided_slice %192 {offsets = [0, 128], sizes = [8, 128], strides = [1, 1]} : vector<8x512xf32> to vector<8x128xf32>
    %200 = arith.negf %199 : vector<8x128xf32>
    %201 = math.exp %200 : vector<8x128xf32>
    %cst_50 = arith.constant 1.000000e+00 : f32
    %202 = vector.broadcast %cst_50 : f32 to vector<8x128xf32>
    %203 = arith.addf %202, %201 : vector<8x128xf32>
    %204 = arith.divf %202, %203 : vector<8x128xf32>
    %205 = vector.extract_strided_slice %192 {offsets = [0, 256], sizes = [8, 128], strides = [1, 1]} : vector<8x512xf32> to vector<8x128xf32>
    %206 = vector.extract_strided_slice %192 {offsets = [0, 384], sizes = [8, 128], strides = [1, 1]} : vector<8x512xf32> to vector<8x128xf32>
    %207 = arith.mulf %198, %206 : vector<8x128xf32>
    %208 = arith.addf %205, %207 : vector<8x128xf32>
    %209 = math.tanh %208 : vector<8x128xf32>
    %cst_51 = arith.constant 1.000000e+00 : f32
    %210 = vector.broadcast %cst_51 : f32 to vector<8x128xf32>
    %211 = arith.subf %210, %204 : vector<8x128xf32>
    %212 = arith.mulf %211, %209 : vector<8x128xf32>
    %213 = arith.mulf %204, %181 : vector<8x128xf32>
    %214 = arith.addf %212, %213 : vector<8x128xf32>
    %215 = tpu.concatenate %214, %182 in 1 : vector<8x128xf32>, vector<8x128xf32> -> vector<8x256xf32>
    %216 = arith.truncf %215 : vector<8x256xf32> to vector<8x256xbf16>
    %c896 = arith.constant 896 : index
    %c0_52 = arith.constant 0 : index
    %217 = vector.load %arg1[%c896, %c0_52] : memref<1152x512xbf16, #tpu.memory_space<vmem>>, vector<256x512xbf16>
    %cst_53 = arith.constant dense<0.000000e+00> : vector<8x512xf32>
    %218 = tpu.matmul %216, %217, %cst_53 {dimension_numbers = #tpu.dot_dimension_numbers<[1], [0], [0], [1], [0, 0, 1, 1], [], []>} : vector<8x256xbf16>, vector<256x512xbf16>, vector<8x512xf32> -> vector<8x512xf32>
    %219 = arith.addf %218, %188 : vector<8x512xf32>
    %220 = vector.extract_strided_slice %219 {offsets = [0, 0], sizes = [8, 128], strides = [1, 1]} : vector<8x512xf32> to vector<8x128xf32>
    %221 = arith.negf %220 : vector<8x128xf32>
    %222 = math.exp %221 : vector<8x128xf32>
    %cst_54 = arith.constant 1.000000e+00 : f32
    %223 = vector.broadcast %cst_54 : f32 to vector<8x128xf32>
    %224 = arith.addf %223, %222 : vector<8x128xf32>
    %225 = arith.divf %223, %224 : vector<8x128xf32>
    %226 = vector.extract_strided_slice %219 {offsets = [0, 128], sizes = [8, 128], strides = [1, 1]} : vector<8x512xf32> to vector<8x128xf32>
    %227 = arith.negf %226 : vector<8x128xf32>
    %228 = math.exp %227 : vector<8x128xf32>
    %cst_55 = arith.constant 1.000000e+00 : f32
    %229 = vector.broadcast %cst_55 : f32 to vector<8x128xf32>
    %230 = arith.addf %229, %228 : vector<8x128xf32>
    %231 = arith.divf %229, %230 : vector<8x128xf32>
    %232 = vector.extract_strided_slice %219 {offsets = [0, 256], sizes = [8, 128], strides = [1, 1]} : vector<8x512xf32> to vector<8x128xf32>
    %233 = vector.extract_strided_slice %219 {offsets = [0, 384], sizes = [8, 128], strides = [1, 1]} : vector<8x512xf32> to vector<8x128xf32>
    %234 = arith.mulf %225, %233 : vector<8x128xf32>
    %235 = arith.addf %232, %234 : vector<8x128xf32>
    %236 = math.tanh %235 : vector<8x128xf32>
    %cst_56 = arith.constant 1.000000e+00 : f32
    %237 = vector.broadcast %cst_56 : f32 to vector<8x128xf32>
    %238 = arith.subf %237, %231 : vector<8x128xf32>
    %239 = arith.mulf %238, %236 : vector<8x128xf32>
    %240 = arith.mulf %231, %182 : vector<8x128xf32>
    %241 = arith.addf %239, %240 : vector<8x128xf32>
    %242 = arith.truncf %214 : vector<8x128xf32> to vector<8x128xbf16>
    %c768_57 = arith.constant 768 : index
    %c0_58 = arith.constant 0 : index
    %243 = vector.load %arg1[%c768_57, %c0_58] : memref<1152x512xbf16, #tpu.memory_space<vmem>>, vector<128x512xbf16>
    %cst_59 = arith.constant dense<0.000000e+00> : vector<8x512xf32>
    %244 = tpu.matmul %242, %243, %cst_59 {dimension_numbers = #tpu.dot_dimension_numbers<[1], [0], [0], [1], [0, 0, 1, 1], [], []>} : vector<8x128xbf16>, vector<128x512xbf16>, vector<8x512xf32> -> vector<8x512xf32>
    %245 = arith.addf %244, %185 : vector<8x512xf32>
    %246 = vector.extract_strided_slice %245 {offsets = [0, 0], sizes = [8, 128], strides = [1, 1]} : vector<8x512xf32> to vector<8x128xf32>
    %247 = arith.negf %246 : vector<8x128xf32>
    %248 = math.exp %247 : vector<8x128xf32>
    %cst_60 = arith.constant 1.000000e+00 : f32
    %249 = vector.broadcast %cst_60 : f32 to vector<8x128xf32>
    %250 = arith.addf %249, %248 : vector<8x128xf32>
    %251 = arith.divf %249, %250 : vector<8x128xf32>
    %252 = vector.extract_strided_slice %245 {offsets = [0, 128], sizes = [8, 128], strides = [1, 1]} : vector<8x512xf32> to vector<8x128xf32>
    %253 = arith.negf %252 : vector<8x128xf32>
    %254 = math.exp %253 : vector<8x128xf32>
    %cst_61 = arith.constant 1.000000e+00 : f32
    %255 = vector.broadcast %cst_61 : f32 to vector<8x128xf32>
    %256 = arith.addf %255, %254 : vector<8x128xf32>
    %257 = arith.divf %255, %256 : vector<8x128xf32>
    %258 = vector.extract_strided_slice %245 {offsets = [0, 256], sizes = [8, 128], strides = [1, 1]} : vector<8x512xf32> to vector<8x128xf32>
    %259 = vector.extract_strided_slice %245 {offsets = [0, 384], sizes = [8, 128], strides = [1, 1]} : vector<8x512xf32> to vector<8x128xf32>
    %260 = arith.mulf %251, %259 : vector<8x128xf32>
    %261 = arith.addf %258, %260 : vector<8x128xf32>
    %262 = math.tanh %261 : vector<8x128xf32>
    %cst_62 = arith.constant 1.000000e+00 : f32
    %263 = vector.broadcast %cst_62 : f32 to vector<8x128xf32>
    %264 = arith.subf %263, %257 : vector<8x128xf32>
    %265 = arith.mulf %264, %262 : vector<8x128xf32>
    %266 = arith.mulf %257, %214 : vector<8x128xf32>
    %267 = arith.addf %265, %266 : vector<8x128xf32>
    %268 = tpu.concatenate %267, %241 in 1 : vector<8x128xf32>, vector<8x128xf32> -> vector<8x256xf32>
    %269 = arith.truncf %268 : vector<8x256xf32> to vector<8x256xbf16>
    %c896_63 = arith.constant 896 : index
    %c0_64 = arith.constant 0 : index
    %270 = vector.load %arg1[%c896_63, %c0_64] : memref<1152x512xbf16, #tpu.memory_space<vmem>>, vector<256x512xbf16>
    %cst_65 = arith.constant dense<0.000000e+00> : vector<8x512xf32>
    %271 = tpu.matmul %269, %270, %cst_65 {dimension_numbers = #tpu.dot_dimension_numbers<[1], [0], [0], [1], [0, 0, 1, 1], [], []>} : vector<8x256xbf16>, vector<256x512xbf16>, vector<8x512xf32> -> vector<8x512xf32>
    %272 = arith.addf %271, %188 : vector<8x512xf32>
    %273 = vector.extract_strided_slice %272 {offsets = [0, 0], sizes = [8, 128], strides = [1, 1]} : vector<8x512xf32> to vector<8x128xf32>
    %274 = arith.negf %273 : vector<8x128xf32>
    %275 = math.exp %274 : vector<8x128xf32>
    %cst_66 = arith.constant 1.000000e+00 : f32
    %276 = vector.broadcast %cst_66 : f32 to vector<8x128xf32>
    %277 = arith.addf %276, %275 : vector<8x128xf32>
    %278 = arith.divf %276, %277 : vector<8x128xf32>
    %279 = vector.extract_strided_slice %272 {offsets = [0, 128], sizes = [8, 128], strides = [1, 1]} : vector<8x512xf32> to vector<8x128xf32>
    %280 = arith.negf %279 : vector<8x128xf32>
    %281 = math.exp %280 : vector<8x128xf32>
    %cst_67 = arith.constant 1.000000e+00 : f32
    %282 = vector.broadcast %cst_67 : f32 to vector<8x128xf32>
    %283 = arith.addf %282, %281 : vector<8x128xf32>
    %284 = arith.divf %282, %283 : vector<8x128xf32>
    %285 = vector.extract_strided_slice %272 {offsets = [0, 256], sizes = [8, 128], strides = [1, 1]} : vector<8x512xf32> to vector<8x128xf32>
    %286 = vector.extract_strided_slice %272 {offsets = [0, 384], sizes = [8, 128], strides = [1, 1]} : vector<8x512xf32> to vector<8x128xf32>
    %287 = arith.mulf %278, %286 : vector<8x128xf32>
    %288 = arith.addf %285, %287 : vector<8x128xf32>
    %289 = math.tanh %288 : vector<8x128xf32>
    %cst_68 = arith.constant 1.000000e+00 : f32
    %290 = vector.broadcast %cst_68 : f32 to vector<8x128xf32>
    %291 = arith.subf %290, %284 : vector<8x128xf32>
    %292 = arith.mulf %291, %289 : vector<8x128xf32>
    %293 = arith.mulf %284, %241 : vector<8x128xf32>
    %294 = arith.addf %292, %293 : vector<8x128xf32>
    %295 = arith.truncf %267 : vector<8x128xf32> to vector<8x128xbf16>
    %c768_69 = arith.constant 768 : index
    %c0_70 = arith.constant 0 : index
    %296 = vector.load %arg1[%c768_69, %c0_70] : memref<1152x512xbf16, #tpu.memory_space<vmem>>, vector<128x512xbf16>
    %cst_71 = arith.constant dense<0.000000e+00> : vector<8x512xf32>
    %297 = tpu.matmul %295, %296, %cst_71 {dimension_numbers = #tpu.dot_dimension_numbers<[1], [0], [0], [1], [0, 0, 1, 1], [], []>} : vector<8x128xbf16>, vector<128x512xbf16>, vector<8x512xf32> -> vector<8x512xf32>
    %298 = arith.addf %297, %185 : vector<8x512xf32>
    %299 = vector.extract_strided_slice %298 {offsets = [0, 0], sizes = [8, 128], strides = [1, 1]} : vector<8x512xf32> to vector<8x128xf32>
    %300 = arith.negf %299 : vector<8x128xf32>
    %301 = math.exp %300 : vector<8x128xf32>
    %cst_72 = arith.constant 1.000000e+00 : f32
    %302 = vector.broadcast %cst_72 : f32 to vector<8x128xf32>
    %303 = arith.addf %302, %301 : vector<8x128xf32>
    %304 = arith.divf %302, %303 : vector<8x128xf32>
    %305 = vector.extract_strided_slice %298 {offsets = [0, 128], sizes = [8, 128], strides = [1, 1]} : vector<8x512xf32> to vector<8x128xf32>
    %306 = arith.negf %305 : vector<8x128xf32>
    %307 = math.exp %306 : vector<8x128xf32>
    %cst_73 = arith.constant 1.000000e+00 : f32
    %308 = vector.broadcast %cst_73 : f32 to vector<8x128xf32>
    %309 = arith.addf %308, %307 : vector<8x128xf32>
    %310 = arith.divf %308, %309 : vector<8x128xf32>
    %311 = vector.extract_strided_slice %298 {offsets = [0, 256], sizes = [8, 128], strides = [1, 1]} : vector<8x512xf32> to vector<8x128xf32>
    %312 = vector.extract_strided_slice %298 {offsets = [0, 384], sizes = [8, 128], strides = [1, 1]} : vector<8x512xf32> to vector<8x128xf32>
    %313 = arith.mulf %304, %312 : vector<8x128xf32>
    %314 = arith.addf %311, %313 : vector<8x128xf32>
    %315 = math.tanh %314 : vector<8x128xf32>
    %cst_74 = arith.constant 1.000000e+00 : f32
    %316 = vector.broadcast %cst_74 : f32 to vector<8x128xf32>
    %317 = arith.subf %316, %310 : vector<8x128xf32>
    %318 = arith.mulf %317, %315 : vector<8x128xf32>
    %319 = arith.mulf %310, %267 : vector<8x128xf32>
    %320 = arith.addf %318, %319 : vector<8x128xf32>
    %321 = tpu.concatenate %320, %294 in 1 : vector<8x128xf32>, vector<8x128xf32> -> vector<8x256xf32>
    %322 = arith.truncf %321 : vector<8x256xf32> to vector<8x256xbf16>
    %c896_75 = arith.constant 896 : index
    %c0_76 = arith.constant 0 : index
    %323 = vector.load %arg1[%c896_75, %c0_76] : memref<1152x512xbf16, #tpu.memory_space<vmem>>, vector<256x512xbf16>
    %cst_77 = arith.constant dense<0.000000e+00> : vector<8x512xf32>
    %324 = tpu.matmul %322, %323, %cst_77 {dimension_numbers = #tpu.dot_dimension_numbers<[1], [0], [0], [1], [0, 0, 1, 1], [], []>} : vector<8x256xbf16>, vector<256x512xbf16>, vector<8x512xf32> -> vector<8x512xf32>
    %325 = arith.addf %324, %188 : vector<8x512xf32>
    %326 = vector.extract_strided_slice %325 {offsets = [0, 0], sizes = [8, 128], strides = [1, 1]} : vector<8x512xf32> to vector<8x128xf32>
    %327 = arith.negf %326 : vector<8x128xf32>
    %328 = math.exp %327 : vector<8x128xf32>
    %cst_78 = arith.constant 1.000000e+00 : f32
    %329 = vector.broadcast %cst_78 : f32 to vector<8x128xf32>
    %330 = arith.addf %329, %328 : vector<8x128xf32>
    %331 = arith.divf %329, %330 : vector<8x128xf32>
    %332 = vector.extract_strided_slice %325 {offsets = [0, 128], sizes = [8, 128], strides = [1, 1]} : vector<8x512xf32> to vector<8x128xf32>
    %333 = arith.negf %332 : vector<8x128xf32>
    %334 = math.exp %333 : vector<8x128xf32>
    %cst_79 = arith.constant 1.000000e+00 : f32
    %335 = vector.broadcast %cst_79 : f32 to vector<8x128xf32>
    %336 = arith.addf %335, %334 : vector<8x128xf32>
    %337 = arith.divf %335, %336 : vector<8x128xf32>
    %338 = vector.extract_strided_slice %325 {offsets = [0, 256], sizes = [8, 128], strides = [1, 1]} : vector<8x512xf32> to vector<8x128xf32>
    %339 = vector.extract_strided_slice %325 {offsets = [0, 384], sizes = [8, 128], strides = [1, 1]} : vector<8x512xf32> to vector<8x128xf32>
    %340 = arith.mulf %331, %339 : vector<8x128xf32>
    %341 = arith.addf %338, %340 : vector<8x128xf32>
    %342 = math.tanh %341 : vector<8x128xf32>
    %cst_80 = arith.constant 1.000000e+00 : f32
    %343 = vector.broadcast %cst_80 : f32 to vector<8x128xf32>
    %344 = arith.subf %343, %337 : vector<8x128xf32>
    %345 = arith.mulf %344, %342 : vector<8x128xf32>
    %346 = arith.mulf %337, %294 : vector<8x128xf32>
    %347 = arith.addf %345, %346 : vector<8x128xf32>
    %348 = tpu.concatenate %241, %294, %347 in 0 : vector<8x128xf32>, vector<8x128xf32>, vector<8x128xf32> -> vector<24x128xf32>
    %c0_81 = arith.constant 0 : index
    %c0_82 = arith.constant 0 : index
    %349 = vector.load %arg3[%c0_81, %c0_82] : memref<24x128xf32, #tpu.memory_space<vmem>>, vector<24x128xf32>
    tpu.vector_store %arg3[%c0_81, %c0_82], %348 {strides = array<i32>} : memref<24x128xf32, #tpu.memory_space<vmem>>, vector<24x128xf32>,
    return
  }
}

</mosaic_0001>

<bundles_post_ra>
// kernel: seq2seq_forward.1
= control target key start
LH: loop header
LB: loop body
LE: loop exit
PB: predicated region body
PF: predicated region fallthrough
CT: control target
= control target key end

     0   :  { %8 = vsyncpa [#allocation3], 0  ;;  %s5105_s0 = inlined_call_operand.vmem [shape: f32[24,128], index: 0, kind: input, shape index: {}]   ;;  %s5106_s1 = inlined_call_operand.hbm [shape: bf16[1152,512], index: 1, kind: input, shape index: {}]   ;;  %s5107_s2 = inlined_call_operand.hbm [shape: f32[8,512], index: 2, kind: input, shape index: {}]   ;;  %s5108_s3 = inlined_call_operand.vmem [shape: f32[24,128], index: 3, kind: output, shape index: {}]  }
   0x1   :  { %9 = vsyncpa [#allocation5], 0  ;;  %s3942_s12 = smov [#allocation2]  }
   0x2   :  { %s17_s13 = sshll.u32 %s3942_s12, 4  ;;  %s18_s13 = int_to_ptr.vmem [resolvable:$true] %s17_s13 }
   0x3   :  { %s3906_s14 = scalar_lea.vmem %s18_s13, 36864  ;;  %p3911_p1 = scmp.lt.s32.totalorder %s18_s13, %s18_s13 }
   0x4   :  { %p3907_p0 = scmp.ne.s32.totalorder %s18_s13, %s3906_s14  ;;  %p3912_p2 = scmp.lt.s32.totalorder %s3906_s14, %s3906_s14 }
   0x6   :  { %p3913_p3 = por %p3912_p2, %p3911_p1 }
   0x8   :  { %p3914_p4 = pnand %p3913_p3, %p3907_p0 }
   0xa   :  { %3917 = shalt.err (!%p3914_p4)
}
   0xb   :  { %s3943_s15 = smov 256   ;;  %s3944_s16 = smov 16  }
   0xc   :  { %23 = dma.hbm_to_vmem [thread:$0]  %s5106_s1, 36864, %s18_s13, [#allocation3], %s3943_s15, %s3943_s15, %s3944_s16  }
   0xd   :  { %s3945_s19 = smov [#allocation4]  }
   0xe   :  { %s30_s20 = sshll.u32 %s3945_s19, 4  ;;  %s31_s20 = int_to_ptr.vmem [resolvable:$true] %s30_s20 }
   0xf   :  { %s3926_s21 = scalar_lea.vmem %s31_s20, 512  ;;  %p3931_p6 = scmp.lt.s32.totalorder %s31_s20, %s31_s20 }
  0x10   :  { %p3927_p5 = scmp.ne.s32.totalorder %s31_s20, %s3926_s21  ;;  %p3932_p7 = scmp.lt.s32.totalorder %s3926_s21, %s3926_s21 }
  0x12   :  { %p3933_p8 = por %p3932_p7, %p3931_p6 }
  0x14   :  { %p3934_p9 = pnand %p3933_p8, %p3927_p5 }
  0x16   :  { %3937 = shalt.err (!%p3934_p9)
}
  0x17   :  { %33 = dma.hbm_to_vmem [thread:$0]  %s5107_s2, 512, %s31_s20, [#allocation5]  }
  0x18   :  { %3938 = dma.done.wait [#allocation3], 36864  }
  0x19   :  { %3939 = vsyncadd [#allocation3], 4294930432 }
  0x1a   :  { %3940 = dma.done.wait [#allocation5], 512  }
  0x1b   :  { %3941 = vsyncadd [#allocation5], 4294966784  ;;  %v5109_v0 = vmov 0   ;;  %v3362_v1 = vld [vmem:[#allocation2 + $0xe4] ss:$16 sps:$4 sm:$0xff]   ;;  %v42_v34 = vld [vmem:[%s5105_s0 + $0x8] sm:$0xff] }
  0x1c   :  { %292 = vmatprep.mubr.bf16.mxu0 %v5109_v0  ;;  %343 = vmatprep.mubr.bf16.mxu1 %v5109_v0  ;;  %v3364_v2 = vld [vmem:[#allocation2 + $0xec] ss:$16 sps:$4 sm:$0xff]   ;;  %v3366_v3 = vld [vmem:[#allocation2 + $0xe0] ss:$16 sps:$4 sm:$0xff]   ;;  %v3367_v4 = vld [vmem:[#allocation2 + $0xe8] ss:$16 sps:$4 sm:$0xff]  }
  0x1d   :  { %260 = vmatprep.subr.bf16.mxu0 %v3362_v1  ;;  %311 = vmatprep.subr.bf16.mxu1 %v3364_v2  ;;  %v3368_v5 = vld [vmem:[#allocation2 + $0xc4] ss:$16 sps:$4 sm:$0xff]   ;;  %v3370_v6 = vld [vmem:[#allocation2 + $0xcc] ss:$16 sps:$4 sm:$0xff]   ;;  %v3372_v7 = vld [vmem:[#allocation2 + $0xc0] ss:$16 sps:$4 sm:$0xff]  }
  0x1e   :  { %261 = vmatpush1.bf16.msra.mxu0 %v3366_v3  ;;  %312 = vmatpush1.bf16.msra.mxu1 %v3367_v4  ;;  %v3373_v8 = vld [vmem:[#allocation2 + $0xc8] ss:$16 sps:$4 sm:$0xff]   ;;  %v3374_v9 = vld [vmem:[#allocation2 + $0xa4] ss:$16 sps:$4 sm:$0xff]   ;;  %v3376_v10 = vld [vmem:[#allocation2 + $0xac] ss:$16 sps:$4 sm:$0xff]  }
  0x1f   :  { %262 = vmatprep.subr.bf16.mxu0 %v3368_v5  ;;  %313 = vmatprep.subr.bf16.mxu1 %v3370_v6  ;;  %v3378_v11 = vld [vmem:[#allocation2 + $0xa0] ss:$16 sps:$4 sm:$0xff]   ;;  %v3379_v12 = vld [vmem:[#allocation2 + $0xa8] ss:$16 sps:$4 sm:$0xff]   ;;  %v3380_v13 = vld [vmem:[#allocation2 + $0x84] ss:$16 sps:$4 sm:$0xff]  }
  0x20   :  { %v3382_v14 = vld [vmem:[#allocation2 + $0x8c] ss:$16 sps:$4 sm:$0xff]   ;;  %v3384_v15 = vld [vmem:[#allocation2 + $0x80] ss:$16 sps:$4 sm:$0xff]   ;;  %v3385_v16 = vld [vmem:[#allocation2 + $0x88] ss:$16 sps:$4 sm:$0xff]  }
  0x21   :  { %v3386_v17 = vld [vmem:[#allocation2 + $0x64] ss:$16 sps:$4 sm:$0xff]   ;;  %v3388_v18 = vld [vmem:[#allocation2 + $0x6c] ss:$16 sps:$4 sm:$0xff]   ;;  %v3390_v19 = vld [vmem:[#allocation2 + $0x60] ss:$16 sps:$4 sm:$0xff]  }
  0x22   :  { %263 = vmatpush1.bf16.msra.mxu0 %v3372_v7  ;;  %314 = vmatpush1.bf16.msra.mxu1 %v3373_v8  ;;  %v3391_v20 = vld [vmem:[#allocation2 + $0x68] ss:$16 sps:$4 sm:$0xff]   ;;  %v3392_v21 = vld [vmem:[#allocation2 + $0x44] ss:$16 sps:$4 sm:$0xff]   ;;  %v3394_v22 = vld [vmem:[#allocation2 + $0x4c] ss:$16 sps:$4 sm:$0xff]  }
  0x23   :  { %264 = vmatprep.subr.bf16.mxu0 %v3374_v9  ;;  %315 = vmatprep.subr.bf16.mxu1 %v3376_v10  ;;  %v3396_v23 = vld [vmem:[#allocation2 + $0x40] ss:$16 sps:$4 sm:$0xff]   ;;  %v3397_v24 = vld [vmem:[#allocation2 + $0x48] ss:$16 sps:$4 sm:$0xff]   ;;  %v3398_v25 = vld [vmem:[#allocation2 + $0x24] ss:$16 sps:$4 sm:$0xff]  }
  0x24   :  { %v3400_v26 = vld [vmem:[#allocation2 + $0x2c] ss:$16 sps:$4 sm:$0xff]   ;;  %v3402_v27 = vld [vmem:[#allocation2 + $0x20] ss:$16 sps:$4 sm:$0xff]   ;;  %v3403_v28 = vld [vmem:[#allocation2 + $0x28] ss:$16 sps:$4 sm:$0xff]  }
  0x25   :  { %v3404_v29 = vld [vmem:[#allocation2 + $0x4] ss:$16 sps:$4 sm:$0xff]   ;;  %v3406_v30 = vld [vmem:[#allocation2 + $0xc] ss:$16 sps:$4 sm:$0xff]   ;;  %v3408_v31 = vld [vmem:[#allocation2] ss:$16 sps:$4 sm:$0xff]  }
  0x26   :  { %265 = vmatpush1.bf16.msra.mxu0 %v3378_v11  ;;  %316 = vmatpush1.bf16.msra.mxu1 %v3379_v12  ;;  %v3409_v32 = vld [vmem:[#allocation2 + $0x8] ss:$16 sps:$4 sm:$0xff]   ;;  %v41_v33 = vld [vmem:[%s5105_s0] sm:$0xff]  ;;  %v3984_v36 = vld [vmem:[#allocation2 + $0x1ec] ss:$16 sps:$4 sm:$0xff]  }
  0x27   :  { %266 = vmatprep.subr.bf16.mxu0 %v3380_v13  ;;  %317 = vmatprep.subr.bf16.mxu1 %v3382_v14  ;;  %v3982_v35 = vld [vmem:[#allocation2 + $0x1e4] ss:$16 sps:$4 sm:$0xff]   ;;  %v44_v37 = vpack.c.bf16 %v42_v34, %v41_v33  ;;  %v3986_v38 = vld [vmem:[#allocation2 + $0x1e0] ss:$16 sps:$4 sm:$0xff]   ;;  %v3988_v39 = vld [vmem:[#allocation2 + $0x1e8] ss:$16 sps:$4 sm:$0xff]  }
  0x28   :  { %v3992_v40 = vld [vmem:[#allocation2 + $0x1c4] ss:$16 sps:$4 sm:$0xff]   ;;  %v3994_v41 = vld [vmem:[#allocation2 + $0x1cc] ss:$16 sps:$4 sm:$0xff]   ;;  %v3996_v42 = vld [vmem:[#allocation2 + $0x1c0] ss:$16 sps:$4 sm:$0xff]  }
  0x29   :  { %v3998_v43 = vld [vmem:[#allocation2 + $0x1c8] ss:$16 sps:$4 sm:$0xff]   ;;  %v4002_v44 = vld [vmem:[#allocation2 + $0x1a4] ss:$16 sps:$4 sm:$0xff]   ;;  %v4009_v46 = vld [vmem:[#allocation2 + $0x1ac] ss:$16 sps:$4 sm:$0xff]  }
  0x2a   :  { %267 = vmatpush1.bf16.msra.mxu0 %v3384_v15  ;;  %318 = vmatpush1.bf16.msra.mxu1 %v3385_v16  ;;  %v43_v45 = vld [vmem:[%s5105_s0 + $0x10] sm:$0xff]  ;;  %v4017_v49 = vld [vmem:[#allocation2 + $0x1a8] ss:$16 sps:$4 sm:$0xff]   ;;  %v4023_v51 = vld [vmem:[#allocation2 + $0x18c] ss:$16 sps:$4 sm:$0xff]  }
  0x2b   :  { %268 = vmatprep.subr.bf16.mxu0 %v3386_v17  ;;  %319 = vmatprep.subr.bf16.mxu1 %v3388_v18  ;;  %v4013_v47 = vld [vmem:[#allocation2 + $0x1a0] ss:$16 sps:$4 sm:$0xff]   ;;  %v45_v48 = vpack.c.bf16 %v43_v45, %v43_v45  ;;  %v4019_v50 = vld [vmem:[#allocation2 + $0x184] ss:$16 sps:$4 sm:$0xff]   ;;  %v4027_v53 = vld [vmem:[#allocation2 + $0x188] ss:$16 sps:$4 sm:$0xff]  }
  0x2c   :  { %v4025_v52 = vld [vmem:[#allocation2 + $0x180] ss:$16 sps:$4 sm:$0xff]   ;;  %v4029_v54 = vld [vmem:[#allocation2 + $0x164] ss:$16 sps:$4 sm:$0xff]   ;;  %v4033_v55 = vld [vmem:[#allocation2 + $0x16c] ss:$16 sps:$4 sm:$0xff]  }
  0x2d   :  { %v4037_v56 = vld [vmem:[#allocation2 + $0x160] ss:$16 sps:$4 sm:$0xff]   ;;  %v4039_v57 = vld [vmem:[#allocation2 + $0x168] ss:$16 sps:$4 sm:$0xff]   ;;  %v4043_v58 = vld [vmem:[#allocation2 + $0x144] ss:$16 sps:$4 sm:$0xff]  }
  0x2e   :  { %269 = vmatpush1.bf16.msra.mxu0 %v3390_v19  ;;  %320 = vmatpush1.bf16.msra.mxu1 %v3391_v20  ;;  %v4045_v59 = vld [vmem:[#allocation2 + $0x14c] ss:$16 sps:$4 sm:$0xff]   ;;  %v4051_v60 = vld [vmem:[#allocation2 + $0x140] ss:$16 sps:$4 sm:$0xff]   ;;  %v4053_v61 = vld [vmem:[#allocation2 + $0x148] ss:$16 sps:$4 sm:$0xff]  }
  0x2f   :  { %270 = vmatprep.subr.bf16.mxu0 %v3392_v21  ;;  %321 = vmatprep.subr.bf16.mxu1 %v3394_v22  ;;  %v4055_v62 = vld [vmem:[#allocation2 + $0x124] ss:$16 sps:$4 sm:$0xff]   ;;  %v4057_v63 = vld [vmem:[#allocation2 + $0x12c] ss:$16 sps:$4 sm:$0xff]   ;;  %v4063_v1 = vld [vmem:[#allocation2 + $0x120] ss:$16 sps:$4 sm:$0xff]  }
  0x30   :  { %v4065_v2 = vld [vmem:[#allocation2 + $0x128] ss:$16 sps:$4 sm:$0xff]   ;;  %v4067_v3 = vld [vmem:[#allocation2 + $0x104] ss:$16 sps:$4 sm:$0xff]   ;;  %v4069_v4 = vld [vmem:[#allocation2 + $0x10c] ss:$16 sps:$4 sm:$0xff]  }
  0x31   :  { %v4075_v5 = vld [vmem:[#allocation2 + $0x100] ss:$16 sps:$4 sm:$0xff]   ;;  %v4077_v6 = vld [vmem:[#allocation2 + $0x108] ss:$16 sps:$4 sm:$0xff]   ;;  %v4089_v8 = vld [vmem:[#allocation2 + $0x2e4] ss:$16 sps:$4 sm:$0xff]  }
  0x32   :  { %271 = vmatpush1.bf16.msra.mxu0 %v3396_v23  ;;  %322 = vmatpush1.bf16.msra.mxu1 %v3397_v24  ;;  %v4087_v7 = vld [vmem:[#allocation2 + $0x2e0] ss:$16 sps:$4 sm:$0xff]   ;;  %v4091_v9 = vld [vmem:[#allocation2 + $0x2e8] ss:$16 sps:$4 sm:$0xff]   ;;  %v4093_v10 = vld [vmem:[#allocation2 + $0x2ec] ss:$16 sps:$4 sm:$0xff]  }
  0x33   :  { %272 = vmatprep.subr.bf16.mxu0 %v3398_v25  ;;  %323 = vmatprep.subr.bf16.mxu1 %v3400_v26  ;;  %v4095_v11 = vld [vmem:[#allocation2 + $0x2c4] ss:$16 sps:$4 sm:$0xff]   ;;  %v4098_v12 = vld [vmem:[#allocation2 + $0x2cc] ss:$16 sps:$4 sm:$0xff]   ;;  %v4102_v13 = vld [vmem:[#allocation2 + $0x2c0] ss:$16 sps:$4 sm:$0xff]  }
  0x34   :  { %v4106_v14 = vld [vmem:[#allocation2 + $0x2c8] ss:$16 sps:$4 sm:$0xff]   ;;  %v4111_v15 = vld [vmem:[#allocation2 + $0x2a4] ss:$16 sps:$4 sm:$0xff]   ;;  %v4113_v16 = vld [vmem:[#allocation2 + $0x2ac] ss:$16 sps:$4 sm:$0xff]  }
  0x35   :  { %5364 = vst [vmem:[#allocation8_spill] sm:$0xff] %v4106_v14  ;;  %5365 = vst [vmem:[#allocation9_spill] sm:$0xff] %v4111_v15  ;;  %v4115_v17 = vld [vmem:[#allocation2 + $0x2a0] ss:$16 sps:$4 sm:$0xff]   ;;  %v4117_v18 = vld [vmem:[#allocation2 + $0x2a8] ss:$16 sps:$4 sm:$0xff]  }
  0x36   :  { %273 = vmatpush1.bf16.msra.mxu0 %v3402_v27  ;;  %324 = vmatpush1.bf16.msra.mxu1 %v3403_v28  ;;  %5366 = vst [vmem:[#allocation10_spill] sm:$0xff] %v4113_v16  ;;  %5367 = vst [vmem:[#allocation11_spill] sm:$0xff] %v4115_v17  ;;  %v4123_v19 = vld [vmem:[#allocation2 + $0x284] ss:$16 sps:$4 sm:$0xff]   ;;  %v4125_v20 = vld [vmem:[#allocation2 + $0x28c] ss:$16 sps:$4 sm:$0xff]  }
  0x37   :  { %274 = vmatprep.subr.bf16.mxu0 %v3404_v29  ;;  %325 = vmatprep.subr.bf16.mxu1 %v3406_v30  ;;  %5368 = vst [vmem:[#allocation12_spill] sm:$0xff] %v4117_v18  ;;  %5369 = vst [vmem:[#allocation13_spill] sm:$0xff] %v4123_v19  ;;  %v4127_v21 = vld [vmem:[#allocation2 + $0x280] ss:$16 sps:$4 sm:$0xff]   ;;  %v4129_v22 = vld [vmem:[#allocation2 + $0x288] ss:$16 sps:$4 sm:$0xff]  }
  0x38   :  { %5370 = vst [vmem:[#allocation14_spill] sm:$0xff] %v4125_v20  ;;  %5371 = vst [vmem:[#allocation15_spill] sm:$0xff] %v4127_v21  ;;  %v4135_v23 = vld [vmem:[#allocation2 + $0x264] ss:$16 sps:$4 sm:$0xff]   ;;  %v4137_v24 = vld [vmem:[#allocation2 + $0x26c] ss:$16 sps:$4 sm:$0xff]  }
  0x39   :  { %5372 = vst [vmem:[#allocation16_spill] sm:$0xff] %v4129_v22  ;;  %5373 = vst [vmem:[#allocation17_spill] sm:$0xff] %v4135_v23  ;;  %v4139_v25 = vld [vmem:[#allocation2 + $0x260] ss:$16 sps:$4 sm:$0xff]   ;;  %v4141_v26 = vld [vmem:[#allocation2 + $0x268] ss:$16 sps:$4 sm:$0xff]  }
  0x3a   :  { %275 = vmatpush1.bf16.msra.mxu0 %v3408_v31  ;;  %326 = vmatpush1.bf16.msra.mxu1 %v3409_v32  ;;  %5374 = vst [vmem:[#allocation18_spill] sm:$0xff] %v4137_v24  ;;  %5375 = vst [vmem:[#allocation19_spill] sm:$0xff] %v4139_v25  ;;  %v4147_v27 = vld [vmem:[#allocation2 + $0x244] ss:$16 sps:$4 sm:$0xff]   ;;  %v4149_v28 = vld [vmem:[#allocation2 + $0x24c] ss:$16 sps:$4 sm:$0xff]  }
  0x3b   :  { %577 = vmatprep.subr.bf16.mxu0 %v3982_v35  ;;  %618 = vmatprep.subr.bf16.mxu1 %v3984_v36  ;;  %5376 = vst [vmem:[#allocation20_spill] sm:$0xff] %v4141_v26  ;;  %5377 = vst [vmem:[#allocation21_spill] sm:$0xff] %v4147_v27  ;;  %v4151_v29 = vld [vmem:[#allocation2 + $0x240] ss:$16 sps:$4 sm:$0xff]   ;;  %v4153_v30 = vld [vmem:[#allocation2 + $0x248] ss:$16 sps:$4 sm:$0xff]  }
  0x3c   :  { %5378 = vst [vmem:[#allocation22_spill] sm:$0xff] %v4149_v28  ;;  %5379 = vst [vmem:[#allocation23_spill] sm:$0xff] %v4151_v29  ;;  %v4159_v31 = vld [vmem:[#allocation2 + $0x224] ss:$16 sps:$4 sm:$0xff]   ;;  %v4161_v32 = vld [vmem:[#allocation2 + $0x22c] ss:$16 sps:$4 sm:$0xff]  }
  0x3d   :  { %293 = vmatmul.mubr.bf16.vlgmr.msra.gmra.mxu0 %v44_v37  ;;  %344 = vmatmul.mubr.bf16.vlgmr.msra.gmra.mxu1 %v44_v37  ;;  %5380 = vst [vmem:[#allocation24_spill] sm:$0xff] %v4153_v30  ;;  %5381 = vst [vmem:[#allocation25_spill] sm:$0xff] %v4159_v31  ;;  %v4163_v33 = vld [vmem:[#allocation2 + $0x220] ss:$16 sps:$4 sm:$0xff]   ;;  %v4165_v34 = vld [vmem:[#allocation2 + $0x228] ss:$16 sps:$4 sm:$0xff]  }
  0x3e   :  { %578 = vmatpush1.bf16.msra.mxu0 %v3986_v38  ;;  %619 = vmatpush1.bf16.msra.mxu1 %v3988_v39  ;;  %5382 = vst [vmem:[#allocation26_spill] sm:$0xff] %v4161_v32  ;;  %5383 = vst [vmem:[#allocation27_spill] sm:$0xff] %v4163_v33  ;;  %v4171_v37 = vld [vmem:[#allocation2 + $0x204] ss:$16 sps:$4 sm:$0xff]   ;;  %v4173_v45 = vld [vmem:[#allocation2 + $0x20c] ss:$16 sps:$4 sm:$0xff]  }
  0x3f   :  { %579 = vmatprep.subr.bf16.mxu0 %v3992_v40  ;;  %620 = vmatprep.subr.bf16.mxu1 %v3994_v41  ;;  %5384 = vst [vmem:[#allocation28_spill] sm:$0xff] %v4165_v34  ;;  %5385 = vst [vmem:[#allocation29_spill] sm:$0xff] %v4171_v37 }
  0x40   :  { %302 = vmatprep.mubr.bf16.mxu0 %v5109_v0  ;;  %353 = vmatprep.mubr.bf16.mxu1 %v5109_v0  ;;  %5386 = vst [vmem:[#allocation30_spill] sm:$0xff] %v4173_v45 }
  0x42   :  { %580 = vmatpush1.bf16.msra.mxu0 %v3996_v42  ;;  %621 = vmatpush1.bf16.msra.mxu1 %v3998_v43 }
  0x43   :  { %581 = vmatprep.subr.bf16.mxu0 %v4002_v44  ;;  %622 = vmatprep.subr.bf16.mxu1 %v4009_v46 }
  0x45   :  { %303 = vmatmul.mubr.bf16.gmra.mxu0 %v45_v48  ;;  %354 = vmatmul.mubr.bf16.gmra.mxu1 %v45_v48  ;;  %v4175_v48 = vld [vmem:[#allocation2 + $0x200] ss:$16 sps:$4 sm:$0xff]  }
  0x46   :  { %582 = vmatpush1.bf16.msra.mxu0 %v4013_v47  ;;  %623 = vmatpush1.bf16.msra.mxu1 %v4017_v49  ;;  %5387 = vst [vmem:[#allocation31_spill] sm:$0xff] %v4175_v48 }
  0x47   :  { %583 = vmatprep.subr.bf16.mxu0 %v4019_v50  ;;  %624 = vmatprep.subr.bf16.mxu1 %v4023_v51 }
  0x48   :  { %609 = vmatprep.mubr.bf16.mxu0 %v5109_v0  ;;  %650 = vmatprep.mubr.bf16.mxu1 %v5109_v0 }
  0x4a   :  { %584 = vmatpush1.bf16.msra.mxu0 %v4025_v52  ;;  %625 = vmatpush1.bf16.msra.mxu1 %v4027_v53 }
  0x4b   :  { %585 = vmatprep.subr.bf16.mxu0 %v4029_v54  ;;  %626 = vmatprep.subr.bf16.mxu1 %v4033_v55 }
  0x4e   :  { %586 = vmatpush1.bf16.msra.mxu0 %v4037_v56  ;;  %627 = vmatpush1.bf16.msra.mxu1 %v4039_v57 }
  0x4f   :  { %587 = vmatprep.subr.bf16.mxu0 %v4043_v58  ;;  %628 = vmatprep.subr.bf16.mxu1 %v4045_v59 }
  0x52   :  { %588 = vmatpush1.bf16.msra.mxu0 %v4051_v60  ;;  %629 = vmatpush1.bf16.msra.mxu1 %v4053_v61 }
  0x53   :  { %589 = vmatprep.subr.bf16.mxu0 %v4055_v62  ;;  %630 = vmatprep.subr.bf16.mxu1 %v4057_v63 }
  0x56   :  { %590 = vmatpush1.bf16.msra.mxu0 %v4063_v1  ;;  %631 = vmatpush1.bf16.msra.mxu1 %v4065_v2 }
  0x57   :  { %591 = vmatprep.subr.bf16.mxu0 %v4067_v3  ;;  %632 = vmatprep.subr.bf16.mxu1 %v4069_v4 }
  0x5a   :  { %592 = vmatpush1.bf16.msra.mxu0 %v4075_v5  ;;  %633 = vmatpush1.bf16.msra.mxu1 %v4077_v6 }
  0x5b   :  { %1068 = vmatprep.subr.bf16.mxu0 %v4089_v8  ;;  %1109 = vmatprep.subr.bf16.mxu1 %v4093_v10 }
  0x5d   :  { %610 = vmatmul.mubr.bf16.vlgmr.msra.gmra.mxu0 %v5109_v0  ;;  %651 = vmatmul.mubr.bf16.vlgmr.msra.gmra.mxu1 %v5109_v0  ;;  %v4177_v0 = vld [vmem:[#allocation2 + $0x208] ss:$16 sps:$4 sm:$0xff]  }
  0x5e   :  { %1069 = vmatpush1.bf16.msra.mxu0 %v4087_v7  ;;  %1110 = vmatpush1.bf16.msra.mxu1 %v4091_v9  ;;  %5388 = vst [vmem:[#allocation32_spill] sm:$0xff] %v4177_v0 }
  0x5f   :  { %1070 = vmatprep.subr.bf16.mxu0 %v4095_v11  ;;  %1111 = vmatprep.subr.bf16.mxu1 %v4098_v12 }
  0x62   :  { %1071 = vmatpush1.bf16.msra.mxu0 %v4102_v13  ;;  %1112 = vmatpush1.bf16.msra.mxu1 %v4106_v14 }
  0x63   :  { %1072 = vmatprep.subr.bf16.mxu0 %v4111_v15  ;;  %1113 = vmatprep.subr.bf16.mxu1 %v4113_v16 }
  0x66   :  { %1073 = vmatpush1.bf16.msra.mxu0 %v4115_v17  ;;  %1114 = vmatpush1.bf16.msra.mxu1 %v4117_v18 }
  0x67   :  { %1074 = vmatprep.subr.bf16.mxu0 %v4123_v19  ;;  %1115 = vmatprep.subr.bf16.mxu1 %v4125_v20 }
  0x6a   :  { %1075 = vmatpush1.bf16.msra.mxu0 %v4127_v21  ;;  %1116 = vmatpush1.bf16.msra.mxu1 %v4129_v22 }
  0x6b   :  { %1076 = vmatprep.subr.bf16.mxu0 %v4135_v23  ;;  %1117 = vmatprep.subr.bf16.mxu1 %v4137_v24 }
  0x6e   :  { %1077 = vmatpush1.bf16.msra.mxu0 %v4139_v25  ;;  %1118 = vmatpush1.bf16.msra.mxu1 %v4141_v26 }
  0x6f   :  { %1078 = vmatprep.subr.bf16.mxu0 %v4147_v27  ;;  %1119 = vmatprep.subr.bf16.mxu1 %v4149_v28 }
  0x72   :  { %1079 = vmatpush1.bf16.msra.mxu0 %v4151_v29  ;;  %1120 = vmatpush1.bf16.msra.mxu1 %v4153_v30  ;;  %v4239_v30 = vld [vmem:[#allocation2 + $0x344] ss:$16 sps:$4 sm:$0xff]   ;;  %v4242_v29 = vld [vmem:[#allocation2 + $0x34c] ss:$16 sps:$4 sm:$0xff]  }
  0x73   :  { %1080 = vmatprep.subr.bf16.mxu0 %v4159_v31  ;;  %1121 = vmatprep.subr.bf16.mxu1 %v4161_v32  ;;  %v4183_v32 = vld [vmem:[#allocation2 + $0x3e4] ss:$16 sps:$4 sm:$0xff]   ;;  %v4189_v31 = vld [vmem:[#allocation2 + $0x3e8] ss:$16 sps:$4 sm:$0xff]   ;;  %5409 = vst [vmem:[#allocation53_spill] sm:$0xff] %v4239_v30  ;;  %5410 = vst [vmem:[#allocation54_spill] sm:$0xff] %v4242_v29 }
  0x74   :  { %5389 = vst [vmem:[#allocation33_spill] sm:$0xff] %v4183_v32  ;;  %5392 = vst [vmem:[#allocation36_spill] sm:$0xff] %v4189_v31 }
  0x76   :  { %1081 = vmatpush1.bf16.msra.mxu0 %v4163_v33  ;;  %1122 = vmatpush1.bf16.msra.mxu1 %v4165_v34  ;;  %v4185_v33 = vld [vmem:[#allocation2 + $0x3ec] ss:$16 sps:$4 sm:$0xff]   ;;  %v4187_v34 = vld [vmem:[#allocation2 + $0x3e0] ss:$16 sps:$4 sm:$0xff]  }
  0x77   :  { %1082 = vmatprep.subr.bf16.mxu0 %v4171_v37  ;;  %1123 = vmatprep.subr.bf16.mxu1 %v4173_v45  ;;  %5390 = vst [vmem:[#allocation34_spill] sm:$0xff] %v4185_v33  ;;  %5391 = vst [vmem:[#allocation35_spill] sm:$0xff] %v4187_v34  ;;  %v4195_v45 = vld [vmem:[#allocation2 + $0x3c4] ss:$16 sps:$4 sm:$0xff]   ;;  %v4201_v37 = vld [vmem:[#allocation2 + $0x3c8] ss:$16 sps:$4 sm:$0xff]  }
  0x78   :  { %5393 = vst [vmem:[#allocation37_spill] sm:$0xff] %v4195_v45  ;;  %5396 = vst [vmem:[#allocation40_spill] sm:$0xff] %v4201_v37 }
  0x7a   :  { %1083 = vmatpush1.bf16.msra.mxu0 %v4175_v48  ;;  %1124 = vmatpush1.bf16.msra.mxu1 %v4177_v0  ;;  %v4197_v48 = vld [vmem:[#allocation2 + $0x3cc] ss:$16 sps:$4 sm:$0xff]   ;;  %v4199_v0 = vld [vmem:[#allocation2 + $0x3c0] ss:$16 sps:$4 sm:$0xff]  }
  0x7b   :  { %1084 = vmatprep.subr.bf16.mxu0 %v4183_v32  ;;  %1125 = vmatprep.subr.bf16.mxu1 %v4185_v33  ;;  %5394 = vst [vmem:[#allocation38_spill] sm:$0xff] %v4197_v48  ;;  %5395 = vst [vmem:[#allocation39_spill] sm:$0xff] %v4199_v0  ;;  %v4207_v33 = vld [vmem:[#allocation2 + $0x3a4] ss:$16 sps:$4 sm:$0xff]   ;;  %v4213_v32 = vld [vmem:[#allocation2 + $0x3a8] ss:$16 sps:$4 sm:$0xff]  }
  0x7c   :  { %5397 = vst [vmem:[#allocation41_spill] sm:$0xff] %v4207_v33  ;;  %5400 = vst [vmem:[#allocation44_spill] sm:$0xff] %v4213_v32 }
  0x7e   :  { %1085 = vmatpush2.bf16.msra.mxu0 %v4187_v34  ;;  %1126 = vmatpush2.bf16.msra.mxu1 %v4189_v31  ;;  %v4209_v34 = vld [vmem:[#allocation2 + $0x3ac] ss:$16 sps:$4 sm:$0xff]   ;;  %v4211_v31 = vld [vmem:[#allocation2 + $0x3a0] ss:$16 sps:$4 sm:$0xff]  }
  0x7f   :  { %1086 = vmatprep.subr.bf16.mxu0 %v4195_v45  ;;  %1127 = vmatprep.subr.bf16.mxu1 %v4197_v48  ;;  %5398 = vst [vmem:[#allocation42_spill] sm:$0xff] %v4209_v34  ;;  %5399 = vst [vmem:[#allocation43_spill] sm:$0xff] %v4211_v31  ;;  %v4219_v48 = vld [vmem:[#allocation2 + $0x384] ss:$16 sps:$4 sm:$0xff]   ;;  %v4225_v45 = vld [vmem:[#allocation2 + $0x388] ss:$16 sps:$4 sm:$0xff]  }
  0x80   :  { %5401 = vst [vmem:[#allocation45_spill] sm:$0xff] %v4219_v48  ;;  %5404 = vst [vmem:[#allocation48_spill] sm:$0xff] %v4225_v45 }
  0x82   :  { %1087 = vmatpush2.bf16.msra.mxu0 %v4199_v0  ;;  %1128 = vmatpush2.bf16.msra.mxu1 %v4201_v37  ;;  %v4221_v0 = vld [vmem:[#allocation2 + $0x38c] ss:$16 sps:$4 sm:$0xff]   ;;  %v4223_v37 = vld [vmem:[#allocation2 + $0x380] ss:$16 sps:$4 sm:$0xff]  }
  0x83   :  { %1088 = vmatprep.subr.bf16.mxu0 %v4207_v33  ;;  %1129 = vmatprep.subr.bf16.mxu1 %v4209_v34  ;;  %5402 = vst [vmem:[#allocation46_spill] sm:$0xff] %v4221_v0  ;;  %5403 = vst [vmem:[#allocation47_spill] sm:$0xff] %v4223_v37  ;;  %v4231_v34 = vld [vmem:[#allocation2 + $0x360] ss:$16 sps:$4 sm:$0xff]   ;;  %v4237_v33 = vld [vmem:[#allocation2 + $0x36c] ss:$16 sps:$4 sm:$0xff]  }
  0x84   :  { %5405 = vst [vmem:[#allocation49_spill] sm:$0xff] %v4231_v34  ;;  %5408 = vst [vmem:[#allocation52_spill] sm:$0xff] %v4237_v33 }
  0x86   :  { %1089 = vmatpush2.bf16.msra.mxu0 %v4211_v31  ;;  %1130 = vmatpush2.bf16.msra.mxu1 %v4213_v32  ;;  %v4233_v31 = vld [vmem:[#allocation2 + $0x364] ss:$16 sps:$4 sm:$0xff]   ;;  %v4235_v32 = vld [vmem:[#allocation2 + $0x368] ss:$16 sps:$4 sm:$0xff]  }
  0x87   :  { %1090 = vmatprep.subr.bf16.mxu0 %v4219_v48  ;;  %1131 = vmatprep.subr.bf16.mxu1 %v4221_v0  ;;  %5406 = vst [vmem:[#allocation50_spill] sm:$0xff] %v4233_v31  ;;  %5407 = vst [vmem:[#allocation51_spill] sm:$0xff] %v4235_v32  ;;  %v4253_v0 = vld [vmem:[#allocation2 + $0x324] ss:$16 sps:$4 sm:$0xff]   ;;  %v4255_v48 = vld [vmem:[#allocation2 + $0x32c] ss:$16 sps:$4 sm:$0xff]  }
  0x88   :  { %5413 = vst [vmem:[#allocation57_spill] sm:$0xff] %v4253_v0  ;;  %5414 = vst [vmem:[#allocation58_spill] sm:$0xff] %v4255_v48 }
  0x8a   :  { %1091 = vmatpush2.bf16.msra.mxu0 %v4223_v37  ;;  %1132 = vmatpush2.bf16.msra.mxu1 %v4225_v45  ;;  %v4247_v45 = vld [vmem:[#allocation2 + $0x340] ss:$16 sps:$4 sm:$0xff]   ;;  %v4249_v37 = vld [vmem:[#allocation2 + $0x348] ss:$16 sps:$4 sm:$0xff]  }
  0x8b   :  { %1092 = vmatprep.subr.bf16.mxu0 %v4233_v31  ;;  %1133 = vmatprep.subr.bf16.mxu1 %v4237_v33  ;;  %5411 = vst [vmem:[#allocation55_spill] sm:$0xff] %v4247_v45  ;;  %5412 = vst [vmem:[#allocation56_spill] sm:$0xff] %v4249_v37  ;;  %v3947_v31 = vmov 0.0|0.0   ;;  %v78_v33 = vld [vmem:[#allocation4] ss:$8 sm:$0xf] }
  0x8c   :  { %1100 = vmatprep.mubr.bf16.mxu0 %v3947_v31  ;;  %1141 = vmatprep.mubr.bf16.mxu1 %v3947_v31  ;;  %v4271_v31 = vld [vmem:[#allocation2 + $0x300] ss:$16 sps:$4 sm:$0xff]  }
  0x8d   :  { %5419 = vst [vmem:[#allocation63_spill] sm:$0xff] %v4271_v31 }
  0x8e   :  { %1093 = vmatpush2.bf16.msra.mxu0 %v4231_v34  ;;  %1134 = vmatpush2.bf16.msra.mxu1 %v4235_v32  ;;  %v4259_v32 = vld [vmem:[#allocation2 + $0x320] ss:$16 sps:$4 sm:$0xff]   ;;  %v4261_v34 = vld [vmem:[#allocation2 + $0x328] ss:$16 sps:$4 sm:$0xff]  }
  0x8f   :  { %1094 = vmatprep.subr.bf16.mxu0 %v4239_v30  ;;  %1135 = vmatprep.subr.bf16.mxu1 %v4242_v29  ;;  %5415 = vst [vmem:[#allocation59_spill] sm:$0xff] %v4259_v32  ;;  %5416 = vst [vmem:[#allocation60_spill] sm:$0xff] %v4261_v34  ;;  %v4265_v29 = vld [vmem:[#allocation2 + $0x304] ss:$16 sps:$4 sm:$0xff]   ;;  %v4267_v30 = vld [vmem:[#allocation2 + $0x30c] ss:$16 sps:$4 sm:$0xff]  }
  0x90   :  { %5417 = vst [vmem:[#allocation61_spill] sm:$0xff] %v4265_v29  ;;  %5418 = vst [vmem:[#allocation62_spill] sm:$0xff] %v4267_v30 }
  0x92   :  { %1095 = vmatpush2.bf16.msra.mxu0 %v4247_v45  ;;  %1136 = vmatpush2.bf16.msra.mxu1 %v4249_v37  ;;  %v4273_v45 = vld [vmem:[#allocation2 + $0x308] ss:$16 sps:$4 sm:$0xff]  }
  0x93   :  { %1096 = vmatprep.subr.bf16.mxu0 %v4253_v0  ;;  %1137 = vmatprep.subr.bf16.mxu1 %v4255_v48  ;;  %5420 = vst [vmem:[#allocation64_spill] sm:$0xff] %v4273_v45  ;;  %v80_v48 = vlaneseq }
  0x96   :  { %1097 = vmatpush2.bf16.msra.mxu0 %v4259_v32  ;;  %1138 = vmatpush2.bf16.msra.mxu1 %v4261_v34  ;;  %v81_v32 = vshrl.u32 %v80_v48, 7 }
  0x97   :  { %1098 = vmatprep.subr.bf16.mxu0 %v4265_v29  ;;  %1139 = vmatprep.subr.bf16.mxu1 %v4267_v30 }
  0x98   :  { %v4281_v0 = vsub.s32 2, %v81_v32  ;;  %v4283_v34 = vsub.s32 0, %v81_v32  ;;  %v4285_v37 = vsub.s32 3, %v81_v32  ;;  %v4287_v30 = vsub.s32 1, %v81_v32 }
  0x9a   :  { %1099 = vmatpush2.bf16.msra.mxu0 %v4271_v31  ;;  %1140 = vmatpush2.bf16.msra.mxu1 %v4273_v45  ;;  %5421 = vst [vmem:[#allocation65_spill] sm:$0xff] %v4281_v0  ;;  %5422 = vst [vmem:[#allocation66_spill] sm:$0xff] %v4283_v34  ;;  %v91_v31 = vrot.slane %v78_v33, %v4281_v0  ;;  %v87_v25 = vrot.slane %v78_v33, %v4287_v30 }
  0x9b   :  { %1169 = vmatprep.subr.bf16.mxu0 %v3982_v35  ;;  %1210 = vmatprep.subr.bf16.mxu1 %v3984_v36  ;;  %5423 = vst [vmem:[#allocation67_spill] sm:$0xff] %v4285_v37  ;;  %5424 = vst [vmem:[#allocation68_spill] sm:$0xff] %v4287_v30  ;;  %v83_v35 = vrot.slane %v78_v33, %v4283_v34  ;;  %v95_v36 = vrot.slane %v78_v33, %v4285_v37 }
  0xfd   :  { %v294_v29 = vpop.f32.mrf.mxu0  ;;  %v345_v28 = vpop.f32.mrf.mxu1 }
  0xff   :  { %v296_v45 = vpop.f32.mrf.mxu0  ;;  %v347_v27 = vpop.f32.mrf.mxu1 }
 0x101   :  { %v298_v48 = vpop.f32.mrf.mxu0  ;;  %v349_v26 = vpop.f32.mrf.mxu1 }
 0x102   :  { %v4293_v24 = vadd.f32 %v298_v48, %v83_v35  ;;  %v4295_v23 = vadd.f32 %v349_v26, %v91_v31 }
 0x103   :  { %v300_v22 = vpop.f32.mrf.mxu0  ;;  %v351_v21 = vpop.f32.mrf.mxu1 }
 0x104   :  { %5425 = vst [vmem:[#allocation69_spill] sm:$0xff] %v4293_v24  ;;  %5426 = vst [vmem:[#allocation70_spill] sm:$0xff] %v4295_v23  ;;  %v4297_v32 = vadd.f32 %v300_v22, %v87_v25  ;;  %v4299_v20 = vadd.f32 %v351_v21, %v95_v36  ;;  %v295_v22 = vadd.f32 %v294_v29, %v83_v35 }
 0x105   :  { %v304_v0 = vpop.f32.mrf.mxu0  ;;  %v355_v19 = vpop.f32.mrf.mxu1  ;;  %v346_v29 = vadd.f32 %v345_v28, %v91_v31  ;;  %v5465_v28 = vld [vmem:[#allocation39_spill] sm:$0xff] }
 0x106   :  { %5427 = vst [vmem:[#allocation71_spill] sm:$0xff] %v4297_v32  ;;  %5428 = vst [vmem:[#allocation72_spill] sm:$0xff] %v4299_v20  ;;  %v4301_v18 = vadd.f32 %v304_v0, %v83_v35  ;;  %v4303_v34 = vadd.f32 %v355_v19, %v91_v31  ;;  %v5466_v31 = vld [vmem:[#allocation40_spill] sm:$0xff] }
 0x107   :  { %v306_v37 = vpop.f32.mrf.mxu0  ;;  %v357_v17 = vpop.f32.mrf.mxu1 }
 0x108   :  { %5429 = vst [vmem:[#allocation73_spill] sm:$0xff] %v4301_v18  ;;  %5430 = vst [vmem:[#allocation74_spill] sm:$0xff] %v4303_v34  ;;  %v4305_v16 = vadd.f32 %v306_v37, %v87_v25  ;;  %v4307_v33 = vadd.f32 %v357_v17, %v95_v36  ;;  %v297_v34 = vadd.f32 %v296_v45, %v87_v25 }
 0x109   :  { %v308_v26 = vpop.f32.mrf.mxu0  ;;  %v359_v48 = vpop.f32.mrf.mxu1 }
 0x10a   :  { %5431 = vst [vmem:[#allocation75_spill] sm:$0xff] %v4305_v16  ;;  %5432 = vst [vmem:[#allocation76_spill] sm:$0xff] %v4307_v33 }
 0x10b   :  { %v309_v23 = vpop.f32.mrf.mxu0  ;;  %v360_v24 = vpop.f32.mrf.mxu1 }
 0x10c   :  { %v348_v24 = vadd.f32 %v347_v27, %v95_v36  ;;  %v5464_v27 = vld [vmem:[#allocation38_spill] sm:$0xff]  ;;  %v5467_v36 = vld [vmem:[#allocation41_spill] sm:$0xff] }
 0x11d   :  { %v611_v32 = vpop.f32.mrf.mxu0  ;;  %v652_v21 = vpop.f32.mrf.mxu1 }
 0x11e   :  { %v659_v20 = vadd.f32 %v611_v32, %v295_v22  ;;  %v661_v33 = vadd.f32 %v652_v21, %v346_v29  ;;  %v5469_v21 = vld [vmem:[#allocation43_spill] sm:$0xff]  ;;  %v5477_v29 = vld [vmem:[#allocation49_spill] sm:$0xff] }
 0x11f   :  { %v613_v30 = vpop.f32.mrf.mxu0  ;;  %v654_v15 = vpop.f32.mrf.mxu1 }
 0x120   :  { %v3140_v0 = vmul.f32 -1.442695, %v659_v20  ;;  %v660_v16 = vadd.f32 %v613_v30, %v297_v34  ;;  %v662_v32 = vadd.f32 %v654_v15, %v348_v24  ;;  %v5433_v15 = vmov 0   ;;  %v5476_v24 = vld [vmem:[#allocation52_spill] sm:$0xff] }
 0x121   :  { %v615_v18 = vpop.f32.mrf.mxu0  ;;  %v656_v19 = vpop.f32.mrf.mxu1 }
 0x122   :  { %3746 = vpow2.f32 %v3140_v0  ;;  %v3141_v17 = vmul.f32 -1.442695, %v660_v16  ;;  %v5470_v19 = vld [vmem:[#allocation44_spill] sm:$0xff] }
 0x123   :  { %v616_v14 = vpop.f32.mrf.mxu0  ;;  %v657_v37 = vpop.f32.mrf.mxu1 }
 0x124   :  { %3748 = vpow2.f32 %v3141_v17  ;;  %v5471_v37 = vld [vmem:[#allocation45_spill] sm:$0xff]  ;;  %v5472_v17 = vld [vmem:[#allocation46_spill] sm:$0xff] }
 0x12f   :  { %v3747_v26 = vpop.eup %3746 }
 0x130   :  { %v666_v48 = vadd.f32 1.0, %v3747_v26  ;;  %v5473_v26 = vld [vmem:[#allocation47_spill] sm:$0xff] }
 0x131   :  { %v3749_v23 = vpop.eup %3748 }
 0x132   :  { %3750 = vrcp.f32 %v666_v48  ;;  %v672_v35 = vadd.f32 1.0, %v3749_v23  ;;  %v5474_v48 = vld [vmem:[#allocation48_spill] sm:$0xff]  ;;  %v5475_v23 = vld [vmem:[#allocation50_spill] sm:$0xff] }
 0x134   :  { %3752 = vrcp.f32 %v672_v35  ;;  %v5478_v35 = vld [vmem:[#allocation51_spill] sm:$0xff] }
 0x13f   :  { %v3751_v22 = vpop.eup %3750 }
 0x140   :  { %v675_v18 = vmul.f32 %v3751_v22, %v662_v32  ;;  %v5479_v32 = vld [vmem:[#allocation53_spill] sm:$0xff]  ;;  %v5480_v22 = vld [vmem:[#allocation54_spill] sm:$0xff] }
 0x141   :  { %v3753_v25 = vpop.eup %3752 }
 0x142   :  { %v676_v20 = vadd.f32 %v675_v18, %v661_v33  ;;  %v678_v14 = vsub.f32 1.0, %v3753_v25  ;;  %v680_v16 = vmul.f32 0.0, %v3753_v25  ;;  %v5468_v33 = vld [vmem:[#allocation42_spill] sm:$0xff]  ;;  %v5481_v18 = vld [vmem:[#allocation55_spill] sm:$0xff]  ;;  %v5483_v25 = vld [vmem:[#allocation57_spill] sm:$0xff] }
 0x144   :  { %3754 = vtanh.f32 %v676_v20  ;;  %v5482_v20 = vld [vmem:[#allocation56_spill] sm:$0xff] }
 0x151   :  { %v3755_v45 = vpop.eup %3754 }
 0x152   :  { %v679_v30 = vmul.f32 %v3755_v45, %v678_v14  ;;  %v5484_v14 = vld [vmem:[#allocation58_spill] sm:$0xff]  ;;  %v5485_v45 = vld [vmem:[#allocation59_spill] sm:$0xff] }
 0x154   :  { %v4309_v34 = vadd.f32 %v680_v16, %v679_v30  ;;  %v5486_v30 = vld [vmem:[#allocation60_spill] sm:$0xff]  ;;  %v5487_v16 = vld [vmem:[#allocation61_spill] sm:$0xff] }
 0x156   :  { %v682_v0 = vpack.c.bf16 %v4309_v34, %v4309_v34 }
 0x158   :  { %1101 = vmatmul.mubr.bf16.vlgmr.msra.gmra.mxu0 %v682_v0  ;;  %1142 = vmatmul.mubr.bf16.vlgmr.msra.gmra.mxu1 %v682_v0 }
 0x159   :  { %1170 = vmatpush1.bf16.msra.mxu0 %v3986_v38  ;;  %1211 = vmatpush1.bf16.msra.mxu1 %v3988_v39  ;;  %v5434_v38 = vld [vmem:[#allocation8_spill] sm:$0xff]  ;;  %v5435_v39 = vld [vmem:[#allocation9_spill] sm:$0xff] }
 0x15a   :  { %1171 = vmatprep.subr.bf16.mxu0 %v3992_v40  ;;  %1212 = vmatprep.subr.bf16.mxu1 %v3994_v41  ;;  %v5436_v40 = vld [vmem:[#allocation10_spill] sm:$0xff]  ;;  %v5437_v41 = vld [vmem:[#allocation11_spill] sm:$0xff] }
 0x15b   :  { %1201 = vmatprep.mubr.bf16.mxu0 %v5433_v15  ;;  %1242 = vmatprep.mubr.bf16.mxu1 %v5433_v15 }
 0x15d   :  { %1172 = vmatpush1.bf16.msra.mxu0 %v3996_v42  ;;  %1213 = vmatpush1.bf16.msra.mxu1 %v3998_v43  ;;  %v5438_v42 = vld [vmem:[#allocation12_spill] sm:$0xff]  ;;  %v5439_v43 = vld [vmem:[#allocation13_spill] sm:$0xff] }
 0x15e   :  { %1173 = vmatprep.subr.bf16.mxu0 %v4002_v44  ;;  %1214 = vmatprep.subr.bf16.mxu1 %v4009_v46  ;;  %v5440_v44 = vld [vmem:[#allocation14_spill] sm:$0xff]  ;;  %v5441_v46 = vld [vmem:[#allocation15_spill] sm:$0xff] }
 0x161   :  { %1174 = vmatpush1.bf16.msra.mxu0 %v4013_v47  ;;  %1215 = vmatpush1.bf16.msra.mxu1 %v4017_v49  ;;  %v5442_v47 = vld [vmem:[#allocation16_spill] sm:$0xff]  ;;  %v5443_v49 = vld [vmem:[#allocation17_spill] sm:$0xff] }
 0x162   :  { %1175 = vmatprep.subr.bf16.mxu0 %v4019_v50  ;;  %1216 = vmatprep.subr.bf16.mxu1 %v4023_v51  ;;  %v5444_v50 = vld [vmem:[#allocation18_spill] sm:$0xff]  ;;  %v5445_v51 = vld [vmem:[#allocation19_spill] sm:$0xff] }
 0x165   :  { %1176 = vmatpush1.bf16.msra.mxu0 %v4025_v52  ;;  %1217 = vmatpush1.bf16.msra.mxu1 %v4027_v53  ;;  %v5446_v52 = vld [vmem:[#allocation20_spill] sm:$0xff]  ;;  %v5447_v53 = vld [vmem:[#allocation21_spill] sm:$0xff] }
 0x166   :  { %1177 = vmatprep.subr.bf16.mxu0 %v4029_v54  ;;  %1218 = vmatprep.subr.bf16.mxu1 %v4033_v55  ;;  %v5448_v54 = vld [vmem:[#allocation22_spill] sm:$0xff]  ;;  %v5449_v55 = vld [vmem:[#allocation23_spill] sm:$0xff] }
 0x169   :  { %1178 = vmatpush1.bf16.msra.mxu0 %v4037_v56  ;;  %1219 = vmatpush1.bf16.msra.mxu1 %v4039_v57  ;;  %v5450_v56 = vld [vmem:[#allocation24_spill] sm:$0xff]  ;;  %v5451_v57 = vld [vmem:[#allocation25_spill] sm:$0xff] }
 0x16a   :  { %1179 = vmatprep.subr.bf16.mxu0 %v4043_v58  ;;  %1220 = vmatprep.subr.bf16.mxu1 %v4045_v59  ;;  %v5452_v58 = vld [vmem:[#allocation26_spill] sm:$0xff]  ;;  %v5453_v59 = vld [vmem:[#allocation27_spill] sm:$0xff] }
 0x16d   :  { %1180 = vmatpush1.bf16.msra.mxu0 %v4051_v60  ;;  %1221 = vmatpush1.bf16.msra.mxu1 %v4053_v61  ;;  %v5454_v60 = vld [vmem:[#allocation28_spill] sm:$0xff]  ;;  %v5455_v61 = vld [vmem:[#allocation29_spill] sm:$0xff] }
 0x16e   :  { %1181 = vmatprep.subr.bf16.mxu0 %v4055_v62  ;;  %1222 = vmatprep.subr.bf16.mxu1 %v4057_v63  ;;  %v5456_v62 = vld [vmem:[#allocation30_spill] sm:$0xff]  ;;  %v5457_v63 = vld [vmem:[#allocation31_spill] sm:$0xff] }
 0x171   :  { %1182 = vmatpush1.bf16.msra.mxu0 %v4063_v1  ;;  %1223 = vmatpush1.bf16.msra.mxu1 %v4065_v2  ;;  %v5458_v1 = vld [vmem:[#allocation32_spill] sm:$0xff]  ;;  %v5459_v2 = vld [vmem:[#allocation33_spill] sm:$0xff] }
 0x172   :  { %1183 = vmatprep.subr.bf16.mxu0 %v4067_v3  ;;  %1224 = vmatprep.subr.bf16.mxu1 %v4069_v4  ;;  %v5460_v3 = vld [vmem:[#allocation34_spill] sm:$0xff]  ;;  %v5461_v4 = vld [vmem:[#allocation35_spill] sm:$0xff] }
 0x175   :  { %1184 = vmatpush1.bf16.msra.mxu0 %v4075_v5  ;;  %1225 = vmatpush1.bf16.msra.mxu1 %v4077_v6  ;;  %v5462_v5 = vld [vmem:[#allocation36_spill] sm:$0xff]  ;;  %v5463_v6 = vld [vmem:[#allocation37_spill] sm:$0xff] }
 0x176   :  { %1276 = vmatprep.subr.bf16.mxu0 %v4089_v8  ;;  %1317 = vmatprep.subr.bf16.mxu1 %v4093_v10 }
 0x178   :  { %1202 = vmatmul.mubr.bf16.vlgmr.msra.gmra.mxu0 %v682_v0  ;;  %1243 = vmatmul.mubr.bf16.vlgmr.msra.gmra.mxu1 %v682_v0  ;;  %v5488_v0 = vld [vmem:[#allocation62_spill] sm:$0xff] }
 0x179   :  { %1277 = vmatpush1.bf16.msra.mxu0 %v4087_v7  ;;  %1318 = vmatpush1.bf16.msra.mxu1 %v4091_v9 }
 0x17a   :  { %1278 = vmatprep.subr.bf16.mxu0 %v4095_v11  ;;  %1319 = vmatprep.subr.bf16.mxu1 %v4098_v12 }
 0x17d   :  { %1279 = vmatpush1.bf16.msra.mxu0 %v4102_v13  ;;  %1320 = vmatpush1.bf16.msra.mxu1 %v5434_v38 }
 0x17e   :  { %1280 = vmatprep.subr.bf16.mxu0 %v5435_v39  ;;  %1321 = vmatprep.subr.bf16.mxu1 %v5436_v40 }
 0x181   :  { %1281 = vmatpush1.bf16.msra.mxu0 %v5437_v41  ;;  %1322 = vmatpush1.bf16.msra.mxu1 %v5438_v42 }
 0x182   :  { %1282 = vmatprep.subr.bf16.mxu0 %v5439_v43  ;;  %1323 = vmatprep.subr.bf16.mxu1 %v5440_v44 }
 0x185   :  { %1283 = vmatpush1.bf16.msra.mxu0 %v5441_v46  ;;  %1324 = vmatpush1.bf16.msra.mxu1 %v5442_v47 }
 0x186   :  { %1284 = vmatprep.subr.bf16.mxu0 %v5443_v49  ;;  %1325 = vmatprep.subr.bf16.mxu1 %v5444_v50 }
 0x189   :  { %1285 = vmatpush1.bf16.msra.mxu0 %v5445_v51  ;;  %1326 = vmatpush1.bf16.msra.mxu1 %v5446_v52 }
 0x18a   :  { %1286 = vmatprep.subr.bf16.mxu0 %v5447_v53  ;;  %1327 = vmatprep.subr.bf16.mxu1 %v5448_v54 }
 0x18d   :  { %1287 = vmatpush1.bf16.msra.mxu0 %v5449_v55  ;;  %1328 = vmatpush1.bf16.msra.mxu1 %v5450_v56 }
 0x18e   :  { %1288 = vmatprep.subr.bf16.mxu0 %v5451_v57  ;;  %1329 = vmatprep.subr.bf16.mxu1 %v5452_v58 }
 0x191   :  { %1289 = vmatpush1.bf16.msra.mxu0 %v5453_v59  ;;  %1330 = vmatpush1.bf16.msra.mxu1 %v5454_v60 }
 0x192   :  { %1290 = vmatprep.subr.bf16.mxu0 %v5455_v61  ;;  %1331 = vmatprep.subr.bf16.mxu1 %v5456_v62 }
 0x195   :  { %1291 = vmatpush1.bf16.msra.mxu0 %v5457_v63  ;;  %1332 = vmatpush1.bf16.msra.mxu1 %v5458_v1 }
 0x196   :  { %1292 = vmatprep.subr.bf16.mxu0 %v5459_v2  ;;  %1333 = vmatprep.subr.bf16.mxu1 %v5460_v3 }
 0x199   :  { %1293 = vmatpush2.bf16.msra.mxu0 %v5461_v4  ;;  %1334 = vmatpush2.bf16.msra.mxu1 %v5462_v5 }
 0x19a   :  { %1294 = vmatprep.subr.bf16.mxu0 %v5463_v6  ;;  %1335 = vmatprep.subr.bf16.mxu1 %v5464_v27 }
 0x19d   :  { %1295 = vmatpush2.bf16.msra.mxu0 %v5465_v28  ;;  %1336 = vmatpush2.bf16.msra.mxu1 %v5466_v31 }
 0x19e   :  { %1296 = vmatprep.subr.bf16.mxu0 %v5467_v36  ;;  %1337 = vmatprep.subr.bf16.mxu1 %v5468_v33 }
 0x1a1   :  { %1297 = vmatpush2.bf16.msra.mxu0 %v5469_v21  ;;  %1338 = vmatpush2.bf16.msra.mxu1 %v5470_v19 }
 0x1a2   :  { %1298 = vmatprep.subr.bf16.mxu0 %v5471_v37  ;;  %1339 = vmatprep.subr.bf16.mxu1 %v5472_v17 }
 0x1a5   :  { %1299 = vmatpush2.bf16.msra.mxu0 %v5473_v26  ;;  %1340 = vmatpush2.bf16.msra.mxu1 %v5474_v48 }
 0x1a6   :  { %1300 = vmatprep.subr.bf16.mxu0 %v5475_v23  ;;  %1341 = vmatprep.subr.bf16.mxu1 %v5476_v24 }
 0x1a9   :  { %1301 = vmatpush2.bf16.msra.mxu0 %v5477_v29  ;;  %1342 = vmatpush2.bf16.msra.mxu1 %v5478_v35  ;;  %v5489_v35 = vld [vmem:[#allocation63_spill] sm:$0xff] }
 0x1aa   :  { %1302 = vmatprep.subr.bf16.mxu0 %v5479_v32  ;;  %1343 = vmatprep.subr.bf16.mxu1 %v5480_v22  ;;  %v5490_v32 = vld [vmem:[#allocation64_spill] sm:$0xff] }
 0x1ab   :  { %v3866_v22 = vld [vmem:[#allocation2 + $0x1e4] ss:$16 sps:$4 sm:$0xff]  }
 0x1ad   :  { %1303 = vmatpush2.bf16.msra.mxu0 %v5481_v18  ;;  %1344 = vmatpush2.bf16.msra.mxu1 %v5482_v20  ;;  %v3867_v18 = vld [vmem:[#allocation2 + $0x1ec] ss:$16 sps:$4 sm:$0xff]   ;;  %v363_v20 = vld [vmem:[#allocation4 + $0x1] ss:$8 sm:$0xf] }
 0x1ae   :  { %1304 = vmatprep.subr.bf16.mxu0 %v5483_v25  ;;  %1345 = vmatprep.subr.bf16.mxu1 %v5484_v14  ;;  %v5491_v25 = vld [vmem:[#allocation66_spill] sm:$0xff] }
 0x1af   :  { %v4410_v29 = vrot.slane %v363_v20, %v5491_v25 }
 0x1b1   :  { %1305 = vmatpush2.bf16.msra.mxu0 %v5485_v45  ;;  %1346 = vmatpush2.bf16.msra.mxu1 %v5486_v30  ;;  %5492 = vst [vmem:[#allocation8_spill] sm:$0xff] %v4410_v29 }
 0x1b2   :  { %1306 = vmatprep.subr.bf16.mxu0 %v5487_v16  ;;  %1347 = vmatprep.subr.bf16.mxu1 %v5488_v0  ;;  %v5493_v0 = vld [vmem:[#allocation68_spill] sm:$0xff] }
 0x1b3   :  { %v4414_v48 = vrot.slane %v363_v20, %v5493_v0 }
 0x1b5   :  { %1307 = vmatpush2.bf16.msra.mxu0 %v5489_v35  ;;  %1348 = vmatpush2.bf16.msra.mxu1 %v5490_v32  ;;  %5494 = vst [vmem:[#allocation9_spill] sm:$0xff] %v4414_v48 }
 0x1b6   :  { %1377 = vmatprep.subr.bf16.mxu0 %v3866_v22  ;;  %1418 = vmatprep.subr.bf16.mxu1 %v3867_v18 }
 0x218   :  { %v1102_v14 = vpop.f32.mrf.mxu0  ;;  %v1143_v45 = vpop.f32.mrf.mxu1 }
 0x219   :  { %v1103_v30 = vadd.f32 %v1102_v14, %v4410_v29  ;;  %v5495_v14 = vld [vmem:[#allocation67_spill] sm:$0xff] }
 0x21a   :  { %v1104_v24 = vpop.f32.mrf.mxu0  ;;  %v1145_v16 = vpop.f32.mrf.mxu1  ;;  %v4418_v29 = vrot.slane %v363_v20, %v5495_v14 }
 0x21b   :  { %v3206_v23 = vmul.f32 -1.442695, %v1103_v30  ;;  %v1105_v18 = vadd.f32 %v1104_v24, %v4414_v48  ;;  %v5497_v30 = vld [vmem:[#allocation65_spill] sm:$0xff] }
 0x21c   :  { %v1106_v35 = vpop.f32.mrf.mxu0  ;;  %v1147_v32 = vpop.f32.mrf.mxu1  ;;  %5496 = vst [vmem:[#allocation10_spill] sm:$0xff] %v4418_v29  ;;  %v4421_v21 = vrot.slane %v363_v20, %v5497_v30  ;;  %v5499_v30 = vld [vmem:[#allocation71_spill] sm:$0xff] }
 0x21d   :  { %3756 = vpow2.f32 %v3206_v23  ;;  %v3207_v17 = vmul.f32 -1.442695, %v1105_v18  ;;  %v1146_v23 = vadd.f32 %v1145_v16, %v4418_v29 }
 0x21e   :  { %v1107_v22 = vpop.f32.mrf.mxu0  ;;  %v1148_v26 = vpop.f32.mrf.mxu1 }
 0x21f   :  { %3758 = vpow2.f32 %v3207_v17  ;;  %v5498_v26 = vld [vmem:[#allocation69_spill] sm:$0xff] }
 0x22a   :  { %v3757_v25 = vpop.eup %3756 }
 0x22b   :  { %v1153_v37 = vadd.f32 1.0, %v3757_v25  ;;  %v1144_v25 = vadd.f32 %v1143_v45, %v4421_v21 }
 0x22c   :  { %v3759_v19 = vpop.eup %3758 }
 0x22d   :  { %3760 = vrcp.f32 %v1153_v37  ;;  %v1159_v0 = vadd.f32 1.0, %v3759_v19 }
 0x22f   :  { %3762 = vrcp.f32 %v1159_v0 }
 0x238   :  { %v1203_v35 = vpop.f32.mrf.mxu0  ;;  %v1244_v32 = vpop.f32.mrf.mxu1 }
 0x239   :  { %v1251_v22 = vadd.f32 %v1203_v35, %v5498_v26 }
 0x23a   :  { %v3761_v24 = vpop.eup %3760  ;;  %v1205_v18 = vpop.f32.mrf.mxu0 }
 0x23b   :  { %v1246_v17 = vpop.f32.mrf.mxu1  ;;  %v1162_v37 = vmul.f32 %v3761_v24, %v1146_v23  ;;  %v3208_v48 = vmul.f32 -1.442695, %v1251_v22  ;;  %v1252_v31 = vadd.f32 %v1205_v18, %v5499_v30  ;;  %v5501_v22 = vld [vmem:[#allocation70_spill] sm:$0xff] }
 0x23c   :  { %v1207_v14 = vpop.f32.mrf.mxu0  ;;  %v3763_v35 = vpop.eup %3762  ;;  %v1253_v24 = vadd.f32 %v1244_v32, %v5501_v22  ;;  %v3868_v32 = vld [vmem:[#allocation2 + $0x1e0] ss:$16 sps:$4 sm:$0xff]   ;;  %v3881_v22 = vld [vmem:[#allocation2 + $0x188] ss:$16 sps:$4 sm:$0xff]  }
 0x23d   :  { %v1248_v33 = vpop.f32.mrf.mxu1  ;;  %v1163_v36 = vadd.f32 %v1162_v37, %v1144_v25  ;;  %3764 = vpow2.f32 %v3208_v48  ;;  %v3209_v16 = vmul.f32 -1.442695, %v1252_v31  ;;  %v1165_v28 = vsub.f32 1.0, %v3763_v35  ;;  %v5500_v14 = vld [vmem:[#allocation72_spill] sm:$0xff] }
 0x23e   :  { %v1208_v20 = vpop.f32.mrf.mxu0  ;;  %v1167_v0 = vmul.f32 0.0, %v3763_v35  ;;  %v1254_v31 = vadd.f32 %v1246_v17, %v5500_v14  ;;  %v3869_v17 = vld [vmem:[#allocation2 + $0x1e8] ss:$16 sps:$4 sm:$0xff]   ;;  %v3870_v35 = vld [vmem:[#allocation2 + $0x1c4] ss:$16 sps:$4 sm:$0xff]  }
 0x23f   :  { %v1249_v19 = vpop.f32.mrf.mxu1  ;;  %3766 = vtanh.f32 %v1163_v36  ;;  %v3878_v14 = vld [vmem:[#allocation2 + $0x184] ss:$16 sps:$4 sm:$0xff]  }
 0x240   :  { %3768 = vpow2.f32 %v3209_v16 }
 0x24a   :  { %v3765_v26 = vpop.eup %3764 }
 0x24b   :  { %v1258_v29 = vadd.f32 1.0, %v3765_v26  ;;  %v3871_v26 = vld [vmem:[#allocation2 + $0x1cc] ss:$16 sps:$4 sm:$0xff]  }
 0x24c   :  { %v3767_v27 = vpop.eup %3766 }
 0x24d   :  { %3770 = vrcp.f32 %v1258_v29  ;;  %v1166_v45 = vmul.f32 %v3767_v27, %v1165_v28  ;;  %v3769_v36 = vpop.eup %3768 }
 0x24e   :  { %v1264_v48 = vadd.f32 1.0, %v3769_v36  ;;  %v3876_v36 = vld [vmem:[#allocation2 + $0x1a0] ss:$16 sps:$4 sm:$0xff]  }
 0x24f   :  { %v4427_v23 = vadd.f32 %v1167_v0, %v1166_v45  ;;  %v3873_v45 = vld [vmem:[#allocation2 + $0x1c8] ss:$16 sps:$4 sm:$0xff]   ;;  %v3874_v0 = vld [vmem:[#allocation2 + $0x1a4] ss:$16 sps:$4 sm:$0xff]  }
 0x250   :  { %3772 = vrcp.f32 %v1264_v48  ;;  %v3877_v48 = vld [vmem:[#allocation2 + $0x1a8] ss:$16 sps:$4 sm:$0xff]  }
 0x251   :  { %v1275_v33 = vpack.c.bf16 %v4427_v23, %v4427_v23 }
 0x253   :  { %1308 = vmatprep.mubr.bf16.mxu0 %v1275_v33  ;;  %1349 = vmatprep.mubr.bf16.mxu1 %v1275_v33  ;;  %v3875_v33 = vld [vmem:[#allocation2 + $0x1ac] ss:$16 sps:$4 sm:$0xff]  }
 0x25a   :  { %v3771_v30 = vpop.eup %3770 }
 0x25b   :  { %v1267_v18 = vmul.f32 %v3771_v30, %v1254_v31  ;;  %v3879_v31 = vld [vmem:[#allocation2 + $0x18c] ss:$16 sps:$4 sm:$0xff]   ;;  %v3880_v30 = vld [vmem:[#allocation2 + $0x180] ss:$16 sps:$4 sm:$0xff]  }
 0x25d   :  { %v1268_v25 = vadd.f32 %v1267_v18, %v1253_v24  ;;  %v3773_v27 = vpop.eup %3772  ;;  %v3882_v24 = vld [vmem:[#allocation2 + $0x164] ss:$16 sps:$4 sm:$0xff]   ;;  %v3883_v18 = vld [vmem:[#allocation2 + $0x16c] ss:$16 sps:$4 sm:$0xff]  }
 0x25e   :  { %v1270_v28 = vsub.f32 1.0, %v3773_v27  ;;  %v1272_v20 = vmul.f32 %v3773_v27, %v4309_v34  ;;  %v3872_v34 = vld [vmem:[#allocation2 + $0x1c0] ss:$16 sps:$4 sm:$0xff]   ;;  %v3885_v27 = vld [vmem:[#allocation2 + $0x168] ss:$16 sps:$4 sm:$0xff]  }
 0x25f   :  { %3774 = vtanh.f32 %v1268_v25  ;;  %v3884_v25 = vld [vmem:[#allocation2 + $0x160] ss:$16 sps:$4 sm:$0xff]  }
 0x26c   :  { %v3775_v29 = vpop.eup %3774 }
 0x26d   :  { %v1271_v37 = vmul.f32 %v3775_v29, %v1270_v28  ;;  %v3886_v28 = vld [vmem:[#allocation2 + $0x144] ss:$16 sps:$4 sm:$0xff]   ;;  %v3887_v29 = vld [vmem:[#allocation2 + $0x14c] ss:$16 sps:$4 sm:$0xff]  }
 0x26f   :  { %v4434_v19 = vadd.f32 %v1272_v20, %v1271_v37  ;;  %v3888_v37 = vld [vmem:[#allocation2 + $0x140] ss:$16 sps:$4 sm:$0xff]   ;;  %v3889_v20 = vld [vmem:[#allocation2 + $0x148] ss:$16 sps:$4 sm:$0xff]  }
 0x271   :  { %v4438_v16 = vpack.c.bf16 %v4434_v19, %v4434_v19 }
 0x273   :  { %1309 = vmatmul.mubr.bf16.vlgmr.msra.gmra.mxu0 %v4438_v16  ;;  %1350 = vmatmul.mubr.bf16.vlgmr.msra.gmra.mxu1 %v4438_v16 }
 0x274   :  { %1378 = vmatpush1.bf16.msra.mxu0 %v3868_v32  ;;  %1419 = vmatpush1.bf16.msra.mxu1 %v3869_v17  ;;  %v3890_v32 = vld [vmem:[#allocation2 + $0x124] ss:$16 sps:$4 sm:$0xff]   ;;  %v3891_v17 = vld [vmem:[#allocation2 + $0x12c] ss:$16 sps:$4 sm:$0xff]  }
 0x275   :  { %1379 = vmatprep.subr.bf16.mxu0 %v3870_v35  ;;  %1420 = vmatprep.subr.bf16.mxu1 %v3871_v26  ;;  %v3892_v35 = vld [vmem:[#allocation2 + $0x120] ss:$16 sps:$4 sm:$0xff]   ;;  %v3893_v26 = vld [vmem:[#allocation2 + $0x128] ss:$16 sps:$4 sm:$0xff]  }
 0x276   :  { %1409 = vmatprep.mubr.bf16.mxu0 %v5433_v15  ;;  %1450 = vmatprep.mubr.bf16.mxu1 %v5433_v15 }
 0x278   :  { %1380 = vmatpush1.bf16.msra.mxu0 %v3872_v34  ;;  %1421 = vmatpush1.bf16.msra.mxu1 %v3873_v45  ;;  %v3894_v34 = vld [vmem:[#allocation2 + $0x104] ss:$16 sps:$4 sm:$0xff]   ;;  %v3895_v45 = vld [vmem:[#allocation2 + $0x10c] ss:$16 sps:$4 sm:$0xff]  }
 0x279   :  { %1381 = vmatprep.subr.bf16.mxu0 %v3874_v0  ;;  %1422 = vmatprep.subr.bf16.mxu1 %v3875_v33  ;;  %v3896_v0 = vld [vmem:[#allocation2 + $0x100] ss:$16 sps:$4 sm:$0xff]   ;;  %v3897_v33 = vld [vmem:[#allocation2 + $0x108] ss:$16 sps:$4 sm:$0xff]  }
 0x27c   :  { %1382 = vmatpush1.bf16.msra.mxu0 %v3876_v36  ;;  %1423 = vmatpush1.bf16.msra.mxu1 %v3877_v48  ;;  %v5530_v48 = vld [vmem:[#allocation9_spill] sm:$0xff] }
 0x27d   :  { %1383 = vmatprep.subr.bf16.mxu0 %v3878_v14  ;;  %1424 = vmatprep.subr.bf16.mxu1 %v3879_v31 }
 0x280   :  { %1384 = vmatpush1.bf16.msra.mxu0 %v3880_v30  ;;  %1425 = vmatpush1.bf16.msra.mxu1 %v3881_v22 }
 0x281   :  { %1385 = vmatprep.subr.bf16.mxu0 %v3882_v24  ;;  %1426 = vmatprep.subr.bf16.mxu1 %v3883_v18 }
 0x284   :  { %1386 = vmatpush1.bf16.msra.mxu0 %v3884_v25  ;;  %1427 = vmatpush1.bf16.msra.mxu1 %v3885_v27 }
 0x285   :  { %1387 = vmatprep.subr.bf16.mxu0 %v3886_v28  ;;  %1428 = vmatprep.subr.bf16.mxu1 %v3887_v29  ;;  %v5531_v28 = vld [vmem:[#allocation10_spill] sm:$0xff] }
 0x288   :  { %1388 = vmatpush1.bf16.msra.mxu0 %v3888_v37  ;;  %1429 = vmatpush1.bf16.msra.mxu1 %v3889_v20  ;;  %v5532_v37 = vld [vmem:[#allocation73_spill] sm:$0xff] }
 0x289   :  { %1389 = vmatprep.subr.bf16.mxu0 %v3890_v32  ;;  %1430 = vmatprep.subr.bf16.mxu1 %v3891_v17 }
 0x28c   :  { %1390 = vmatpush1.bf16.msra.mxu0 %v3892_v35  ;;  %1431 = vmatpush1.bf16.msra.mxu1 %v3893_v26 }
 0x28d   :  { %1391 = vmatprep.subr.bf16.mxu0 %v3894_v34  ;;  %1432 = vmatprep.subr.bf16.mxu1 %v3895_v45 }
 0x290   :  { %1392 = vmatpush1.bf16.msra.mxu0 %v3896_v0  ;;  %1433 = vmatpush1.bf16.msra.mxu1 %v3897_v33 }
 0x291   :  { %1484 = vmatprep.subr.bf16.mxu0 %v4089_v8  ;;  %1525 = vmatprep.subr.bf16.mxu1 %v4093_v10  ;;  %v5503_v8 = vld [vmem:[#allocation39_spill] sm:$0xff]  ;;  %v5505_v10 = vld [vmem:[#allocation41_spill] sm:$0xff] }
 0x293   :  { %1410 = vmatmul.mubr.bf16.vlgmr.msra.gmra.mxu0 %v4438_v16  ;;  %1451 = vmatmul.mubr.bf16.vlgmr.msra.gmra.mxu1 %v4438_v16 }
 0x294   :  { %1485 = vmatpush1.bf16.msra.mxu0 %v4087_v7  ;;  %1526 = vmatpush1.bf16.msra.mxu1 %v4091_v9  ;;  %v5502_v7 = vld [vmem:[#allocation38_spill] sm:$0xff]  ;;  %v5504_v9 = vld [vmem:[#allocation40_spill] sm:$0xff] }
 0x295   :  { %1486 = vmatprep.subr.bf16.mxu0 %v4095_v11  ;;  %1527 = vmatprep.subr.bf16.mxu1 %v4098_v12  ;;  %v5506_v11 = vld [vmem:[#allocation42_spill] sm:$0xff]  ;;  %v5507_v12 = vld [vmem:[#allocation43_spill] sm:$0xff] }
 0x298   :  { %1487 = vmatpush1.bf16.msra.mxu0 %v4102_v13  ;;  %1528 = vmatpush1.bf16.msra.mxu1 %v5434_v38  ;;  %v5508_v13 = vld [vmem:[#allocation44_spill] sm:$0xff]  ;;  %v5509_v38 = vld [vmem:[#allocation45_spill] sm:$0xff] }
 0x299   :  { %1488 = vmatprep.subr.bf16.mxu0 %v5435_v39  ;;  %1529 = vmatprep.subr.bf16.mxu1 %v5436_v40  ;;  %v5510_v39 = vld [vmem:[#allocation46_spill] sm:$0xff]  ;;  %v5511_v40 = vld [vmem:[#allocation47_spill] sm:$0xff] }
 0x29c   :  { %1489 = vmatpush1.bf16.msra.mxu0 %v5437_v41  ;;  %1530 = vmatpush1.bf16.msra.mxu1 %v5438_v42  ;;  %v5512_v41 = vld [vmem:[#allocation48_spill] sm:$0xff]  ;;  %v5513_v42 = vld [vmem:[#allocation50_spill] sm:$0xff] }
 0x29d   :  { %1490 = vmatprep.subr.bf16.mxu0 %v5439_v43  ;;  %1531 = vmatprep.subr.bf16.mxu1 %v5440_v44  ;;  %v5514_v43 = vld [vmem:[#allocation52_spill] sm:$0xff]  ;;  %v5515_v44 = vld [vmem:[#allocation49_spill] sm:$0xff] }
 0x2a0   :  { %1491 = vmatpush1.bf16.msra.mxu0 %v5441_v46  ;;  %1532 = vmatpush1.bf16.msra.mxu1 %v5442_v47  ;;  %v5516_v46 = vld [vmem:[#allocation51_spill] sm:$0xff]  ;;  %v5517_v47 = vld [vmem:[#allocation53_spill] sm:$0xff] }
 0x2a1   :  { %1492 = vmatprep.subr.bf16.mxu0 %v5443_v49  ;;  %1533 = vmatprep.subr.bf16.mxu1 %v5444_v50  ;;  %v5518_v49 = vld [vmem:[#allocation54_spill] sm:$0xff]  ;;  %v5519_v50 = vld [vmem:[#allocation55_spill] sm:$0xff] }
 0x2a4   :  { %1493 = vmatpush1.bf16.msra.mxu0 %v5445_v51  ;;  %1534 = vmatpush1.bf16.msra.mxu1 %v5446_v52  ;;  %v5520_v51 = vld [vmem:[#allocation56_spill] sm:$0xff]  ;;  %v5521_v52 = vld [vmem:[#allocation57_spill] sm:$0xff] }
 0x2a5   :  { %1494 = vmatprep.subr.bf16.mxu0 %v5447_v53  ;;  %1535 = vmatprep.subr.bf16.mxu1 %v5448_v54  ;;  %v5522_v53 = vld [vmem:[#allocation58_spill] sm:$0xff]  ;;  %v5523_v54 = vld [vmem:[#allocation59_spill] sm:$0xff] }
 0x2a8   :  { %1495 = vmatpush1.bf16.msra.mxu0 %v5449_v55  ;;  %1536 = vmatpush1.bf16.msra.mxu1 %v5450_v56  ;;  %v5524_v55 = vld [vmem:[#allocation60_spill] sm:$0xff]  ;;  %v5525_v56 = vld [vmem:[#allocation61_spill] sm:$0xff] }
 0x2a9   :  { %1496 = vmatprep.subr.bf16.mxu0 %v5451_v57  ;;  %1537 = vmatprep.subr.bf16.mxu1 %v5452_v58  ;;  %v5526_v57 = vld [vmem:[#allocation62_spill] sm:$0xff]  ;;  %v5527_v58 = vld [vmem:[#allocation63_spill] sm:$0xff] }
 0x2ac   :  { %1497 = vmatpush1.bf16.msra.mxu0 %v5453_v59  ;;  %1538 = vmatpush1.bf16.msra.mxu1 %v5454_v60  ;;  %v5528_v59 = vld [vmem:[#allocation64_spill] sm:$0xff] }
 0x2ad   :  { %1498 = vmatprep.subr.bf16.mxu0 %v5455_v61  ;;  %1539 = vmatprep.subr.bf16.mxu1 %v5456_v62  ;;  %v3556_v60 = vld [vmem:[#allocation2 + $0x4e4] ss:$16 sps:$4 sm:$0xff]  }
 0x2b0   :  { %1499 = vmatpush1.bf16.msra.mxu0 %v5457_v63  ;;  %1540 = vmatpush1.bf16.msra.mxu1 %v5458_v1  ;;  %v5529_v63 = vld [vmem:[#allocation8_spill] sm:$0xff] }
 0x2b1   :  { %1500 = vmatprep.subr.bf16.mxu0 %v5459_v2  ;;  %1541 = vmatprep.subr.bf16.mxu1 %v5460_v3 }
 0x2b4   :  { %1501 = vmatpush2.bf16.msra.mxu0 %v5461_v4  ;;  %1542 = vmatpush2.bf16.msra.mxu1 %v5462_v5 }
 0x2b5   :  { %1502 = vmatprep.subr.bf16.mxu0 %v5463_v6  ;;  %1543 = vmatprep.subr.bf16.mxu1 %v5502_v7 }
 0x2b8   :  { %1503 = vmatpush2.bf16.msra.mxu0 %v5503_v8  ;;  %1544 = vmatpush2.bf16.msra.mxu1 %v5504_v9 }
 0x2b9   :  { %1504 = vmatprep.subr.bf16.mxu0 %v5505_v10  ;;  %1545 = vmatprep.subr.bf16.mxu1 %v5506_v11  ;;  %v5533_v10 = vld [vmem:[#allocation75_spill] sm:$0xff] }
 0x2bc   :  { %1505 = vmatpush2.bf16.msra.mxu0 %v5507_v12  ;;  %1546 = vmatpush2.bf16.msra.mxu1 %v5508_v13 }
 0x2bd   :  { %1506 = vmatprep.subr.bf16.mxu0 %v5509_v38  ;;  %1547 = vmatprep.subr.bf16.mxu1 %v5510_v39 }
 0x2c0   :  { %1507 = vmatpush2.bf16.msra.mxu0 %v5511_v40  ;;  %1548 = vmatpush2.bf16.msra.mxu1 %v5512_v41 }
 0x2c1   :  { %1508 = vmatprep.subr.bf16.mxu0 %v5513_v42  ;;  %1549 = vmatprep.subr.bf16.mxu1 %v5514_v43 }
 0x2c4   :  { %1509 = vmatpush2.bf16.msra.mxu0 %v5515_v44  ;;  %1550 = vmatpush2.bf16.msra.mxu1 %v5516_v46 }
 0x2c5   :  { %1510 = vmatprep.subr.bf16.mxu0 %v5517_v47  ;;  %1551 = vmatprep.subr.bf16.mxu1 %v5518_v49 }
 0x2c8   :  { %1511 = vmatpush2.bf16.msra.mxu0 %v5519_v50  ;;  %1552 = vmatpush2.bf16.msra.mxu1 %v5520_v51  ;;  %v5534_v50 = vld [vmem:[#allocation76_spill] sm:$0xff] }
 0x2c9   :  { %1512 = vmatprep.subr.bf16.mxu0 %v5521_v52  ;;  %1553 = vmatprep.subr.bf16.mxu1 %v5522_v53  ;;  %v5535_v53 = vld [vmem:[#allocation74_spill] sm:$0xff] }
 0x2cc   :  { %1513 = vmatpush2.bf16.msra.mxu0 %v5523_v54  ;;  %1554 = vmatpush2.bf16.msra.mxu1 %v5524_v55 }
 0x2cd   :  { %1514 = vmatprep.subr.bf16.mxu0 %v5525_v56  ;;  %1555 = vmatprep.subr.bf16.mxu1 %v5526_v57 }
 0x2d0   :  { %1515 = vmatpush2.bf16.msra.mxu0 %v5527_v58  ;;  %1556 = vmatpush2.bf16.msra.mxu1 %v5528_v59 }
 0x2d1   :  { %1791 = vmatprep.subr.bf16.mxu0 %v3556_v60 }
 0x333   :  { %v1310_v61 = vpop.f32.mrf.mxu0  ;;  %v1351_v62 = vpop.f32.mrf.mxu1 }
 0x334   :  { %v1311_v1 = vadd.f32 %v1310_v61, %v5529_v63  ;;  %v1352_v26 = vadd.f32 %v1351_v62, %v4421_v21  ;;  %v3554_v62 = vld [vmem:[#allocation2 + $0x4e0] ss:$16 sps:$4 sm:$0xff]  }
 0x335   :  { %v1312_v2 = vpop.f32.mrf.mxu0  ;;  %v1353_v3 = vpop.f32.mrf.mxu1 }
 0x336   :  { %v3210_v4 = vmul.f32 -1.442695, %v1311_v1  ;;  %v1313_v14 = vadd.f32 %v1312_v2, %v5530_v48  ;;  %v1354_v29 = vadd.f32 %v1353_v3, %v5531_v28  ;;  %v3559_v2 = vld [vmem:[#allocation2 + $0x4c4] ss:$16 sps:$4 sm:$0xff]   ;;  %v3557_v3 = vld [vmem:[#allocation2 + $0x4c0] ss:$16 sps:$4 sm:$0xff]  }
 0x337   :  { %v1314_v5 = vpop.f32.mrf.mxu0  ;;  %v1355_v6 = vpop.f32.mrf.mxu1 }
 0x338   :  { %3776 = vpow2.f32 %v3210_v4  ;;  %v3211_v31 = vmul.f32 -1.442695, %v1313_v14  ;;  %v3562_v4 = vld [vmem:[#allocation2 + $0x4a4] ss:$16 sps:$4 sm:$0xff]   ;;  %v3560_v5 = vld [vmem:[#allocation2 + $0x4a0] ss:$16 sps:$4 sm:$0xff]  }
 0x339   :  { %v1315_v16 = vpop.f32.mrf.mxu0  ;;  %v1356_v36 = vpop.f32.mrf.mxu1  ;;  %v3563_v6 = vld [vmem:[#allocation2 + $0x480] ss:$16 sps:$4 sm:$0xff]   ;;  %v3571_v14 = vld [vmem:[#allocation2 + $0x444] ss:$16 sps:$4 sm:$0xff]  }
 0x33a   :  { %3778 = vpow2.f32 %v3211_v31  ;;  %v3568_v16 = vld [vmem:[#allocation2 + $0x464] ss:$16 sps:$4 sm:$0xff]   ;;  %v3566_v36 = vld [vmem:[#allocation2 + $0x460] ss:$16 sps:$4 sm:$0xff]  }
 0x33b   :  { %v3569_v31 = vld [vmem:[#allocation2 + $0x440] ss:$16 sps:$4 sm:$0xff]  }
 0x345   :  { %v3777_v30 = vpop.eup %3776 }
 0x346   :  { %v1361_v22 = vadd.f32 1.0, %v3777_v30  ;;  %v3574_v30 = vld [vmem:[#allocation2 + $0x424] ss:$16 sps:$4 sm:$0xff]  }
 0x347   :  { %v3779_v24 = vpop.eup %3778 }
 0x348   :  { %3780 = vrcp.f32 %v1361_v22  ;;  %v1367_v18 = vadd.f32 1.0, %v3779_v24  ;;  %v3572_v22 = vld [vmem:[#allocation2 + $0x420] ss:$16 sps:$4 sm:$0xff]   ;;  %v3577_v24 = vld [vmem:[#allocation2 + $0x404] ss:$16 sps:$4 sm:$0xff]  }
 0x34a   :  { %3782 = vrcp.f32 %v1367_v18  ;;  %v3575_v18 = vld [vmem:[#allocation2 + $0x400] ss:$16 sps:$4 sm:$0xff]  }
 0x353   :  { %v1411_v25 = vpop.f32.mrf.mxu0  ;;  %v1452_v27 = vpop.f32.mrf.mxu1 }
 0x354   :  { %v1459_v20 = vadd.f32 %v1411_v25, %v5532_v37  ;;  %v1461_v54 = vadd.f32 %v1452_v27, %v5535_v53  ;;  %v3580_v25 = vld [vmem:[#allocation2 + $0x5e4] ss:$16 sps:$4 sm:$0xff]   ;;  %v3578_v27 = vld [vmem:[#allocation2 + $0x5e0] ss:$16 sps:$4 sm:$0xff]  }
 0x355   :  { %v3781_v32 = vpop.eup %3780  ;;  %v1413_v17 = vpop.f32.mrf.mxu0  ;;  %v3581_v37 = vld [vmem:[#allocation2 + $0x5c0] ss:$16 sps:$4 sm:$0xff]  }
 0x356   :  { %v1454_v35 = vpop.f32.mrf.mxu1  ;;  %v1370_v34 = vmul.f32 %v3781_v32, %v1354_v29  ;;  %v3212_v45 = vmul.f32 -1.442695, %v1459_v20  ;;  %v1460_v11 = vadd.f32 %v1413_v17, %v5533_v10  ;;  %v3583_v29 = vld [vmem:[#allocation2 + $0x5c4] ss:$16 sps:$4 sm:$0xff]   ;;  %v3584_v32 = vld [vmem:[#allocation2 + $0x5a0] ss:$16 sps:$4 sm:$0xff]  }
 0x357   :  { %v1415_v0 = vpop.f32.mrf.mxu0  ;;  %v3783_v13 = vpop.eup %3782  ;;  %v1462_v51 = vadd.f32 %v1454_v35, %v5534_v50  ;;  %v3586_v20 = vld [vmem:[#allocation2 + $0x5a4] ss:$16 sps:$4 sm:$0xff]   ;;  %v3587_v17 = vld [vmem:[#allocation2 + $0x580] ss:$16 sps:$4 sm:$0xff]  }
 0x358   :  { %v1456_v33 = vpop.f32.mrf.mxu1  ;;  %v1371_v7 = vadd.f32 %v1370_v34, %v1352_v26  ;;  %3784 = vpow2.f32 %v3212_v45  ;;  %v3213_v12 = vmul.f32 -1.442695, %v1460_v11  ;;  %v1373_v40 = vsub.f32 1.0, %v3783_v13  ;;  %v3589_v35 = vld [vmem:[#allocation2 + $0x584] ss:$16 sps:$4 sm:$0xff]  }
 0x359   :  { %v1416_v8 = vpop.f32.mrf.mxu0  ;;  %v1375_v43 = vmul.f32 %v3783_v13, %v4427_v23  ;;  %v3592_v26 = vld [vmem:[#allocation2 + $0x564] ss:$16 sps:$4 sm:$0xff]   ;;  %v3590_v34 = vld [vmem:[#allocation2 + $0x560] ss:$16 sps:$4 sm:$0xff]  }
 0x35a   :  { %v1457_v9 = vpop.f32.mrf.mxu1  ;;  %3786 = vtanh.f32 %v1371_v7  ;;  %v3595_v45 = vld [vmem:[#allocation2 + $0x544] ss:$16 sps:$4 sm:$0xff]   ;;  %v3593_v0 = vld [vmem:[#allocation2 + $0x540] ss:$16 sps:$4 sm:$0xff]  }
 0x35b   :  { %3788 = vpow2.f32 %v3213_v12  ;;  %v3598_v33 = vld [vmem:[#allocation2 + $0x524] ss:$16 sps:$4 sm:$0xff]   ;;  %v3596_v7 = vld [vmem:[#allocation2 + $0x520] ss:$16 sps:$4 sm:$0xff]  }
 0x35c   :  { %v3601_v8 = vld [vmem:[#allocation2 + $0x504] ss:$16 sps:$4 sm:$0xff]   ;;  %v3599_v9 = vld [vmem:[#allocation2 + $0x500] ss:$16 sps:$4 sm:$0xff]  }
 0x35d   :  { %v4529_v10 = vld [vmem:[#allocation2 + $0x6e0] ss:$16 sps:$4 sm:$0xff]   ;;  %v4531_v11 = vld [vmem:[#allocation2 + $0x6e4] ss:$16 sps:$4 sm:$0xff]  }
 0x35e   :  { %5536 = vst [vmem:[#allocation11_spill] sm:$0xff] %v4531_v11  ;;  %v4533_v12 = vld [vmem:[#allocation2 + $0x6c4] ss:$16 sps:$4 sm:$0xff]   ;;  %2071 = vmatprep.subr.bf16.mxu1 %v4531_v11  ;;  %v4537_v13 = vld [vmem:[#allocation2 + $0x6c0] ss:$16 sps:$4 sm:$0xff]  }
 0x35f   :  { %v4567_v50 = vld [vmem:[#allocation2 + $0x620] ss:$16 sps:$4 sm:$0xff]  }
 0x365   :  { %v3785_v38 = vpop.eup %3784 }
 0x366   :  { %v1466_v39 = vadd.f32 1.0, %v3785_v38  ;;  %v4540_v38 = vld [vmem:[#allocation2 + $0x6a4] ss:$16 sps:$4 sm:$0xff]  }
 0x367   :  { %v3787_v41 = vpop.eup %3786 }
 0x368   :  { %3790 = vrcp.f32 %v1466_v39  ;;  %v1374_v42 = vmul.f32 %v3787_v41, %v1373_v40  ;;  %v3789_v47 = vpop.eup %3788  ;;  %v4543_v39 = vld [vmem:[#allocation2 + $0x6a0] ss:$16 sps:$4 sm:$0xff]   ;;  %v4546_v40 = vld [vmem:[#allocation2 + $0x684] ss:$16 sps:$4 sm:$0xff]  }
 0x369   :  { %v1472_v49 = vadd.f32 1.0, %v3789_v47  ;;  %v4549_v41 = vld [vmem:[#allocation2 + $0x680] ss:$16 sps:$4 sm:$0xff]  }
 0x36a   :  { %v4517_v44 = vadd.f32 %v1375_v43, %v1374_v42  ;;  %v4552_v42 = vld [vmem:[#allocation2 + $0x664] ss:$16 sps:$4 sm:$0xff]   ;;  %v4555_v43 = vld [vmem:[#allocation2 + $0x660] ss:$16 sps:$4 sm:$0xff]  }
 0x36b   :  { %3792 = vrcp.f32 %v1472_v49  ;;  %v4561_v47 = vld [vmem:[#allocation2 + $0x640] ss:$16 sps:$4 sm:$0xff]   ;;  %v4564_v49 = vld [vmem:[#allocation2 + $0x624] ss:$16 sps:$4 sm:$0xff]  }
 0x36c   :  { %v1483_v46 = vpack.c.bf16 %v4517_v44, %v4517_v44 }
 0x36e   :  { %1516 = vmatprep.mubr.bf16.mxu0 %v1483_v46  ;;  %1557 = vmatprep.mubr.bf16.mxu1 %v1483_v46  ;;  %v4558_v46 = vld [vmem:[#allocation2 + $0x644] ss:$16 sps:$4 sm:$0xff]  }
 0x375   :  { %v3791_v52 = vpop.eup %3790 }
 0x376   :  { %v1475_v55 = vmul.f32 %v3791_v52, %v1462_v51 }
 0x378   :  { %v1476_v56 = vadd.f32 %v1475_v55, %v1461_v54  ;;  %v3793_v57 = vpop.eup %3792 }
 0x379   :  { %v1478_v23 = vsub.f32 1.0, %v3793_v57  ;;  %v1480_v60 = vmul.f32 %v3793_v57, %v4434_v19  ;;  %v3565_v19 = vld [vmem:[#allocation2 + $0x484] ss:$16 sps:$4 sm:$0xff]  }
 0x37a   :  { %3794 = vtanh.f32 %v1476_v56 }
 0x387   :  { %v3795_v58 = vpop.eup %3794 }
 0x388   :  { %v1479_v59 = vmul.f32 %v3795_v58, %v1478_v23 }
 0x38a   :  { %v1481_v61 = vadd.f32 %v1480_v60, %v1479_v59 }
 0x38c   :  { %v4524_v1 = vpack.c.bf16 %v1481_v61, %v1481_v61 }
 0x38e   :  { %1517 = vmatmul.mubr.bf16.vlgmr.msra.gmra.mxu0 %v4524_v1  ;;  %1558 = vmatmul.mubr.bf16.vlgmr.msra.gmra.mxu1 %v4524_v1 }
 0x38f   :  { %1792 = vmatpush1.bf16.msra.mxu0 %v3554_v62  ;;  %2103 = vmatprep.mubr.bf16.mxu1 %v5433_v15 }
 0x390   :  { %1793 = vmatprep.subr.bf16.mxu0 %v3559_v2  ;;  %2072 = vmatpush1.bf16.msra.mxu1 %v4529_v10 }
 0x391   :  { %2073 = vmatprep.subr.bf16.mxu1 %v4533_v12 }
 0x393   :  { %1794 = vmatpush1.bf16.msra.mxu0 %v3557_v3 }
 0x394   :  { %1795 = vmatprep.subr.bf16.mxu0 %v3562_v4  ;;  %2074 = vmatpush1.bf16.msra.mxu1 %v4537_v13 }
 0x395   :  { %2075 = vmatprep.subr.bf16.mxu1 %v4540_v38 }
 0x397   :  { %1796 = vmatpush1.bf16.msra.mxu0 %v3560_v5 }
 0x398   :  { %1797 = vmatprep.subr.bf16.mxu0 %v3565_v19  ;;  %2076 = vmatpush1.bf16.msra.mxu1 %v4543_v39 }
 0x399   :  { %2077 = vmatprep.subr.bf16.mxu1 %v4546_v40 }
 0x39b   :  { %1798 = vmatpush1.bf16.msra.mxu0 %v3563_v6 }
 0x39c   :  { %1799 = vmatprep.subr.bf16.mxu0 %v3568_v16  ;;  %2078 = vmatpush1.bf16.msra.mxu1 %v4549_v41 }
 0x39d   :  { %2079 = vmatprep.subr.bf16.mxu1 %v4552_v42 }
 0x39f   :  { %1800 = vmatpush1.bf16.msra.mxu0 %v3566_v36 }
 0x3a0   :  { %1801 = vmatprep.subr.bf16.mxu0 %v3571_v14  ;;  %2080 = vmatpush1.bf16.msra.mxu1 %v4555_v43 }
 0x3a1   :  { %2081 = vmatprep.subr.bf16.mxu1 %v4558_v46 }
 0x3a3   :  { %1802 = vmatpush1.bf16.msra.mxu0 %v3569_v31 }
 0x3a4   :  { %1803 = vmatprep.subr.bf16.mxu0 %v3574_v30  ;;  %2082 = vmatpush1.bf16.msra.mxu1 %v4561_v47 }
 0x3a5   :  { %2083 = vmatprep.subr.bf16.mxu1 %v4564_v49 }
 0x3a7   :  { %1804 = vmatpush1.bf16.msra.mxu0 %v3572_v22 }
 0x3a8   :  { %1805 = vmatprep.subr.bf16.mxu0 %v3577_v24  ;;  %2084 = vmatpush1.bf16.msra.mxu1 %v4567_v50 }
 0x3ab   :  { %1806 = vmatpush1.bf16.msra.mxu0 %v3575_v18  ;;  %v4577_v18 = vld [vmem:[#allocation2 + $0x604] ss:$16 sps:$4 sm:$0xff]  }
 0x3ac   :  { %1807 = vmatprep.subr.bf16.mxu0 %v3580_v25  ;;  %2085 = vmatprep.subr.bf16.mxu1 %v4577_v18  ;;  %v4586_v25 = vld [vmem:[#allocation2 + $0x7e0] ss:$16 sps:$4 sm:$0xff]  }
 0x3af   :  { %1808 = vmatpush2.bf16.msra.mxu0 %v3578_v27  ;;  %v4590_v27 = vld [vmem:[#allocation2 + $0x7c4] ss:$16 sps:$4 sm:$0xff]  }
 0x3b0   :  { %1809 = vmatprep.subr.bf16.mxu0 %v3583_v29  ;;  %v1619_v29 = vld [vmem:[#allocation4 + $0x2] ss:$8 sm:$0x3] }
 0x3b3   :  { %1810 = vmatpush2.bf16.msra.mxu0 %v3581_v37  ;;  %v5539_v37 = vld [vmem:[#allocation66_spill] sm:$0xff] }
 0x3b4   :  { %1811 = vmatprep.subr.bf16.mxu0 %v3586_v20  ;;  %v1624_v20 = vrot.slane %v1619_v29, %v5539_v37 }
 0x3b7   :  { %1812 = vmatpush2.bf16.msra.mxu0 %v3584_v32  ;;  %v5540_v32 = vld [vmem:[#allocation68_spill] sm:$0xff] }
 0x3b8   :  { %1813 = vmatprep.subr.bf16.mxu0 %v3589_v35 }
 0x3bb   :  { %1814 = vmatpush2.bf16.msra.mxu0 %v3587_v17  ;;  %v1628_v17 = vrot.slane %v1619_v29, %v5540_v32  ;;  %v4694_v29 = vld [vmem:[#allocation2 + $0x760] ss:$16 sps:$4 sm:$0xff]  }
 0x3bc   :  { %1815 = vmatprep.subr.bf16.mxu0 %v3592_v26  ;;  %5554 = vst [vmem:[#allocation27_spill] sm:$0xff] %v4694_v29 }
 0x3bf   :  { %1816 = vmatpush2.bf16.msra.mxu0 %v3590_v34 }
 0x3c0   :  { %1817 = vmatprep.subr.bf16.mxu0 %v3595_v45  ;;  %v4602_v45 = vld [vmem:[#allocation2 + $0x6e8] ss:$16 sps:$4 sm:$0xff]  }
 0x3c3   :  { %1818 = vmatpush2.bf16.msra.mxu0 %v3593_v0 }
 0x3c4   :  { %1819 = vmatprep.subr.bf16.mxu0 %v3598_v33 }
 0x3c7   :  { %1820 = vmatpush2.bf16.msra.mxu0 %v3596_v7  ;;  %v4608_v7 = vld [vmem:[#allocation2 + $0x6cc] ss:$16 sps:$4 sm:$0xff]  }
 0x3c8   :  { %1821 = vmatprep.subr.bf16.mxu0 %v3601_v8 }
 0x3cb   :  { %1822 = vmatpush2.bf16.msra.mxu0 %v3599_v9 }
 0x44e   :  { %v1518_v51 = vpop.f32.mrf.mxu0  ;;  %v1559_v52 = vpop.f32.mrf.mxu1 }
 0x44f   :  { %v1519_v53 = vadd.f32 %v1518_v51, %v5529_v63  ;;  %v1560_v19 = vadd.f32 %v1559_v52, %v4421_v21  ;;  %v4583_v21 = vld [vmem:[#allocation2 + $0x6ec] ss:$16 sps:$4 sm:$0xff]   ;;  %v4613_v52 = vld [vmem:[#allocation2 + $0x6c8] ss:$16 sps:$4 sm:$0xff]  }
 0x450   :  { %v1520_v54 = vpop.f32.mrf.mxu0  ;;  %v1561_v55 = vpop.f32.mrf.mxu1  ;;  %5537 = vst [vmem:[#allocation12_spill] sm:$0xff] %v4583_v21 }
 0x451   :  { %v3214_v56 = vmul.f32 -1.442695, %v1519_v53  ;;  %v1521_v60 = vadd.f32 %v1520_v54, %v5530_v48  ;;  %v1562_v5 = vadd.f32 %v1561_v55, %v5531_v28  ;;  %v4579_v28 = vld [vmem:[#allocation2 + $0x600] ss:$16 sps:$4 sm:$0xff]   ;;  %v4617_v53 = vld [vmem:[#allocation2 + $0x6ac] ss:$16 sps:$4 sm:$0xff]  }
 0x452   :  { %v1522_v57 = vpop.f32.mrf.mxu0  ;;  %v1563_v23 = vpop.f32.mrf.mxu1  ;;  %2086 = vmatpush1.bf16.msra.mxu1 %v4579_v28  ;;  %v4620_v54 = vld [vmem:[#allocation2 + $0x6a8] ss:$16 sps:$4 sm:$0xff]   ;;  %v4623_v55 = vld [vmem:[#allocation2 + $0x68c] ss:$16 sps:$4 sm:$0xff]  }
 0x453   :  { %3796 = vpow2.f32 %v3214_v56  ;;  %v3215_v61 = vmul.f32 -1.442695, %v1521_v60  ;;  %2112 = vmatprep.subr.bf16.mxu1 %v4583_v21  ;;  %v4626_v56 = vld [vmem:[#allocation2 + $0x688] ss:$16 sps:$4 sm:$0xff]   ;;  %v4629_v57 = vld [vmem:[#allocation2 + $0x66c] ss:$16 sps:$4 sm:$0xff]  }
 0x454   :  { %v1523_v58 = vpop.f32.mrf.mxu0  ;;  %v1564_v59 = vpop.f32.mrf.mxu1  ;;  %v4632_v23 = vld [vmem:[#allocation2 + $0x668] ss:$16 sps:$4 sm:$0xff]   ;;  %v4641_v60 = vld [vmem:[#allocation2 + $0x62c] ss:$16 sps:$4 sm:$0xff]  }
 0x455   :  { %3798 = vpow2.f32 %v3215_v61  ;;  %v4635_v58 = vld [vmem:[#allocation2 + $0x64c] ss:$16 sps:$4 sm:$0xff]   ;;  %v4638_v59 = vld [vmem:[#allocation2 + $0x648] ss:$16 sps:$4 sm:$0xff]  }
 0x456   :  { %v4644_v61 = vld [vmem:[#allocation2 + $0x628] ss:$16 sps:$4 sm:$0xff]  }
 0x460   :  { %v3797_v62 = vpop.eup %3796 }
 0x461   :  { %v1569_v2 = vadd.f32 1.0, %v3797_v62  ;;  %v4647_v62 = vld [vmem:[#allocation2 + $0x60c] ss:$16 sps:$4 sm:$0xff]  }
 0x462   :  { %v3799_v3 = vpop.eup %3798 }
 0x463   :  { %3800 = vrcp.f32 %v1569_v2  ;;  %v1575_v4 = vadd.f32 1.0, %v3799_v3  ;;  %v4650_v2 = vld [vmem:[#allocation2 + $0x608] ss:$16 sps:$4 sm:$0xff]   ;;  %v4653_v3 = vld [vmem:[#allocation2 + $0x7ec] ss:$16 sps:$4 sm:$0xff]  }
 0x465   :  { %3802 = vrcp.f32 %v1575_v4  ;;  %v4656_v4 = vld [vmem:[#allocation2 + $0x7e8] ss:$16 sps:$4 sm:$0xff]  }
 0x470   :  { %v3801_v63 = vpop.eup %3800 }
 0x471   :  { %v1578_v6 = vmul.f32 %v3801_v63, %v1562_v5  ;;  %v4659_v5 = vld [vmem:[#allocation2 + $0x7cc] ss:$16 sps:$4 sm:$0xff]   ;;  %v4662_v63 = vld [vmem:[#allocation2 + $0x7c8] ss:$16 sps:$4 sm:$0xff]  }
 0x472   :  { %v3803_v36 = vpop.eup %3802  ;;  %5542 = vst [vmem:[#allocation15_spill] sm:$0xff] %v4659_v5  ;;  %5543 = vst [vmem:[#allocation16_spill] sm:$0xff] %v4662_v63 }
 0x473   :  { %v1579_v16 = vadd.f32 %v1578_v6, %v1560_v19  ;;  %v1581_v14 = vsub.f32 1.0, %v3803_v36  ;;  %v1583_v30 = vmul.f32 %v3803_v36, %v4517_v44  ;;  %v4588_v44 = vld [vmem:[#allocation2 + $0x7e4] ss:$16 sps:$4 sm:$0xff]   ;;  %v4668_v6 = vld [vmem:[#allocation2 + $0x7ac] ss:$16 sps:$4 sm:$0xff]  }
 0x474   :  { %2558 = vmatprep.subr.bf16.mxu0 %v4588_v44  ;;  %v4666_v19 = vld [vmem:[#allocation2 + $0x7a4] ss:$16 sps:$4 sm:$0xff]   ;;  %5545 = vst [vmem:[#allocation18_spill] sm:$0xff] %v4668_v6  ;;  %v4672_v36 = vld [vmem:[#allocation2 + $0x7a8] ss:$16 sps:$4 sm:$0xff]  }
 0x475   :  { %3804 = vtanh.f32 %v1579_v16  ;;  %5544 = vst [vmem:[#allocation17_spill] sm:$0xff] %v4666_v19  ;;  %v4670_v16 = vld [vmem:[#allocation2 + $0x7a0] ss:$16 sps:$4 sm:$0xff]   ;;  %5547 = vst [vmem:[#allocation20_spill] sm:$0xff] %v4672_v36 }
 0x476   :  { %5546 = vst [vmem:[#allocation19_spill] sm:$0xff] %v4670_v16 }
 0x482   :  { %v3805_v31 = vpop.eup %3804 }
 0x483   :  { %v1582_v48 = vmul.f32 %v3805_v31, %v1581_v14  ;;  %v4678_v14 = vld [vmem:[#allocation2 + $0x784] ss:$16 sps:$4 sm:$0xff]   ;;  %v4680_v31 = vld [vmem:[#allocation2 + $0x78c] ss:$16 sps:$4 sm:$0xff]  }
 0x484   :  { %5548 = vst [vmem:[#allocation21_spill] sm:$0xff] %v4678_v14  ;;  %5549 = vst [vmem:[#allocation22_spill] sm:$0xff] %v4680_v31 }
 0x485   :  { %v1584_v22 = vadd.f32 %v1583_v30, %v1582_v48  ;;  %v4682_v48 = vld [vmem:[#allocation2 + $0x780] ss:$16 sps:$4 sm:$0xff]   ;;  %v4684_v30 = vld [vmem:[#allocation2 + $0x788] ss:$16 sps:$4 sm:$0xff]  }
 0x486   :  { %5550 = vst [vmem:[#allocation23_spill] sm:$0xff] %v4682_v48  ;;  %5551 = vst [vmem:[#allocation24_spill] sm:$0xff] %v4684_v30 }
 0x487   :  { %v1585_v24 = vpack.c.bf16 %v1584_v22, %v1584_v22  ;;  %v4690_v22 = vld [vmem:[#allocation2 + $0x764] ss:$16 sps:$4 sm:$0xff]  }
 0x488   :  { %5552 = vst [vmem:[#allocation25_spill] sm:$0xff] %v4690_v22 }
 0x489   :  { %1823 = vmatprep.mubr.bf16.mxu0 %v1585_v24  ;;  %v4692_v24 = vld [vmem:[#allocation2 + $0x76c] ss:$16 sps:$4 sm:$0xff]  }
 0x48a   :  { %1824 = vmatmul.mubr.bf16.vlgmr.msra.gmra.mxu0 %v4524_v1  ;;  %v4594_v1 = vld [vmem:[#allocation2 + $0x7c0] ss:$16 sps:$4 sm:$0xff]   ;;  %5553 = vst [vmem:[#allocation26_spill] sm:$0xff] %v4692_v24 }
 0x48b   :  { %2559 = vmatpush1.bf16.msra.mxu0 %v4586_v25  ;;  %5538 = vst [vmem:[#allocation13_spill] sm:$0xff] %v4594_v1 }
 0x48c   :  { %2560 = vmatprep.subr.bf16.mxu0 %v4590_v27 }
 0x48f   :  { %2561 = vmatpush1.bf16.msra.mxu0 %v4594_v1 }
 0x490   :  { %2562 = vmatprep.subr.bf16.mxu0 %v4666_v19 }
 0x493   :  { %2563 = vmatpush1.bf16.msra.mxu0 %v4670_v16 }
 0x494   :  { %2564 = vmatprep.subr.bf16.mxu0 %v4678_v14 }
 0x497   :  { %2565 = vmatpush1.bf16.msra.mxu0 %v4682_v48 }
 0x498   :  { %2566 = vmatprep.subr.bf16.mxu0 %v4690_v22  ;;  %v5602_v22 = vld [vmem:[#allocation67_spill] sm:$0xff] }
 0x49b   :  { %2567 = vmatpush1.bf16.msra.mxu0 %v4694_v29  ;;  %v4797_v29 = vld [vmem:[#allocation2 + $0x84c] ss:$16 sps:$4 sm:$0xff]  }
 0x49c   :  { %5589 = vst [vmem:[#allocation58_spill] sm:$0xff] %v4797_v29 }
 0x54a   :  { %v1825_v35 = vpop.f32.mrf.mxu0 }
 0x54b   :  { %v4600_v26 = vadd.f32 %v1825_v35, %v1624_v20  ;;  %v4696_v20 = vld [vmem:[#allocation2 + $0x768] ss:$16 sps:$4 sm:$0xff]   ;;  %v4704_v35 = vld [vmem:[#allocation2 + $0x74c] ss:$16 sps:$4 sm:$0xff]  }
 0x54c   :  { %v1827_v34 = vpop.f32.mrf.mxu0  ;;  %5555 = vst [vmem:[#allocation28_spill] sm:$0xff] %v4696_v20  ;;  %5557 = vst [vmem:[#allocation30_spill] sm:$0xff] %v4704_v35 }
 0x54d   :  { %v1878_v0 = vpack.c.bf16 %v4600_v26, %v4600_v26  ;;  %v4606_v33 = vadd.f32 %v1827_v34, %v1628_v17  ;;  %v4702_v17 = vld [vmem:[#allocation2 + $0x744] ss:$16 sps:$4 sm:$0xff]   ;;  %v4706_v34 = vld [vmem:[#allocation2 + $0x740] ss:$16 sps:$4 sm:$0xff]  }
 0x54e   :  { %v1829_v8 = vpop.f32.mrf.mxu0  ;;  %5556 = vst [vmem:[#allocation29_spill] sm:$0xff] %v4702_v17  ;;  %5558 = vst [vmem:[#allocation31_spill] sm:$0xff] %v4706_v34  ;;  %2568 = vmatprep.subr.bf16.mxu0 %v4702_v17  ;;  %v4732_v17 = vld [vmem:[#allocation2 + $0x708] ss:$16 sps:$4 sm:$0xff]  }
 0x54f   :  { %5541 = vst [vmem:[#allocation14_spill] sm:$0xff] %v4606_v33  ;;  %v2173_v9 = vpack.c.bf16 %v4606_v33, %v4606_v33  ;;  %2104 = vmatmul.mubr.bf16.vlgmr.msra.gmra.mxu1 %v1878_v0  ;;  %2569 = vmatpush1.bf16.msra.mxu0 %v4706_v34  ;;  %v4714_v8 = vld [vmem:[#allocation2 + $0x724] ss:$16 sps:$4 sm:$0xff]   ;;  %v4720_v33 = vld [vmem:[#allocation2 + $0x728] ss:$16 sps:$4 sm:$0xff]   ;;  %5567 = vst [vmem:[#allocation72_spill] sm:$0xff] %v4732_v17 }
 0x550   :  { %2113 = vmatpush1.bf16.msra.mxu1 %v4602_v45  ;;  %v1830_v51 = vpop.f32.mrf.mxu0  ;;  %2144 = vmatprep.mubr.bf16.mxu1 %v5433_v15  ;;  %5560 = vst [vmem:[#allocation33_spill] sm:$0xff] %v4714_v8  ;;  %5563 = vst [vmem:[#allocation36_spill] sm:$0xff] %v4720_v33  ;;  %v4728_v34 = vld [vmem:[#allocation2 + $0x70c] ss:$16 sps:$4 sm:$0xff]  }
 0x551   :  { %2590 = vmatprep.mubr.bf16.mxu0 %v2173_v9  ;;  %2114 = vmatprep.subr.bf16.mxu1 %v4608_v7  ;;  %v4718_v51 = vld [vmem:[#allocation2 + $0x720] ss:$16 sps:$4 sm:$0xff]   ;;  %5565 = vst [vmem:[#allocation69_spill] sm:$0xff] %v4728_v34 }
 0x552   :  { %5562 = vst [vmem:[#allocation35_spill] sm:$0xff] %v4718_v51  ;;  %2570 = vmatprep.subr.bf16.mxu0 %v4714_v8  ;;  %v4738_v8 = vld [vmem:[#allocation2 + $0x8ec] ss:$16 sps:$4 sm:$0xff]  }
 0x553   :  { %2571 = vmatpush1.bf16.msra.mxu0 %v4718_v51  ;;  %5569 = vst [vmem:[#allocation38_spill] sm:$0xff] %v4738_v8  ;;  %v4744_v51 = vld [vmem:[#allocation2 + $0x8e8] ss:$16 sps:$4 sm:$0xff]  }
 0x554   :  { %2115 = vmatpush1.bf16.msra.mxu1 %v4613_v52  ;;  %5571 = vst [vmem:[#allocation40_spill] sm:$0xff] %v4744_v51 }
 0x555   :  { %2116 = vmatprep.subr.bf16.mxu1 %v4617_v53 }
 0x558   :  { %2117 = vmatpush1.bf16.msra.mxu1 %v4620_v54 }
 0x559   :  { %2118 = vmatprep.subr.bf16.mxu1 %v4623_v55 }
 0x55c   :  { %2119 = vmatpush1.bf16.msra.mxu1 %v4626_v56 }
 0x55d   :  { %2120 = vmatprep.subr.bf16.mxu1 %v4629_v57 }
 0x560   :  { %2121 = vmatpush1.bf16.msra.mxu1 %v4632_v23 }
 0x561   :  { %2122 = vmatprep.subr.bf16.mxu1 %v4635_v58 }
 0x564   :  { %2123 = vmatpush1.bf16.msra.mxu1 %v4638_v59 }
 0x565   :  { %2124 = vmatprep.subr.bf16.mxu1 %v4641_v60 }
 0x568   :  { %2125 = vmatpush1.bf16.msra.mxu1 %v4644_v61 }
 0x569   :  { %2126 = vmatprep.subr.bf16.mxu1 %v4647_v62 }
 0x56c   :  { %2127 = vmatpush1.bf16.msra.mxu1 %v4650_v2 }
 0x56d   :  { %2599 = vmatprep.subr.bf16.mxu1 %v4653_v3 }
 0x56f   :  { %2145 = vmatmul.mubr.bf16.vlgmr.msra.gmra.mxu1 %v1878_v0  ;;  %v4708_v0 = vld [vmem:[#allocation2 + $0x748] ss:$16 sps:$4 sm:$0xff]  }
 0x570   :  { %2631 = vmatprep.mubr.bf16.mxu1 %v2173_v9  ;;  %2600 = vmatpush1.bf16.msra.mxu1 %v4656_v4  ;;  %5559 = vst [vmem:[#allocation32_spill] sm:$0xff] %v4708_v0  ;;  %v4716_v9 = vld [vmem:[#allocation2 + $0x72c] ss:$16 sps:$4 sm:$0xff]  }
 0x571   :  { %2601 = vmatprep.subr.bf16.mxu1 %v4659_v5  ;;  %5561 = vst [vmem:[#allocation34_spill] sm:$0xff] %v4716_v9 }
 0x574   :  { %2602 = vmatpush1.bf16.msra.mxu1 %v4662_v63 }
 0x575   :  { %2603 = vmatprep.subr.bf16.mxu1 %v4668_v6 }
 0x578   :  { %2604 = vmatpush1.bf16.msra.mxu1 %v4672_v36 }
 0x579   :  { %2605 = vmatprep.subr.bf16.mxu1 %v4680_v31 }
 0x57c   :  { %2606 = vmatpush1.bf16.msra.mxu1 %v4684_v30 }
 0x57d   :  { %2607 = vmatprep.subr.bf16.mxu1 %v4692_v24 }
 0x580   :  { %2608 = vmatpush1.bf16.msra.mxu1 %v4696_v20  ;;  %v4736_v20 = vld [vmem:[#allocation2 + $0x8e4] ss:$16 sps:$4 sm:$0xff]  }
 0x581   :  { %2609 = vmatprep.subr.bf16.mxu1 %v4704_v35  ;;  %v4726_v35 = vld [vmem:[#allocation2 + $0x704] ss:$16 sps:$4 sm:$0xff]   ;;  %5568 = vst [vmem:[#allocation70_spill] sm:$0xff] %v4736_v20 }
 0x582   :  { %5564 = vst [vmem:[#allocation37_spill] sm:$0xff] %v4726_v35  ;;  %2572 = vmatprep.subr.bf16.mxu0 %v4726_v35  ;;  %v4752_v35 = vld [vmem:[#allocation2 + $0x8cc] ss:$16 sps:$4 sm:$0xff]  }
 0x583   :  { %5573 = vst [vmem:[#allocation42_spill] sm:$0xff] %v4752_v35 }
 0x584   :  { %2610 = vmatpush1.bf16.msra.mxu1 %v4708_v0  ;;  %v4730_v0 = vld [vmem:[#allocation2 + $0x700] ss:$16 sps:$4 sm:$0xff]  }
 0x585   :  { %2611 = vmatprep.subr.bf16.mxu1 %v4716_v9  ;;  %5566 = vst [vmem:[#allocation71_spill] sm:$0xff] %v4730_v0  ;;  %2573 = vmatpush1.bf16.msra.mxu0 %v4730_v0  ;;  %v4754_v9 = vld [vmem:[#allocation2 + $0x8c0] ss:$16 sps:$4 sm:$0xff]   ;;  %v4756_v0 = vld [vmem:[#allocation2 + $0x8c8] ss:$16 sps:$4 sm:$0xff]  }
 0x586   :  { %2574 = vmatprep.subr.bf16.mxu0 %v4736_v20  ;;  %5574 = vst [vmem:[#allocation43_spill] sm:$0xff] %v4754_v9  ;;  %5575 = vst [vmem:[#allocation44_spill] sm:$0xff] %v4756_v0  ;;  %v4768_v20 = vld [vmem:[#allocation2 + $0x8a8] ss:$16 sps:$4 sm:$0xff]  }
 0x587   :  { %5579 = vst [vmem:[#allocation48_spill] sm:$0xff] %v4768_v20 }
 0x588   :  { %2612 = vmatpush1.bf16.msra.mxu1 %v4720_v33  ;;  %v4742_v33 = vld [vmem:[#allocation2 + $0x8e0] ss:$16 sps:$4 sm:$0xff]  }
 0x589   :  { %2613 = vmatprep.subr.bf16.mxu1 %v4728_v34  ;;  %5570 = vst [vmem:[#allocation39_spill] sm:$0xff] %v4742_v33  ;;  %2575 = vmatpush2.bf16.msra.mxu0 %v4742_v33  ;;  %v4750_v34 = vld [vmem:[#allocation2 + $0x8c4] ss:$16 sps:$4 sm:$0xff]   ;;  %v4764_v33 = vld [vmem:[#allocation2 + $0x8ac] ss:$16 sps:$4 sm:$0xff]  }
 0x58a   :  { %5572 = vst [vmem:[#allocation41_spill] sm:$0xff] %v4750_v34  ;;  %2576 = vmatprep.subr.bf16.mxu0 %v4750_v34  ;;  %5577 = vst [vmem:[#allocation46_spill] sm:$0xff] %v4764_v33  ;;  %v4780_v34 = vld [vmem:[#allocation2 + $0x888] ss:$16 sps:$4 sm:$0xff]  }
 0x58b   :  { %5583 = vst [vmem:[#allocation51_spill] sm:$0xff] %v4780_v34 }
 0x58c   :  { %2614 = vmatpush1.bf16.msra.mxu1 %v4732_v17  ;;  %v4794_v17 = vld [vmem:[#allocation2 + $0x844] ss:$16 sps:$4 sm:$0xff]  }
 0x58d   :  { %2615 = vmatprep.subr.bf16.mxu1 %v4738_v8  ;;  %2577 = vmatpush2.bf16.msra.mxu0 %v4754_v9  ;;  %v4762_v8 = vld [vmem:[#allocation2 + $0x8a4] ss:$16 sps:$4 sm:$0xff]   ;;  %v4776_v9 = vld [vmem:[#allocation2 + $0x88c] ss:$16 sps:$4 sm:$0xff]   ;;  %5588 = vst [vmem:[#allocation57_spill] sm:$0xff] %v4794_v17 }
 0x58e   :  { %5576 = vst [vmem:[#allocation45_spill] sm:$0xff] %v4762_v8  ;;  %2578 = vmatprep.subr.bf16.mxu0 %v4762_v8  ;;  %5581 = vst [vmem:[#allocation52_spill] sm:$0xff] %v4776_v9  ;;  %v4792_v8 = vld [vmem:[#allocation2 + $0x86c] ss:$16 sps:$4 sm:$0xff]  }
 0x58f   :  { %5587 = vst [vmem:[#allocation56_spill] sm:$0xff] %v4792_v8 }
 0x590   :  { %2616 = vmatpush2.bf16.msra.mxu1 %v4744_v51  ;;  %v4766_v51 = vld [vmem:[#allocation2 + $0x8a0] ss:$16 sps:$4 sm:$0xff]  }
 0x591   :  { %2617 = vmatprep.subr.bf16.mxu1 %v4752_v35  ;;  %5578 = vst [vmem:[#allocation47_spill] sm:$0xff] %v4766_v51  ;;  %2579 = vmatpush2.bf16.msra.mxu0 %v4766_v51  ;;  %v4774_v35 = vld [vmem:[#allocation2 + $0x884] ss:$16 sps:$4 sm:$0xff]  }
 0x592   :  { %5580 = vst [vmem:[#allocation50_spill] sm:$0xff] %v4774_v35  ;;  %2580 = vmatprep.subr.bf16.mxu0 %v4774_v35  ;;  %v4788_v51 = vld [vmem:[#allocation2 + $0x864] ss:$16 sps:$4 sm:$0xff]   ;;  %v4810_v35 = vld [vmem:[#allocation2 + $0x82c] ss:$16 sps:$4 sm:$0xff]  }
 0x593   :  { %5585 = vst [vmem:[#allocation54_spill] sm:$0xff] %v4788_v51  ;;  %5593 = vst [vmem:[#allocation62_spill] sm:$0xff] %v4810_v35 }
 0x594   :  { %2618 = vmatpush2.bf16.msra.mxu1 %v4756_v0  ;;  %v4778_v0 = vld [vmem:[#allocation2 + $0x880] ss:$16 sps:$4 sm:$0xff]  }
 0x595   :  { %2619 = vmatprep.subr.bf16.mxu1 %v4764_v33  ;;  %5582 = vst [vmem:[#allocation49_spill] sm:$0xff] %v4778_v0  ;;  %2581 = vmatpush2.bf16.msra.mxu0 %v4778_v0  ;;  %v4786_v33 = vld [vmem:[#allocation2 + $0x860] ss:$16 sps:$4 sm:$0xff]   ;;  %v4804_v0 = vld [vmem:[#allocation2 + $0x848] ss:$16 sps:$4 sm:$0xff]  }
 0x596   :  { %5584 = vst [vmem:[#allocation53_spill] sm:$0xff] %v4786_v33  ;;  %2582 = vmatprep.subr.bf16.mxu0 %v4788_v51  ;;  %5591 = vst [vmem:[#allocation60_spill] sm:$0xff] %v4804_v0 }
 0x598   :  { %2620 = vmatpush2.bf16.msra.mxu1 %v4768_v20  ;;  %v4790_v20 = vld [vmem:[#allocation2 + $0x868] ss:$16 sps:$4 sm:$0xff]  }
 0x599   :  { %2621 = vmatprep.subr.bf16.mxu1 %v4776_v9  ;;  %5586 = vst [vmem:[#allocation55_spill] sm:$0xff] %v4790_v20  ;;  %2583 = vmatpush2.bf16.msra.mxu0 %v4786_v33  ;;  %v4808_v9 = vld [vmem:[#allocation2 + $0x824] ss:$16 sps:$4 sm:$0xff]   ;;  %v4816_v33 = vld [vmem:[#allocation2 + $0x828] ss:$16 sps:$4 sm:$0xff]  }
 0x59a   :  { %2584 = vmatprep.subr.bf16.mxu0 %v4794_v17  ;;  %5592 = vst [vmem:[#allocation61_spill] sm:$0xff] %v4808_v9  ;;  %5595 = vst [vmem:[#allocation64_spill] sm:$0xff] %v4816_v33  ;;  %v4822_v17 = vld [vmem:[#allocation2 + $0x80c] ss:$16 sps:$4 sm:$0xff]  }
 0x59b   :  { %5597 = vst [vmem:[#allocation9_spill] sm:$0xff] %v4822_v17 }
 0x59c   :  { %2622 = vmatpush2.bf16.msra.mxu1 %v4780_v34  ;;  %v4802_v34 = vld [vmem:[#allocation2 + $0x840] ss:$16 sps:$4 sm:$0xff]  }
 0x59d   :  { %2623 = vmatprep.subr.bf16.mxu1 %v4792_v8  ;;  %5590 = vst [vmem:[#allocation59_spill] sm:$0xff] %v4802_v34  ;;  %2585 = vmatpush2.bf16.msra.mxu0 %v4802_v34  ;;  %v4814_v8 = vld [vmem:[#allocation2 + $0x820] ss:$16 sps:$4 sm:$0xff]   ;;  %v4828_v34 = vld [vmem:[#allocation2 + $0x808] ss:$16 sps:$4 sm:$0xff]  }
 0x59e   :  { %5594 = vst [vmem:[#allocation63_spill] sm:$0xff] %v4814_v8  ;;  %2586 = vmatprep.subr.bf16.mxu0 %v4808_v9  ;;  %5599 = vst [vmem:[#allocation73_spill] sm:$0xff] %v4828_v34 }
 0x5a0   :  { %2624 = vmatpush2.bf16.msra.mxu1 %v4790_v20  ;;  %v4820_v20 = vld [vmem:[#allocation2 + $0x804] ss:$16 sps:$4 sm:$0xff]  }
 0x5a1   :  { %2625 = vmatprep.subr.bf16.mxu1 %v4797_v29  ;;  %5596 = vst [vmem:[#allocation8_spill] sm:$0xff] %v4820_v20  ;;  %2587 = vmatpush2.bf16.msra.mxu0 %v4814_v8  ;;  %v4826_v29 = vld [vmem:[#allocation2 + $0x800] ss:$16 sps:$4 sm:$0xff]  }
 0x5a2   :  { %5598 = vst [vmem:[#allocation10_spill] sm:$0xff] %v4826_v29  ;;  %2588 = vmatprep.subr.bf16.mxu0 %v4820_v20 }
 0x5a4   :  { %2626 = vmatpush2.bf16.msra.mxu1 %v4804_v0 }
 0x5a5   :  { %2627 = vmatprep.subr.bf16.mxu1 %v4810_v35  ;;  %2589 = vmatpush2.bf16.msra.mxu0 %v4826_v29  ;;  %v1833_v35 = vld [vmem:[#allocation4 + $0x3] ss:$8 sm:$0xf] }
 0x5a6   :  { %2659 = vmatprep.subr.bf16.mxu0 %v4531_v11  ;;  %v4837_v8 = vrot.slane %v1833_v35, %v5539_v37  ;;  %v4845_v30 = vrot.slane %v1833_v35, %v5602_v22 }
 0x5a8   :  { %2628 = vmatpush2.bf16.msra.mxu1 %v4816_v33  ;;  %5600 = vst [vmem:[#allocation75_spill] sm:$0xff] %v4837_v8 }
 0x5a9   :  { %2629 = vmatprep.subr.bf16.mxu1 %v4822_v17  ;;  %v4841_v17 = vrot.slane %v1833_v35, %v5540_v32 }
 0x5ab   :  { %5601 = vst [vmem:[#allocation76_spill] sm:$0xff] %v4841_v17 }
 0x5ac   :  { %2630 = vmatpush2.bf16.msra.mxu1 %v4828_v34 }
 0x5ad   :  { %2700 = vmatprep.subr.bf16.mxu1 %v4583_v21 }
 0x60f   :  { %v2105_v33 = vpop.f32.mrf.mxu1 }
 0x610   :  { %v2106_v9 = vadd.f32 %v2105_v33, %v4837_v8 }
 0x611   :  { %v2107_v0 = vpop.f32.mrf.mxu1 }
 0x612   :  { %v3280_v51 = vmul.f32 -1.442695, %v2106_v9  ;;  %v2108_v34 = vadd.f32 %v2107_v0, %v4841_v17  ;;  %v5603_v9 = vld [vmem:[#allocation65_spill] sm:$0xff] }
 0x613   :  { %v2109_v20 = vpop.f32.mrf.mxu1 }
 0x614   :  { %3806 = vpow2.f32 %v3280_v51  ;;  %v3281_v11 = vmul.f32 -1.442695, %v2108_v34  ;;  %v4848_v20 = vrot.slane %v1833_v35, %v5603_v9 }
 0x615   :  { %v2110_v29 = vpop.f32.mrf.mxu1 }
 0x616   :  { %3808 = vpow2.f32 %v3281_v11 }
 0x621   :  { %v3807_v21 = vpop.eup %3806 }
 0x622   :  { %v2156_v24 = vadd.f32 1.0, %v3807_v21 }
 0x623   :  { %v3809_v37 = vpop.eup %3808 }
 0x624   :  { %3810 = vrcp.f32 %v2156_v24  ;;  %v2162_v8 = vadd.f32 1.0, %v3809_v37 }
 0x626   :  { %3812 = vrcp.f32 %v2162_v8  ;;  %v5610_v8 = vld [vmem:[#allocation28_spill] sm:$0xff] }
 0x62f   :  { %v2146_v33 = vpop.f32.mrf.mxu1 }
 0x630   :  { %v2147_v11 = vadd.f32 %v2146_v33, %v4848_v20  ;;  %v5611_v33 = vld [vmem:[#allocation29_spill] sm:$0xff] }
 0x631   :  { %v3811_v51 = vpop.eup %3810  ;;  %v2148_v32 = vpop.f32.mrf.mxu1 }
 0x632   :  { %v2149_v29 = vadd.f32 %v2148_v32, %v4845_v30  ;;  %v5604_v32 = vld [vmem:[#allocation22_spill] sm:$0xff] }
 0x633   :  { %v2150_v48 = vpop.f32.mrf.mxu1  ;;  %v3813_v0 = vpop.eup %3812 }
 0x634   :  { %v2165_v34 = vmul.f32 %v3811_v51, %v2149_v29  ;;  %v2168_v17 = vsub.f32 1.0, %v3813_v0  ;;  %v2170_v37 = vmul.f32 %v3813_v0, %v4600_v26  ;;  %v5605_v26 = vld [vmem:[#allocation23_spill] sm:$0xff]  ;;  %v5607_v48 = vld [vmem:[#allocation25_spill] sm:$0xff]  ;;  %v5614_v29 = vld [vmem:[#allocation32_spill] sm:$0xff] }
 0x635   :  { %v2151_v21 = vpop.f32.mrf.mxu1  ;;  %v5613_v51 = vld [vmem:[#allocation31_spill] sm:$0xff]  ;;  %v5619_v0 = vld [vmem:[#allocation37_spill] sm:$0xff] }
 0x636   :  { %v2166_v24 = vadd.f32 %v2165_v34, %v2147_v11  ;;  %v5615_v11 = vld [vmem:[#allocation33_spill] sm:$0xff]  ;;  %v5616_v34 = vld [vmem:[#allocation34_spill] sm:$0xff]  ;;  %v5617_v21 = vld [vmem:[#allocation35_spill] sm:$0xff] }
 0x638   :  { %3814 = vtanh.f32 %v2166_v24  ;;  %v5618_v24 = vld [vmem:[#allocation36_spill] sm:$0xff] }
 0x645   :  { %v3815_v22 = vpop.eup %3814 }
 0x646   :  { %v2169_v31 = vmul.f32 %v3815_v22, %v2168_v17  ;;  %v5608_v22 = vld [vmem:[#allocation26_spill] sm:$0xff]  ;;  %v5609_v17 = vld [vmem:[#allocation27_spill] sm:$0xff] }
 0x648   :  { %v4853_v35 = vadd.f32 %v2170_v37, %v2169_v31  ;;  %v5606_v31 = vld [vmem:[#allocation24_spill] sm:$0xff]  ;;  %v5620_v37 = vld [vmem:[#allocation69_spill] sm:$0xff] }
 0x64a   :  { %v2172_v9 = vpack.c.bf16 %v4853_v35, %v4853_v35 }
 0x64c   :  { %2591 = vmatmul.mubr.bf16.vlgmr.msra.gmra.mxu0 %v2172_v9  ;;  %2632 = vmatmul.mubr.bf16.vlgmr.msra.gmra.mxu1 %v2172_v9 }
 0x64d   :  { %2660 = vmatpush1.bf16.msra.mxu0 %v4529_v10  ;;  %2701 = vmatpush1.bf16.msra.mxu1 %v4602_v45 }
 0x64e   :  { %2661 = vmatprep.subr.bf16.mxu0 %v4533_v12  ;;  %2702 = vmatprep.subr.bf16.mxu1 %v4608_v7 }
 0x64f   :  { %2691 = vmatprep.mubr.bf16.mxu0 %v5433_v15  ;;  %2732 = vmatprep.mubr.bf16.mxu1 %v5433_v15 }
 0x651   :  { %2662 = vmatpush1.bf16.msra.mxu0 %v4537_v13  ;;  %2703 = vmatpush1.bf16.msra.mxu1 %v4613_v52 }
 0x652   :  { %2663 = vmatprep.subr.bf16.mxu0 %v4540_v38  ;;  %2704 = vmatprep.subr.bf16.mxu1 %v4617_v53 }
 0x655   :  { %2664 = vmatpush1.bf16.msra.mxu0 %v4543_v39  ;;  %2705 = vmatpush1.bf16.msra.mxu1 %v4620_v54 }
 0x656   :  { %2665 = vmatprep.subr.bf16.mxu0 %v4546_v40  ;;  %2706 = vmatprep.subr.bf16.mxu1 %v4623_v55 }
 0x659   :  { %2666 = vmatpush1.bf16.msra.mxu0 %v4549_v41  ;;  %2707 = vmatpush1.bf16.msra.mxu1 %v4626_v56 }
 0x65a   :  { %2667 = vmatprep.subr.bf16.mxu0 %v4552_v42  ;;  %2708 = vmatprep.subr.bf16.mxu1 %v4629_v57 }
 0x65d   :  { %2668 = vmatpush1.bf16.msra.mxu0 %v4555_v43  ;;  %2709 = vmatpush1.bf16.msra.mxu1 %v4632_v23 }
 0x65e   :  { %2669 = vmatprep.subr.bf16.mxu0 %v4558_v46  ;;  %2710 = vmatprep.subr.bf16.mxu1 %v4635_v58 }
 0x661   :  { %2670 = vmatpush1.bf16.msra.mxu0 %v4561_v47  ;;  %2711 = vmatpush1.bf16.msra.mxu1 %v4638_v59 }
 0x662   :  { %2671 = vmatprep.subr.bf16.mxu0 %v4564_v49  ;;  %2712 = vmatprep.subr.bf16.mxu1 %v4641_v60 }
 0x665   :  { %2672 = vmatpush1.bf16.msra.mxu0 %v4567_v50  ;;  %2713 = vmatpush1.bf16.msra.mxu1 %v4644_v61 }
 0x666   :  { %2673 = vmatprep.subr.bf16.mxu0 %v4577_v18  ;;  %2714 = vmatprep.subr.bf16.mxu1 %v4647_v62 }
 0x669   :  { %2674 = vmatpush1.bf16.msra.mxu0 %v4579_v28  ;;  %2715 = vmatpush1.bf16.msra.mxu1 %v4650_v2 }
 0x66a   :  { %2762 = vmatprep.subr.bf16.mxu0 %v4588_v44  ;;  %2803 = vmatprep.subr.bf16.mxu1 %v4653_v3 }
 0x66c   :  { %2692 = vmatmul.mubr.bf16.vlgmr.msra.gmra.mxu0 %v2172_v9  ;;  %2733 = vmatmul.mubr.bf16.vlgmr.msra.gmra.mxu1 %v2172_v9  ;;  %v5612_v9 = vld [vmem:[#allocation30_spill] sm:$0xff] }
 0x66d   :  { %2763 = vmatpush1.bf16.msra.mxu0 %v4586_v25  ;;  %2804 = vmatpush1.bf16.msra.mxu1 %v4656_v4 }
 0x66e   :  { %2764 = vmatprep.subr.bf16.mxu0 %v4590_v27  ;;  %2805 = vmatprep.subr.bf16.mxu1 %v4659_v5 }
 0x671   :  { %2765 = vmatpush1.bf16.msra.mxu0 %v4594_v1  ;;  %2806 = vmatpush1.bf16.msra.mxu1 %v4662_v63 }
 0x672   :  { %2766 = vmatprep.subr.bf16.mxu0 %v4666_v19  ;;  %2807 = vmatprep.subr.bf16.mxu1 %v4668_v6 }
 0x675   :  { %2767 = vmatpush1.bf16.msra.mxu0 %v4670_v16  ;;  %2808 = vmatpush1.bf16.msra.mxu1 %v4672_v36 }
 0x676   :  { %2768 = vmatprep.subr.bf16.mxu0 %v4678_v14  ;;  %2809 = vmatprep.subr.bf16.mxu1 %v5604_v32 }
 0x679   :  { %2769 = vmatpush1.bf16.msra.mxu0 %v5605_v26  ;;  %2810 = vmatpush1.bf16.msra.mxu1 %v5606_v31 }
 0x67a   :  { %2770 = vmatprep.subr.bf16.mxu0 %v5607_v48  ;;  %2811 = vmatprep.subr.bf16.mxu1 %v5608_v22 }
 0x67d   :  { %2771 = vmatpush1.bf16.msra.mxu0 %v5609_v17  ;;  %2812 = vmatpush1.bf16.msra.mxu1 %v5610_v8  ;;  %v5621_v8 = vld [vmem:[#allocation71_spill] sm:$0xff] }
 0x67e   :  { %2772 = vmatprep.subr.bf16.mxu0 %v5611_v33  ;;  %2813 = vmatprep.subr.bf16.mxu1 %v5612_v9  ;;  %v5622_v33 = vld [vmem:[#allocation72_spill] sm:$0xff]  ;;  %v5623_v9 = vld [vmem:[#allocation70_spill] sm:$0xff] }
 0x681   :  { %2773 = vmatpush1.bf16.msra.mxu0 %v5613_v51  ;;  %2814 = vmatpush1.bf16.msra.mxu1 %v5614_v29  ;;  %v5624_v51 = vld [vmem:[#allocation38_spill] sm:$0xff]  ;;  %v5625_v29 = vld [vmem:[#allocation39_spill] sm:$0xff] }
 0x682   :  { %2774 = vmatprep.subr.bf16.mxu0 %v5615_v11  ;;  %2815 = vmatprep.subr.bf16.mxu1 %v5616_v34  ;;  %v5626_v11 = vld [vmem:[#allocation40_spill] sm:$0xff]  ;;  %v5627_v34 = vld [vmem:[#allocation41_spill] sm:$0xff] }
 0x685   :  { %2775 = vmatpush1.bf16.msra.mxu0 %v5617_v21  ;;  %2816 = vmatpush1.bf16.msra.mxu1 %v5618_v24  ;;  %v5628_v21 = vld [vmem:[#allocation42_spill] sm:$0xff]  ;;  %v5629_v24 = vld [vmem:[#allocation43_spill] sm:$0xff] }
 0x686   :  { %2776 = vmatprep.subr.bf16.mxu0 %v5619_v0  ;;  %2817 = vmatprep.subr.bf16.mxu1 %v5620_v37  ;;  %v5630_v0 = vld [vmem:[#allocation44_spill] sm:$0xff]  ;;  %v5631_v37 = vld [vmem:[#allocation45_spill] sm:$0xff] }
 0x689   :  { %2777 = vmatpush1.bf16.msra.mxu0 %v5621_v8  ;;  %2818 = vmatpush1.bf16.msra.mxu1 %v5622_v33  ;;  %v5632_v8 = vld [vmem:[#allocation46_spill] sm:$0xff]  ;;  %v5633_v33 = vld [vmem:[#allocation47_spill] sm:$0xff] }
 0x68a   :  { %2778 = vmatprep.subr.bf16.mxu0 %v5623_v9  ;;  %2819 = vmatprep.subr.bf16.mxu1 %v5624_v51  ;;  %v5634_v9 = vld [vmem:[#allocation48_spill] sm:$0xff]  ;;  %v5635_v51 = vld [vmem:[#allocation50_spill] sm:$0xff] }
 0x68d   :  { %2779 = vmatpush2.bf16.msra.mxu0 %v5625_v29  ;;  %2820 = vmatpush2.bf16.msra.mxu1 %v5626_v11  ;;  %v5636_v29 = vld [vmem:[#allocation52_spill] sm:$0xff]  ;;  %v5637_v11 = vld [vmem:[#allocation49_spill] sm:$0xff] }
 0x68e   :  { %2780 = vmatprep.subr.bf16.mxu0 %v5627_v34  ;;  %2821 = vmatprep.subr.bf16.mxu1 %v5628_v21  ;;  %v5638_v34 = vld [vmem:[#allocation51_spill] sm:$0xff]  ;;  %v5639_v21 = vld [vmem:[#allocation54_spill] sm:$0xff] }
 0x691   :  { %2781 = vmatpush2.bf16.msra.mxu0 %v5629_v24  ;;  %2822 = vmatpush2.bf16.msra.mxu1 %v5630_v0  ;;  %v5640_v24 = vld [vmem:[#allocation56_spill] sm:$0xff]  ;;  %v5641_v0 = vld [vmem:[#allocation53_spill] sm:$0xff] }
 0x692   :  { %2782 = vmatprep.subr.bf16.mxu0 %v5631_v37  ;;  %2823 = vmatprep.subr.bf16.mxu1 %v5632_v8  ;;  %v5642_v37 = vld [vmem:[#allocation55_spill] sm:$0xff]  ;;  %v5643_v8 = vld [vmem:[#allocation57_spill] sm:$0xff] }
 0x695   :  { %2783 = vmatpush2.bf16.msra.mxu0 %v5633_v33  ;;  %2824 = vmatpush2.bf16.msra.mxu1 %v5634_v9  ;;  %v5644_v33 = vld [vmem:[#allocation58_spill] sm:$0xff]  ;;  %v5645_v9 = vld [vmem:[#allocation59_spill] sm:$0xff] }
 0x696   :  { %2784 = vmatprep.subr.bf16.mxu0 %v5635_v51  ;;  %2825 = vmatprep.subr.bf16.mxu1 %v5636_v29  ;;  %v5646_v51 = vld [vmem:[#allocation60_spill] sm:$0xff]  ;;  %v5647_v29 = vld [vmem:[#allocation61_spill] sm:$0xff] }
 0x699   :  { %2785 = vmatpush2.bf16.msra.mxu0 %v5637_v11  ;;  %2826 = vmatpush2.bf16.msra.mxu1 %v5638_v34  ;;  %v5648_v11 = vld [vmem:[#allocation62_spill] sm:$0xff]  ;;  %v5649_v34 = vld [vmem:[#allocation63_spill] sm:$0xff] }
 0x69a   :  { %2786 = vmatprep.subr.bf16.mxu0 %v5639_v21  ;;  %2827 = vmatprep.subr.bf16.mxu1 %v5640_v24  ;;  %v5650_v21 = vld [vmem:[#allocation64_spill] sm:$0xff] }
 0x69b   :  { %v5651_v24 = vld [vmem:[#allocation8_spill] sm:$0xff] }
 0x69d   :  { %2787 = vmatpush2.bf16.msra.mxu0 %v5641_v0  ;;  %2828 = vmatpush2.bf16.msra.mxu1 %v5642_v37  ;;  %v5652_v0 = vld [vmem:[#allocation9_spill] sm:$0xff]  ;;  %v5653_v37 = vld [vmem:[#allocation10_spill] sm:$0xff] }
 0x69e   :  { %2788 = vmatprep.subr.bf16.mxu0 %v5643_v8  ;;  %2829 = vmatprep.subr.bf16.mxu1 %v5644_v33  ;;  %v5654_v8 = vld [vmem:[#allocation73_spill] sm:$0xff]  ;;  %v5655_v33 = vld [vmem:[#allocation11_spill] sm:$0xff] }
 0x6a1   :  { %2789 = vmatpush2.bf16.msra.mxu0 %v5645_v9  ;;  %2830 = vmatpush2.bf16.msra.mxu1 %v5646_v51  ;;  %v5656_v9 = vld [vmem:[#allocation12_spill] sm:$0xff] }
 0x6a2   :  { %2790 = vmatprep.subr.bf16.mxu0 %v5647_v29  ;;  %2831 = vmatprep.subr.bf16.mxu1 %v5648_v11  ;;  %v1856_v51 = vld [vmem:[#allocation4 + $0x4] ss:$8 sm:$0xf] }
 0x6a3   :  { %v5657_v29 = vld [vmem:[#allocation66_spill] sm:$0xff] }
 0x6a4   :  { %v4956_v17 = vrot.slane %v1856_v51, %v5657_v29 }
 0x6a5   :  { %2791 = vmatpush2.bf16.msra.mxu0 %v5649_v34  ;;  %2832 = vmatpush2.bf16.msra.mxu1 %v5650_v21 }
 0x6a6   :  { %2792 = vmatprep.subr.bf16.mxu0 %v5651_v24  ;;  %2833 = vmatprep.subr.bf16.mxu1 %v5652_v0  ;;  %5658 = vst [vmem:[#allocation74_spill] sm:$0xff] %v4956_v17  ;;  %v5659_v0 = vld [vmem:[#allocation68_spill] sm:$0xff] }
 0x6a7   :  { %v4960_v31 = vrot.slane %v1856_v51, %v5659_v0 }
 0x6a9   :  { %2793 = vmatpush2.bf16.msra.mxu0 %v5653_v37  ;;  %2834 = vmatpush2.bf16.msra.mxu1 %v5654_v8  ;;  %5660 = vst [vmem:[#allocation11_spill] sm:$0xff] %v4960_v31 }
 0x6aa   :  { %2863 = vmatprep.subr.bf16.mxu0 %v5655_v33  ;;  %2904 = vmatprep.subr.bf16.mxu1 %v5656_v9 }
 0x70c   :  { %v2592_v11 = vpop.f32.mrf.mxu0  ;;  %v2633_v34 = vpop.f32.mrf.mxu1 }
 0x70d   :  { %v2593_v21 = vadd.f32 %v2592_v11, %v4956_v17  ;;  %v5661_v11 = vld [vmem:[#allocation67_spill] sm:$0xff] }
 0x70e   :  { %v2594_v22 = vpop.f32.mrf.mxu0  ;;  %v2635_v24 = vpop.f32.mrf.mxu1  ;;  %v4964_v17 = vrot.slane %v1856_v51, %v5661_v11 }
 0x70f   :  { %v3346_v48 = vmul.f32 -1.442695, %v2593_v21  ;;  %v2595_v9 = vadd.f32 %v2594_v22, %v4960_v31  ;;  %v5663_v21 = vld [vmem:[#allocation65_spill] sm:$0xff] }
 0x710   :  { %v2596_v37 = vpop.f32.mrf.mxu0  ;;  %v2637_v8 = vpop.f32.mrf.mxu1  ;;  %5662 = vst [vmem:[#allocation12_spill] sm:$0xff] %v4964_v17  ;;  %v4967_v16 = vrot.slane %v1856_v51, %v5663_v21  ;;  %v5665_v21 = vld [vmem:[#allocation76_spill] sm:$0xff] }
 0x711   :  { %3816 = vpow2.f32 %v3346_v48  ;;  %v3347_v32 = vmul.f32 -1.442695, %v2595_v9  ;;  %v2636_v48 = vadd.f32 %v2635_v24, %v4964_v17 }
 0x712   :  { %v2597_v33 = vpop.f32.mrf.mxu0  ;;  %v2638_v26 = vpop.f32.mrf.mxu1 }
 0x713   :  { %3818 = vpow2.f32 %v3347_v32  ;;  %v5664_v26 = vld [vmem:[#allocation75_spill] sm:$0xff] }
 0x71e   :  { %v3817_v29 = vpop.eup %3816 }
 0x71f   :  { %v2643_v14 = vadd.f32 1.0, %v3817_v29  ;;  %v2634_v29 = vadd.f32 %v2633_v34, %v4967_v16 }
 0x720   :  { %v3819_v36 = vpop.eup %3818 }
 0x721   :  { %3820 = vrcp.f32 %v2643_v14  ;;  %v2649_v0 = vadd.f32 1.0, %v3819_v36 }
 0x723   :  { %3822 = vrcp.f32 %v2649_v0  ;;  %v5666_v0 = vld [vmem:[#allocation14_spill] sm:$0xff] }
 0x72c   :  { %v2693_v37 = vpop.f32.mrf.mxu0  ;;  %v2734_v8 = vpop.f32.mrf.mxu1 }
 0x72d   :  { %v2694_v33 = vadd.f32 %v2693_v37, %v5664_v26 }
 0x72e   :  { %v3821_v22 = vpop.eup %3820  ;;  %v2695_v9 = vpop.f32.mrf.mxu0 }
 0x72f   :  { %v2736_v32 = vpop.f32.mrf.mxu1  ;;  %v2652_v14 = vmul.f32 %v3821_v22, %v2636_v48  ;;  %v3348_v31 = vmul.f32 -1.442695, %v2694_v33  ;;  %v2696_v63 = vadd.f32 %v2695_v9, %v5665_v21 }
 0x730   :  { %v2697_v11 = vpop.f32.mrf.mxu0  ;;  %v3823_v37 = vpop.eup %3822 }
 0x731   :  { %v2738_v6 = vpop.f32.mrf.mxu1  ;;  %v2653_v19 = vadd.f32 %v2652_v14, %v2634_v29  ;;  %3824 = vpow2.f32 %v3348_v31  ;;  %v3349_v24 = vmul.f32 -1.442695, %v2696_v63  ;;  %v2655_v1 = vsub.f32 1.0, %v3823_v37 }
 0x732   :  { %v2698_v51 = vpop.f32.mrf.mxu0  ;;  %v2657_v48 = vmul.f32 %v3823_v37, %v5666_v0  ;;  %v2737_v31 = vadd.f32 %v2736_v32, %v4845_v30  ;;  %v5705_v32 = vld [vmem:[#allocation48_spill] sm:$0xff]  ;;  %v5709_v0 = vld [vmem:[#allocation51_spill] sm:$0xff] }
 0x733   :  { %v2739_v36 = vpop.f32.mrf.mxu1  ;;  %3826 = vtanh.f32 %v2653_v19  ;;  %v5707_v37 = vld [vmem:[#allocation52_spill] sm:$0xff] }
 0x734   :  { %3828 = vpow2.f32 %v3349_v24  ;;  %v5706_v24 = vld [vmem:[#allocation50_spill] sm:$0xff] }
 0x73e   :  { %v3825_v26 = vpop.eup %3824 }
 0x73f   :  { %v2744_v17 = vadd.f32 1.0, %v3825_v26 }
 0x740   :  { %v3827_v5 = vpop.eup %3826 }
 0x741   :  { %3830 = vrcp.f32 %v2744_v17  ;;  %v2656_v34 = vmul.f32 %v3827_v5, %v2655_v1  ;;  %v3829_v63 = vpop.eup %3828  ;;  %v2735_v1 = vadd.f32 %v2734_v8, %v4848_v20  ;;  %v5704_v8 = vld [vmem:[#allocation47_spill] sm:$0xff] }
 0x742   :  { %v2750_v19 = vadd.f32 1.0, %v3829_v63  ;;  %v5712_v63 = vld [vmem:[#allocation53_spill] sm:$0xff] }
 0x743   :  { %v4974_v33 = vadd.f32 %v2657_v48, %v2656_v34  ;;  %v5708_v34 = vld [vmem:[#allocation49_spill] sm:$0xff]  ;;  %v5710_v48 = vld [vmem:[#allocation54_spill] sm:$0xff] }
 0x744   :  { %3832 = vrcp.f32 %v2750_v19  ;;  %v5713_v19 = vld [vmem:[#allocation55_spill] sm:$0xff] }
 0x745   :  { %v2761_v6 = vpack.c.bf16 %v4974_v33, %v4974_v33  ;;  %3067 = vst [vmem:[%s5108_s3] sm:$0xff] %v4974_v33 }
 0x747   :  { %2794 = vmatprep.mubr.bf16.mxu0 %v2761_v6  ;;  %2835 = vmatprep.mubr.bf16.mxu1 %v2761_v6  ;;  %v5711_v6 = vld [vmem:[#allocation56_spill] sm:$0xff] }
 0x74e   :  { %v3831_v17 = vpop.eup %3830 }
 0x74f   :  { %v2753_v5 = vmul.f32 %v3831_v17, %v2737_v31  ;;  %v5714_v31 = vld [vmem:[#allocation57_spill] sm:$0xff]  ;;  %v5715_v17 = vld [vmem:[#allocation58_spill] sm:$0xff] }
 0x751   :  { %v2754_v26 = vadd.f32 %v2753_v5, %v2735_v1  ;;  %v3833_v22 = vpop.eup %3832  ;;  %v5716_v1 = vld [vmem:[#allocation59_spill] sm:$0xff]  ;;  %v5717_v5 = vld [vmem:[#allocation60_spill] sm:$0xff] }
 0x752   :  { %v2756_v9 = vsub.f32 1.0, %v3833_v22  ;;  %v2758_v11 = vmul.f32 %v3833_v22, %v4853_v35  ;;  %v5703_v35 = vld [vmem:[#allocation46_spill] sm:$0xff] }
 0x753   :  { %3834 = vtanh.f32 %v2754_v26  ;;  %v5718_v26 = vld [vmem:[#allocation61_spill] sm:$0xff]  ;;  %v5719_v22 = vld [vmem:[#allocation62_spill] sm:$0xff] }
 0x760   :  { %v3835_v29 = vpop.eup %3834 }
 0x761   :  { %v2757_v14 = vmul.f32 %v3835_v29, %v2756_v9  ;;  %v5720_v9 = vld [vmem:[#allocation63_spill] sm:$0xff]  ;;  %v5721_v29 = vld [vmem:[#allocation64_spill] sm:$0xff] }
 0x763   :  { %v4985_v51 = vadd.f32 %v2758_v11, %v2757_v14  ;;  %v5722_v14 = vld [vmem:[#allocation8_spill] sm:$0xff]  ;;  %v5723_v11 = vld [vmem:[#allocation9_spill] sm:$0xff] }
 0x765   :  { %v2760_v36 = vpack.c.bf16 %v4985_v51, %v4985_v51 }
 0x767   :  { %2795 = vmatmul.mubr.bf16.vlgmr.msra.gmra.mxu0 %v2760_v36  ;;  %2836 = vmatmul.mubr.bf16.vlgmr.msra.gmra.mxu1 %v2760_v36 }
 0x768   :  { %2864 = vmatpush1.bf16.msra.mxu0 %v4529_v10  ;;  %2905 = vmatpush1.bf16.msra.mxu1 %v4602_v45  ;;  %v5668_v10 = vld [vmem:[#allocation13_spill] sm:$0xff] }
 0x769   :  { %2865 = vmatprep.subr.bf16.mxu0 %v4533_v12  ;;  %2906 = vmatprep.subr.bf16.mxu1 %v4608_v7  ;;  %v5669_v12 = vld [vmem:[#allocation16_spill] sm:$0xff]  ;;  %v5686_v45 = vld [vmem:[#allocation33_spill] sm:$0xff]  ;;  %v5687_v7 = vld [vmem:[#allocation34_spill] sm:$0xff] }
 0x76a   :  { %2895 = vmatprep.mubr.bf16.mxu0 %v5433_v15  ;;  %2936 = vmatprep.mubr.bf16.mxu1 %v5433_v15  ;;  %v5667_v15 = vld [vmem:[#allocation15_spill] sm:$0xff] }
 0x76c   :  { %2866 = vmatpush1.bf16.msra.mxu0 %v4537_v13  ;;  %2907 = vmatpush1.bf16.msra.mxu1 %v4613_v52  ;;  %v5670_v13 = vld [vmem:[#allocation17_spill] sm:$0xff]  ;;  %v5688_v52 = vld [vmem:[#allocation35_spill] sm:$0xff] }
 0x76d   :  { %2867 = vmatprep.subr.bf16.mxu0 %v4540_v38  ;;  %2908 = vmatprep.subr.bf16.mxu1 %v4617_v53  ;;  %v5671_v38 = vld [vmem:[#allocation18_spill] sm:$0xff]  ;;  %v5689_v53 = vld [vmem:[#allocation36_spill] sm:$0xff] }
 0x770   :  { %2868 = vmatpush1.bf16.msra.mxu0 %v4543_v39  ;;  %2909 = vmatpush1.bf16.msra.mxu1 %v4620_v54  ;;  %v5672_v39 = vld [vmem:[#allocation19_spill] sm:$0xff]  ;;  %v5690_v54 = vld [vmem:[#allocation37_spill] sm:$0xff] }
 0x771   :  { %2869 = vmatprep.subr.bf16.mxu0 %v4546_v40  ;;  %2910 = vmatprep.subr.bf16.mxu1 %v4623_v55  ;;  %v5673_v40 = vld [vmem:[#allocation20_spill] sm:$0xff]  ;;  %v5691_v55 = vld [vmem:[#allocation69_spill] sm:$0xff] }
 0x774   :  { %2870 = vmatpush1.bf16.msra.mxu0 %v4549_v41  ;;  %2911 = vmatpush1.bf16.msra.mxu1 %v4626_v56  ;;  %v5674_v41 = vld [vmem:[#allocation21_spill] sm:$0xff]  ;;  %v5692_v56 = vld [vmem:[#allocation71_spill] sm:$0xff] }
 0x775   :  { %2871 = vmatprep.subr.bf16.mxu0 %v4552_v42  ;;  %2912 = vmatprep.subr.bf16.mxu1 %v4629_v57  ;;  %v5675_v42 = vld [vmem:[#allocation22_spill] sm:$0xff]  ;;  %v5693_v57 = vld [vmem:[#allocation72_spill] sm:$0xff] }
 0x778   :  { %2872 = vmatpush1.bf16.msra.mxu0 %v4555_v43  ;;  %2913 = vmatpush1.bf16.msra.mxu1 %v4632_v23  ;;  %v5676_v43 = vld [vmem:[#allocation23_spill] sm:$0xff]  ;;  %v5694_v23 = vld [vmem:[#allocation70_spill] sm:$0xff] }
 0x779   :  { %2873 = vmatprep.subr.bf16.mxu0 %v4558_v46  ;;  %2914 = vmatprep.subr.bf16.mxu1 %v4635_v58  ;;  %v5677_v46 = vld [vmem:[#allocation24_spill] sm:$0xff]  ;;  %v5695_v58 = vld [vmem:[#allocation38_spill] sm:$0xff] }
 0x77c   :  { %2874 = vmatpush1.bf16.msra.mxu0 %v4561_v47  ;;  %2915 = vmatpush1.bf16.msra.mxu1 %v4638_v59  ;;  %v5678_v47 = vld [vmem:[#allocation25_spill] sm:$0xff]  ;;  %v5696_v59 = vld [vmem:[#allocation39_spill] sm:$0xff] }
 0x77d   :  { %2875 = vmatprep.subr.bf16.mxu0 %v4564_v49  ;;  %2916 = vmatprep.subr.bf16.mxu1 %v4641_v60  ;;  %v5679_v49 = vld [vmem:[#allocation26_spill] sm:$0xff]  ;;  %v5697_v60 = vld [vmem:[#allocation40_spill] sm:$0xff] }
 0x780   :  { %2876 = vmatpush1.bf16.msra.mxu0 %v4567_v50  ;;  %2917 = vmatpush1.bf16.msra.mxu1 %v4644_v61  ;;  %v5680_v50 = vld [vmem:[#allocation27_spill] sm:$0xff]  ;;  %v5698_v61 = vld [vmem:[#allocation41_spill] sm:$0xff] }
 0x781   :  { %2877 = vmatprep.subr.bf16.mxu0 %v4577_v18  ;;  %2918 = vmatprep.subr.bf16.mxu1 %v4647_v62  ;;  %v5681_v18 = vld [vmem:[#allocation28_spill] sm:$0xff]  ;;  %v5699_v62 = vld [vmem:[#allocation42_spill] sm:$0xff] }
 0x784   :  { %2878 = vmatpush1.bf16.msra.mxu0 %v4579_v28  ;;  %2919 = vmatpush1.bf16.msra.mxu1 %v4650_v2  ;;  %v5682_v28 = vld [vmem:[#allocation29_spill] sm:$0xff]  ;;  %v5700_v2 = vld [vmem:[#allocation43_spill] sm:$0xff] }
 0x785   :  { %2966 = vmatprep.subr.bf16.mxu0 %v4588_v44  ;;  %3007 = vmatprep.subr.bf16.mxu1 %v4653_v3  ;;  %v5684_v44 = vld [vmem:[#allocation31_spill] sm:$0xff]  ;;  %v5701_v3 = vld [vmem:[#allocation44_spill] sm:$0xff] }
 0x787   :  { %2896 = vmatmul.mubr.bf16.vlgmr.msra.gmra.mxu0 %v2760_v36  ;;  %2937 = vmatmul.mubr.bf16.vlgmr.msra.gmra.mxu1 %v2760_v36  ;;  %v5724_v36 = vld [vmem:[#allocation10_spill] sm:$0xff] }
 0x788   :  { %2967 = vmatpush1.bf16.msra.mxu0 %v4586_v25  ;;  %3008 = vmatpush1.bf16.msra.mxu1 %v4656_v4  ;;  %v5683_v25 = vld [vmem:[#allocation30_spill] sm:$0xff]  ;;  %v5702_v4 = vld [vmem:[#allocation45_spill] sm:$0xff] }
 0x789   :  { %2968 = vmatprep.subr.bf16.mxu0 %v4590_v27  ;;  %3009 = vmatprep.subr.bf16.mxu1 %v5667_v15  ;;  %v5685_v27 = vld [vmem:[#allocation32_spill] sm:$0xff]  ;;  %v5725_v15 = vld [vmem:[#allocation73_spill] sm:$0xff] }
 0x78c   :  { %2969 = vmatpush1.bf16.msra.mxu0 %v5668_v10  ;;  %3010 = vmatpush1.bf16.msra.mxu1 %v5669_v12 }
 0x78d   :  { %2970 = vmatprep.subr.bf16.mxu0 %v5670_v13  ;;  %3011 = vmatprep.subr.bf16.mxu1 %v5671_v38  ;;  %v5726_v13 = vld [vmem:[#allocation74_spill] sm:$0xff] }
 0x790   :  { %2971 = vmatpush1.bf16.msra.mxu0 %v5672_v39  ;;  %3012 = vmatpush1.bf16.msra.mxu1 %v5673_v40 }
 0x791   :  { %2972 = vmatprep.subr.bf16.mxu0 %v5674_v41  ;;  %3013 = vmatprep.subr.bf16.mxu1 %v5675_v42 }
 0x794   :  { %2973 = vmatpush1.bf16.msra.mxu0 %v5676_v43  ;;  %3014 = vmatpush1.bf16.msra.mxu1 %v5677_v46 }
 0x795   :  { %2974 = vmatprep.subr.bf16.mxu0 %v5678_v47  ;;  %3015 = vmatprep.subr.bf16.mxu1 %v5679_v49  ;;  %v5727_v49 = vld [vmem:[#allocation11_spill] sm:$0xff] }
 0x798   :  { %2975 = vmatpush1.bf16.msra.mxu0 %v5680_v50  ;;  %3016 = vmatpush1.bf16.msra.mxu1 %v5681_v18 }
 0x799   :  { %2976 = vmatprep.subr.bf16.mxu0 %v5682_v28  ;;  %3017 = vmatprep.subr.bf16.mxu1 %v5683_v25 }
 0x79c   :  { %2977 = vmatpush1.bf16.msra.mxu0 %v5684_v44  ;;  %3018 = vmatpush1.bf16.msra.mxu1 %v5685_v27 }
 0x79d   :  { %2978 = vmatprep.subr.bf16.mxu0 %v5686_v45  ;;  %3019 = vmatprep.subr.bf16.mxu1 %v5687_v7 }
 0x7a0   :  { %2979 = vmatpush1.bf16.msra.mxu0 %v5688_v52  ;;  %3020 = vmatpush1.bf16.msra.mxu1 %v5689_v53  ;;  %v5728_v52 = vld [vmem:[#allocation12_spill] sm:$0xff] }
 0x7a1   :  { %2980 = vmatprep.subr.bf16.mxu0 %v5690_v54  ;;  %3021 = vmatprep.subr.bf16.mxu1 %v5691_v55  ;;  %v5729_v54 = vld [vmem:[#allocation75_spill] sm:$0xff] }
 0x7a4   :  { %2981 = vmatpush1.bf16.msra.mxu0 %v5692_v56  ;;  %3022 = vmatpush1.bf16.msra.mxu1 %v5693_v57 }
 0x7a5   :  { %2982 = vmatprep.subr.bf16.mxu0 %v5694_v23  ;;  %3023 = vmatprep.subr.bf16.mxu1 %v5695_v58 }
 0x7a8   :  { %2983 = vmatpush2.bf16.msra.mxu0 %v5696_v59  ;;  %3024 = vmatpush2.bf16.msra.mxu1 %v5697_v60 }
 0x7a9   :  { %2984 = vmatprep.subr.bf16.mxu0 %v5698_v61  ;;  %3025 = vmatprep.subr.bf16.mxu1 %v5699_v62 }
 0x7ac   :  { %2985 = vmatpush2.bf16.msra.mxu0 %v5700_v2  ;;  %3026 = vmatpush2.bf16.msra.mxu1 %v5701_v3 }
 0x7ad   :  { %2986 = vmatprep.subr.bf16.mxu0 %v5702_v4  ;;  %3027 = vmatprep.subr.bf16.mxu1 %v5703_v35 }
 0x7b0   :  { %2987 = vmatpush2.bf16.msra.mxu0 %v5704_v8  ;;  %3028 = vmatpush2.bf16.msra.mxu1 %v5705_v32 }
 0x7b1   :  { %2988 = vmatprep.subr.bf16.mxu0 %v5706_v24  ;;  %3029 = vmatprep.subr.bf16.mxu1 %v5707_v37 }
 0x7b4   :  { %2989 = vmatpush2.bf16.msra.mxu0 %v5708_v34  ;;  %3030 = vmatpush2.bf16.msra.mxu1 %v5709_v0 }
 0x7b5   :  { %2990 = vmatprep.subr.bf16.mxu0 %v5710_v48  ;;  %3031 = vmatprep.subr.bf16.mxu1 %v5711_v6 }
 0x7b8   :  { %2991 = vmatpush2.bf16.msra.mxu0 %v5712_v63  ;;  %3032 = vmatpush2.bf16.msra.mxu1 %v5713_v19 }
 0x7b9   :  { %2992 = vmatprep.subr.bf16.mxu0 %v5714_v31  ;;  %3033 = vmatprep.subr.bf16.mxu1 %v5715_v17 }
 0x7bc   :  { %2993 = vmatpush2.bf16.msra.mxu0 %v5716_v1  ;;  %3034 = vmatpush2.bf16.msra.mxu1 %v5717_v5 }
 0x7bd   :  { %2994 = vmatprep.subr.bf16.mxu0 %v5718_v26  ;;  %3035 = vmatprep.subr.bf16.mxu1 %v5719_v22 }
 0x7c0   :  { %2995 = vmatpush2.bf16.msra.mxu0 %v5720_v9  ;;  %3036 = vmatpush2.bf16.msra.mxu1 %v5721_v29 }
 0x7c1   :  { %2996 = vmatprep.subr.bf16.mxu0 %v5722_v14  ;;  %3037 = vmatprep.subr.bf16.mxu1 %v5723_v11 }
 0x7c4   :  { %2997 = vmatpush2.bf16.msra.mxu0 %v5724_v36  ;;  %3038 = vmatpush2.bf16.msra.mxu1 %v5725_v15 }
 0x827   :  { %v2796_v10 = vpop.f32.mrf.mxu0  ;;  %v2837_v12 = vpop.f32.mrf.mxu1 }
 0x828   :  { %v2797_v38 = vadd.f32 %v2796_v10, %v5726_v13  ;;  %v2838_v58 = vadd.f32 %v2837_v12, %v4967_v16 }
 0x829   :  { %v2798_v39 = vpop.f32.mrf.mxu0  ;;  %v2839_v40 = vpop.f32.mrf.mxu1 }
 0x82a   :  { %v3350_v41 = vmul.f32 -1.442695, %v2797_v38  ;;  %v2799_v50 = vadd.f32 %v2798_v39, %v5727_v49  ;;  %v2840_v53 = vadd.f32 %v2839_v40, %v5728_v52 }
 0x82b   :  { %v2800_v42 = vpop.f32.mrf.mxu0  ;;  %v2841_v43 = vpop.f32.mrf.mxu1 }
 0x82c   :  { %3836 = vpow2.f32 %v3350_v41  ;;  %v3351_v18 = vmul.f32 -1.442695, %v2799_v50 }
 0x82d   :  { %v2801_v46 = vpop.f32.mrf.mxu0  ;;  %v2842_v47 = vpop.f32.mrf.mxu1 }
 0x82e   :  { %3838 = vpow2.f32 %v3351_v18 }
 0x839   :  { %v3837_v28 = vpop.eup %3836 }
 0x83a   :  { %v2847_v25 = vadd.f32 1.0, %v3837_v28 }
 0x83b   :  { %v3839_v44 = vpop.eup %3838 }
 0x83c   :  { %3840 = vrcp.f32 %v2847_v25  ;;  %v2853_v27 = vadd.f32 1.0, %v3839_v44 }
 0x83e   :  { %3842 = vrcp.f32 %v2853_v27 }
 0x847   :  { %v2897_v45 = vpop.f32.mrf.mxu0  ;;  %v2938_v7 = vpop.f32.mrf.mxu1 }
 0x848   :  { %v2898_v55 = vadd.f32 %v2897_v45, %v5729_v54  ;;  %v2939_v5 = vadd.f32 %v2938_v7, %v4848_v20 }
 0x849   :  { %v3841_v56 = vpop.eup %3840  ;;  %v2899_v57 = vpop.f32.mrf.mxu0 }
 0x84a   :  { %v2940_v23 = vpop.f32.mrf.mxu1  ;;  %v2856_v59 = vmul.f32 %v3841_v56, %v2840_v53  ;;  %v3352_v60 = vmul.f32 -1.442695, %v2898_v55  ;;  %v2900_v35 = vadd.f32 %v2899_v57, %v5665_v21 }
 0x84b   :  { %v2901_v61 = vpop.f32.mrf.mxu0  ;;  %v3843_v32 = vpop.eup %3842  ;;  %v2941_v17 = vadd.f32 %v2940_v23, %v4845_v30 }
 0x84c   :  { %v2942_v62 = vpop.f32.mrf.mxu1  ;;  %v2857_v2 = vadd.f32 %v2856_v59, %v2838_v58  ;;  %3844 = vpow2.f32 %v3352_v60  ;;  %v3353_v8 = vmul.f32 -1.442695, %v2900_v35  ;;  %v2859_v34 = vsub.f32 1.0, %v3843_v32 }
 0x84d   :  { %v2902_v3 = vpop.f32.mrf.mxu0  ;;  %v2861_v6 = vmul.f32 %v3843_v32, %v4974_v33 }
 0x84e   :  { %v2943_v4 = vpop.f32.mrf.mxu1  ;;  %3846 = vtanh.f32 %v2857_v2 }
 0x84f   :  { %3848 = vpow2.f32 %v3353_v8 }
 0x859   :  { %v3845_v24 = vpop.eup %3844 }
 0x85a   :  { %v2948_v37 = vadd.f32 1.0, %v3845_v24 }
 0x85b   :  { %v3847_v0 = vpop.eup %3846 }
 0x85c   :  { %3850 = vrcp.f32 %v2948_v37  ;;  %v2860_v48 = vmul.f32 %v3847_v0, %v2859_v34  ;;  %v3849_v21 = vpop.eup %3848 }
 0x85d   :  { %v2954_v31 = vadd.f32 1.0, %v3849_v21 }
 0x85e   :  { %v2862_v63 = vadd.f32 %v2861_v6, %v2860_v48 }
 0x85f   :  { %3852 = vrcp.f32 %v2954_v31 }
 0x860   :  { %v2965_v19 = vpack.c.bf16 %v2862_v63, %v2862_v63  ;;  %3068 = vst [vmem:[%s5108_s3 + $0x8] sm:$0xff] %v2862_v63 }
 0x862   :  { %2998 = vmatprep.mubr.bf16.mxu0 %v2965_v19  ;;  %3039 = vmatprep.mubr.bf16.mxu1 %v2965_v19 }
 0x869   :  { %v3851_v1 = vpop.eup %3850 }
 0x86a   :  { %v2957_v26 = vmul.f32 %v3851_v1, %v2941_v17 }
 0x86c   :  { %v2958_v22 = vadd.f32 %v2957_v26, %v2939_v5  ;;  %v3853_v33 = vpop.eup %3852 }
 0x86d   :  { %v2960_v9 = vsub.f32 1.0, %v3853_v33  ;;  %v2962_v11 = vmul.f32 %v3853_v33, %v4985_v51 }
 0x86e   :  { %3854 = vtanh.f32 %v2958_v22 }
 0x87b   :  { %v3855_v29 = vpop.eup %3854 }
 0x87c   :  { %v2961_v14 = vmul.f32 %v3855_v29, %v2960_v9 }
 0x87e   :  { %v2963_v36 = vadd.f32 %v2962_v11, %v2961_v14 }
 0x880   :  { %v2964_v15 = vpack.c.bf16 %v2963_v36, %v2963_v36 }
 0x882   :  { %2999 = vmatmul.mubr.bf16.vlgmr.msra.gmra.mxu0 %v2964_v15  ;;  %3040 = vmatmul.mubr.bf16.vlgmr.msra.gmra.mxu1 %v2964_v15 }
 0x942   :  { %v3000_v10 = vpop.f32.mrf.mxu0  ;;  %v3041_v12 = vpop.f32.mrf.mxu1 }
 0x943   :  { %v3001_v30 = vadd.f32 %v3000_v10, %v5726_v13  ;;  %v3042_v44 = vadd.f32 %v3041_v12, %v4967_v16 }
 0x944   :  { %v3002_v38 = vpop.f32.mrf.mxu0  ;;  %v3043_v20 = vpop.f32.mrf.mxu1 }
 0x945   :  { %v3354_v39 = vmul.f32 -1.442695, %v3001_v30  ;;  %v3003_v46 = vadd.f32 %v3002_v38, %v5727_v49  ;;  %v3044_v25 = vadd.f32 %v3043_v20, %v5728_v52 }
 0x946   :  { %v3004_v40 = vpop.f32.mrf.mxu0  ;;  %v3045_v41 = vpop.f32.mrf.mxu1 }
 0x947   :  { %3856 = vpow2.f32 %v3354_v39  ;;  %v3355_v47 = vmul.f32 -1.442695, %v3003_v46 }
 0x948   :  { %v3005_v42 = vpop.f32.mrf.mxu0  ;;  %v3046_v43 = vpop.f32.mrf.mxu1 }
 0x949   :  { %3858 = vpow2.f32 %v3355_v47 }
 0x954   :  { %v3857_v51 = vpop.eup %3856 }
 0x955   :  { %v3051_v50 = vadd.f32 1.0, %v3857_v51 }
 0x956   :  { %v3859_v18 = vpop.eup %3858 }
 0x957   :  { %3860 = vrcp.f32 %v3051_v50  ;;  %v3057_v28 = vadd.f32 1.0, %v3859_v18 }
 0x959   :  { %3862 = vrcp.f32 %v3057_v28 }
 0x964   :  { %v3861_v13 = vpop.eup %3860 }
 0x965   :  { %v3060_v27 = vmul.f32 %v3861_v13, %v3044_v25 }
 0x966   :  { %v3863_v7 = vpop.eup %3862 }
 0x967   :  { %v3061_v45 = vadd.f32 %v3060_v27, %v3042_v44  ;;  %v3063_v53 = vsub.f32 1.0, %v3863_v7  ;;  %v3065_v49 = vmul.f32 %v3863_v7, %v2862_v63 }
 0x969   :  { %3864 = vtanh.f32 %v3061_v45 }
 0x976   :  { %v3865_v54 = vpop.eup %3864 }
 0x977   :  { %v3064_v55 = vmul.f32 %v3865_v54, %v3063_v53 }
 0x979   :  { %v3066_v56 = vadd.f32 %v3065_v49, %v3064_v55 }
 0x97b   :  { %3069 = vst [vmem:[%s5108_s3 + $0x10] sm:$0xff] %v3066_v56 }
 0x97c   :  { %3074 = vsyncpa [#allocation3], 1 }
 0x97d   :  { %3075 = vsyncpa [#allocation5], 1 }

</bundles_post_ra>
